<compile_context>
chip_gen: v6e
topology: v6e:2x2x1
jax: 0.10.0
libtpu: 0.0.40
codegen_flags: <defaults>
</compile_context>

<pallas_src>
import functools
import math

import jax
import jax.numpy as jnp
from jax.experimental import pallas as pl
from jax.experimental.pallas import tpu as pltpu

_EPS = 1e-5


# ---------------------------------------------------------------------------
# helpers (used both inside kernels and in the pure-JAX reference)
# ---------------------------------------------------------------------------
def _layer_norm(x, g, b, eps=_EPS):
    m = jnp.mean(x, axis=-1, keepdims=True)
    v = jnp.mean(jnp.square(x - m), axis=-1, keepdims=True)
    return (x - m) * jax.lax.rsqrt(v + eps) * g + b


def _sigmoid(x):
    return 1.0 / (1.0 + jnp.exp(-x))


def _swish(x):
    return x * _sigmoid(x)


def _bf16(w):
    return w.astype(jnp.bfloat16)


def _pick_tile(n, max_tile):
    """Largest tile <= max_tile that divides n and is a multiple of 8 (else n itself)."""
    if n <= max_tile:
        return n
    t = max_tile - (max_tile % 8)
    while t >= 8:
        if n % t == 0:
            return t
        t -= 8
    return n


def _full_spec(shape):
    """Whole-array block, same block for every grid step (any grid rank)."""
    n = len(shape)
    return pl.BlockSpec(shape, lambda *_, n=n: (0,) * n)


def _vmem_limit_bytes():
    """Generation-aware scoped-VMEM budget (v5e/v6e: 128 MiB physical, v7x: 64 MiB)."""
    try:
        cap = pltpu.get_tpu_info().vmem_capacity_bytes
    except Exception:
        cap = 64 * 1024 * 1024
    return int(min(cap * 3 // 4, 100 * 1024 * 1024))


def _compiler_params(dimension_semantics):
    return pltpu.CompilerParams(
        dimension_semantics=dimension_semantics,
        vmem_limit_bytes=_vmem_limit_bytes(),
    )


# ---------------------------------------------------------------------------
# 1) Feed-forward module with half-step residual:  y = x + 1/2 * FFN(LN(x))
#    (optionally fused with the block's final LayerNorm for ff_module2)
# ---------------------------------------------------------------------------
def _ffn_half_kernel(x_ref, g_ref, b_ref, w1_ref, b1_ref, w2_ref, b2_ref,
                     gf_ref, bf_ref, o_ref, *, with_final_ln):
    x = x_ref[...].astype(jnp.float32)                                   # (TR, D)
    xn = _layer_norm(x, g_ref[...], b_ref[...])
    h = jnp.dot(xn.astype(jnp.bfloat16), w1_ref[...],
                preferred_element_type=jnp.float32) + b1_ref[...]
    h = _swish(h)
    y = jnp.dot(h.astype(jnp.bfloat16), w2_ref[...],
                preferred_element_type=jnp.float32) + b2_ref[...]
    out = x + 0.5 * y
    if with_final_ln:                                                    # static branch
        out = _layer_norm(out, gf_ref[...], bf_ref[...])
    o_ref[...] = out.astype(o_ref.dtype)


def _ffn_half(x, p, pre, final_ln_g=None, final_ln_b=None):
    B, T, D = x.shape
    Dff = p[pre + "_w1"].shape[1]
    R = B * T
    TR = _pick_tile(R, 256)
    with_final_ln = final_ln_g is not None
    gf = final_ln_g if with_final_ln else p[pre + "_ln_g"]
    bf = final_ln_b if with_final_ln else p[pre + "_ln_b"]

    out = pl.pallas_call(
        functools.partial(_ffn_half_kernel, with_final_ln=with_final_ln),
        out_shape=jax.ShapeDtypeStruct((R, D), x.dtype),
        grid_spec=pltpu.PrefetchScalarGridSpec(
            num_scalar_prefetch=0,
            grid=(R // TR,),
            in_specs=[
                pl.BlockSpec((TR, D), lambda i: (i, 0)),                 # x rows
                _full_spec((1, D)), _full_spec((1, D)),                  # LN gamma / beta
                _full_spec((D, Dff)), _full_spec((1, Dff)),              # W1, b1
                _full_spec((Dff, D)), _full_spec((1, D)),                # W2, b2
                _full_spec((1, D)), _full_spec((1, D)),                  # final LN gamma / beta
            ],
            out_specs=pl.BlockSpec((TR, D), lambda i: (i, 0)),
        ),
        compiler_params=_compiler_params(("parallel",)),
    )(x.reshape(R, D),
      p[pre + "_ln_g"], p[pre + "_ln_b"],
      _bf16(p[pre + "_w1"]), p[pre + "_b1"],
      _bf16(p[pre + "_w2"]), p[pre + "_b2"],
      gf, bf)
    return out.reshape(B, T, D)


# ---------------------------------------------------------------------------
# 2) K/V projection (row-tiled, bf16 outputs). apply_ln=True for self-attention
#    (K/V come from the pre-normed x); False for cross-attention (raw x_enc).
# ---------------------------------------------------------------------------
def _kv_proj_kernel(x_ref, g_ref, b_ref, wk_ref, bk_ref, wv_ref, bv_ref,
                    k_ref, v_ref, *, apply_ln):
    x = x_ref[...].astype(jnp.float32)                                   # (TR, D)
    if apply_ln:
        x = _layer_norm(x, g_ref[...], b_ref[...])
    xb = x.astype(jnp.bfloat16)
    k = jnp.dot(xb, wk_ref[...], preferred_element_type=jnp.float32) + bk_ref[...]
    v = jnp.dot(xb, wv_ref[...], preferred_element_type=jnp.float32) + bv_ref[...]
    k_ref[...] = k.astype(k_ref.dtype)
    v_ref[...] = v.astype(v_ref.dtype)


def _kv_proj(src, p, pre, apply_ln):
    B, Tk, D = src.shape
    R = B * Tk
    TR = _pick_tile(R, 256)
    k, v = pl.pallas_call(
        functools.partial(_kv_proj_kernel, apply_ln=apply_ln),
        out_shape=[jax.ShapeDtypeStruct((R, D), jnp.bfloat16),
                   jax.ShapeDtypeStruct((R, D), jnp.bfloat16)],
        grid_spec=pltpu.PrefetchScalarGridSpec(
            num_scalar_prefetch=0,
            grid=(R // TR,),
            in_specs=[
                pl.BlockSpec((TR, D), lambda i: (i, 0)),
                _full_spec((1, D)), _full_spec((1, D)),
                _full_spec((D, D)), _full_spec((1, D)),
                _full_spec((D, D)), _full_spec((1, D)),
            ],
            out_specs=[pl.BlockSpec((TR, D), lambda i: (i, 0)),
                       pl.BlockSpec((TR, D), lambda i: (i, 0))],
        ),
        compiler_params=_compiler_params(("parallel",)),
    )(src.reshape(R, D),
      p[pre + "_ln_g"], p[pre + "_ln_b"],
      _bf16(p[pre + "_wk"]), p[pre + "_bk"],
      _bf16(p[pre + "_wv"]), p[pre + "_bv"])
    return k.reshape(B, Tk, D), v.reshape(B, Tk, D)


# ---------------------------------------------------------------------------
# 3) Multi-head attention + residual, query-tiled grid (B, Tq // TQ)
# ---------------------------------------------------------------------------
def _mha_kernel(xq_ref, k_ref, v_ref, g_ref, b_ref, wq_ref, bq_ref, wo_ref, bo_ref,
                o_ref, att_ref, *, num_heads, head_dim):
    xq = xq_ref[0].astype(jnp.float32)                                   # (TQ, D) residual stream
    xn = _layer_norm(xq, g_ref[...], b_ref[...])
    q = jnp.dot(xn.astype(jnp.bfloat16), wq_ref[...],
                preferred_element_type=jnp.float32) + bq_ref[...]        # (TQ, D)
    k = k_ref[0]                                                         # (Tk, D) bf16
    v = v_ref[0]                                                         # (Tk, D) bf16
    scale = 1.0 / math.sqrt(head_dim)

    acc = jnp.zeros_like(xq)                                             # (TQ, D) f32 accumulator
    for h in range(num_heads):                                           # static unrolled head loop
        sl = slice(h * head_dim, (h + 1) * head_dim)
        qh = (q[:, sl] * scale).astype(jnp.bfloat16)                     # (TQ, Dh)
        s = jax.lax.dot_general(qh, k[:, sl],
                                dimension_numbers=(((1,), (1,)), ((), ())),
                                preferred_element_type=jnp.float32)      # (TQ, Tk)
        s = s - jnp.max(s, axis=-1, keepdims=True)
        pexp = jnp.exp(s)
        prob = pexp * pl.reciprocal(jnp.sum(pexp, axis=-1, keepdims=True), approx=True)
        att_ref[0, h, :, :] = prob.astype(att_ref.dtype)                 # lane-dense (TQ, Tk) store
        ctx = jnp.dot(prob.astype(jnp.bfloat16), v[:, sl],
                      preferred_element_type=jnp.float32)                # (TQ, Dh)
        # lane-dense accumulate through the matching Wo row block (Dh is a multiple of 8)
        acc = acc + jnp.dot(ctx.astype(jnp.bfloat16),
                            wo_ref[pl.ds(h * head_dim, head_dim), :],
                            preferred_element_type=jnp.float32)
    out = xq + acc + bo_ref[...]                                         # residual (att_res = Identity)
    o_ref[0] = out.astype(o_ref.dtype)


def _mha(xq, k, v, p, pre, num_heads, att_dtype=jnp.bfloat16):
    B, Tq, D = xq.shape
    Tk = k.shape[1]
    Dh = D // num_heads
    TQ = _pick_tile(Tq, 128)
    out, att = pl.pallas_call(
        functools.partial(_mha_kernel, num_heads=num_heads, head_dim=Dh),
        out_shape=[jax.ShapeDtypeStruct((B, Tq, D), xq.dtype),
                   jax.ShapeDtypeStruct((B, num_heads, Tq, Tk), att_dtype)],
        grid_spec=pltpu.PrefetchScalarGridSpec(
            num_scalar_prefetch=0,
            grid=(B, Tq // TQ),
            in_specs=[
                pl.BlockSpec((1, TQ, D), lambda b, q: (b, q, 0)),        # query tile
                pl.BlockSpec((1, Tk, D), lambda b, q: (b, 0, 0)),        # keys   (re-DMA only on new b)
                pl.BlockSpec((1, Tk, D), lambda b, q: (b, 0, 0)),        # values (re-DMA only on new b)
                _full_spec((1, D)), _full_spec((1, D)),                  # pre-LN gamma / beta
                _full_spec((D, D)), _full_spec((1, D)),                  # Wq, bq
                _full_spec((D, D)), _full_spec((1, D)),                  # Wo, bo
            ],
            out_specs=[
                pl.BlockSpec((1, TQ, D), lambda b, q: (b, q, 0)),
                pl.BlockSpec((1, num_heads, TQ, Tk), lambda b, q: (b, 0, q, 0)),
            ],
        ),
        compiler_params=_compiler_params(("parallel", "parallel")),
    )(xq, k, v,
      p[pre + "_ln_g"], p[pre + "_ln_b"],
      _bf16(p[pre + "_wq"]), p[pre + "_bq"],
      _bf16(p[pre + "_wo"]), p[pre + "_bo"])
    return out, att


# ---------------------------------------------------------------------------
# 4) Convolution module + residual (per batch element)
#    LN -> pointwise conv (2*De) -> GLU -> depthwise conv (same pad, stride 1)
#       -> BatchNorm (inference) -> Swish -> pointwise conv
# ---------------------------------------------------------------------------
def _conv_module_kernel(x_ref, g_ref, b_ref, wpw1_ref, bpw1_ref, wdw_ref, bdw_ref,
                        bng_ref, bnb_ref, bnm_ref, bnv_ref, wpw2_ref, bpw2_ref,
                        o_ref, pad_ref, *, kernel_size, dim_expand):
    x = x_ref[0].astype(jnp.float32)                                     # (T, D)
    T = x.shape[0]
    pad = (kernel_size - 1) // 2
    xn = _layer_norm(x, g_ref[...], b_ref[...])
    h = jnp.dot(xn.astype(jnp.bfloat16), wpw1_ref[...],
                preferred_element_type=jnp.float32) + bpw1_ref[...]      # (T, 2*De)
    u = h[:, :dim_expand] * _sigmoid(h[:, dim_expand:])                  # GLU -> (T, De)

    # depthwise conv along time ("same" padding, stride 1) via a zero-padded VMEM scratch
    pad_ref[...] = jnp.zeros_like(pad_ref)
    pad_ref[pl.ds(pad, T), :] = u
    w_dw = wdw_ref[...].astype(jnp.float32)                              # (K, De)
    dw = jnp.zeros_like(u)
    for t in range(kernel_size):                                         # static tap loop
        dw = dw + pad_ref[pl.ds(t, T), :] * w_dw[t:t + 1, :]
    dw = dw + bdw_ref[...]

    # BatchNorm1d, inference mode (running statistics)
    dw = (dw - bnm_ref[...]) * jax.lax.rsqrt(bnv_ref[...] + _EPS) * bng_ref[...] + bnb_ref[...]
    y = _swish(dw)
    y = jnp.dot(y.astype(jnp.bfloat16), wpw2_ref[...],
                preferred_element_type=jnp.float32) + bpw2_ref[...]
    o_ref[0] = (x + y).astype(o_ref.dtype)                               # conv_res = Identity


def _conv_module(x, p, kernel_size):
    # TODO(synk): for very long T, tile the time axis with a (kernel_size-1)//2 halo;
    #             the whole (T, D) slab per batch element is kept in VMEM here.
    B, T, D = x.shape
    De = p["conv_w_pw2"].shape[1]
    P = (kernel_size - 1) // 2
    out = pl.pallas_call(
        functools.partial(_conv_module_kernel, kernel_size=kernel_size, dim_expand=De),
        out_shape=jax.ShapeDtypeStruct((B, T, De), x.dtype),
        grid_spec=pltpu.PrefetchScalarGridSpec(
            num_scalar_prefetch=0,
            grid=(B,),
            in_specs=[
                pl.BlockSpec((1, T, D), lambda b: (b, 0, 0)),
                _full_spec((1, D)), _full_spec((1, D)),                  # LN gamma / beta
                _full_spec((D, 2 * De)), _full_spec((1, 2 * De)),        # pointwise conv 1
                _full_spec((kernel_size, De)), _full_spec((1, De)),      # depthwise conv
                _full_spec((1, De)), _full_spec((1, De)),                # BN gamma / beta
                _full_spec((1, De)), _full_spec((1, De)),                # BN running mean / var
                _full_spec((De, De)), _full_spec((1, De)),               # pointwise conv 2
            ],
            out_specs=pl.BlockSpec((1, T, De), lambda b: (b, 0, 0)),
            scratch_shapes=[pltpu.VMEM((T + 2 * P, De), jnp.float32)],
        ),
        compiler_params=_compiler_params(("parallel",)),
    )(x,
      p["conv_ln_g"], p["conv_ln_b"],
      _bf16(p["conv_w_pw1"]), p["conv_b_pw1"],
      p["conv_w_dw"], p["conv_b_dw"],
      p["conv_bn_g"], p["conv_bn_b"], p["conv_bn_rm"], p["conv_bn_rv"],
      _bf16(p["conv_w_pw2"]), p["conv_b_pw2"])
    return out


# ---------------------------------------------------------------------------
# Full CrossConformerBlock forward
# ---------------------------------------------------------------------------
def cross_conformer_block(x, x_enc, params, num_heads, conv_kernel_size):
    # TODO(synk): attention masks (mask / mask_enc), causal attention, relative-positional /
    #             streaming attention variants (att_params) and the streaming `hidden` cache
    #             are not implemented; plain MHSA / cross-MHA is used and hidden=None is returned.
    # TODO(synk): att_stride > 1, conv_stride > 1 and dim_expand != dim_model residual paths
    #             (MaxPool / pointwise-conv residuals) are not implemented (identity residuals).
    x = _ffn_half(x, params, "ff1")                                      # x + 1/2 * ff_module1(x)
    k_s, v_s = _kv_proj(x, params, "satt", apply_ln=True)                # self-attention K/V
    x, self_att = _mha(x, k_s, v_s, params, "satt", num_heads)           # x + self_att(x)
    k_c, v_c = _kv_proj(x_enc, params, "catt", apply_ln=False)           # cross-attention K/V
    x, cross_att = _mha(x, k_c, v_c, params, "catt", num_heads)          # x + cross_att(x, x_enc)
    x = _conv_module(x, params, conv_kernel_size)                        # x + conv_module(x)
    x = _ffn_half(x, params, "ff2",                                      # x + 1/2 * ff_module2(x)
                  final_ln_g=params["final_ln_g"],                       # fused final LayerNorm
                  final_ln_b=params["final_ln_b"])
    return x, {"self": self_att, "cross": cross_att}, None


# ---------------------------------------------------------------------------
# Pure-JAX reference for correctness checking
# ---------------------------------------------------------------------------
def _ffn_ref(v, p, pre):
    h = _layer_norm(v, p[pre + "_ln_g"], p[pre + "_ln_b"]) @ p[pre + "_w1"] + p[pre + "_b1"][0]
    return _swish(h) @ p[pre + "_w2"] + p[pre + "_b2"][0]


def _mha_ref(q_in, kv_in, p, pre, H):
    B, Tq, D = q_in.shape
    Tk = kv_in.shape[1]
    Dh = D // H
    qn = _layer_norm(q_in, p[pre + "_ln_g"], p[pre + "_ln_b"])
    q = qn @ p[pre + "_wq"] + p[pre + "_bq"][0]
    k = kv_in @ p[pre + "_wk"] + p[pre + "_bk"][0]
    v = kv_in @ p[pre + "_wv"] + p[pre + "_bv"][0]
    q = q.reshape(B, Tq, H, Dh).transpose(0, 2, 1, 3)
    k = k.reshape(B, Tk, H, Dh).transpose(0, 2, 1, 3)
    v = v.reshape(B, Tk, H, Dh).transpose(0, 2, 1, 3)
    s = jnp.einsum("bhqd,bhkd->bhqk", q, k) / math.sqrt(Dh)
    att = jax.nn.softmax(s, axis=-1)
    ctx = jnp.einsum("bhqk,bhkd->bhqd", att, v).transpose(0, 2, 1, 3).reshape(B, Tq, D)
    return ctx @ p[pre + "_wo"] + p[pre + "_bo"][0], att


def _conv_ref(v, p, K):
    De = p["conv_w_pw2"].shape[1]
    T = v.shape[1]
    xn = _layer_norm(v, p["conv_ln_g"], p["conv_ln_b"])
    h = xn @ p["conv_w_pw1"] + p["conv_b_pw1"][0]
    u = h[..., :De] * _sigmoid(h[..., De:])
    P = (K - 1) // 2
    up = jnp.pad(u, ((0, 0), (P, P), (0, 0)))
    dw = sum(up[:, t:t + T, :] * p["conv_w_dw"][t] for t in range(K)) + p["conv_b_dw"][0]
    dw = (dw - p["conv_bn_rm"][0]) * jax.lax.rsqrt(p["conv_bn_rv"][0] + _EPS) \
        * p["conv_bn_g"][0] + p["conv_bn_b"][0]
    return _swish(dw) @ p["conv_w_pw2"] + p["conv_b_pw2"][0]


def cross_conformer_block_ref(x, x_enc, p, num_heads, K):
    x = x + 0.5 * _ffn_ref(x, p, "ff1")
    att_out, self_att = _mha_ref(x, _layer_norm(x, p["satt_ln_g"], p["satt_ln_b"]),
                                 p, "satt", num_heads)
    x = x + att_out
    att_out, cross_att = _mha_ref(x, x_enc, p, "catt", num_heads)
    x = x + att_out
    x = x + _conv_ref(x, p, K)
    x = x + 0.5 * _ffn_ref(x, p, "ff2")
    x = _layer_norm(x, p["final_ln_g"], p["final_ln_b"])
    return x, self_att, cross_att


if __name__ == "__main__":
    B, T, T_enc = 2, 16, 24          # batch, decoder length, encoder length
    D = 32                           # dim_model == dim_expand
    H = 4                            # attention heads (head_dim = 8)
    FF_RATIO = 4                     # dim_ffn = 128
    K = 3                            # depthwise conv kernel size
    Dff = D * FF_RATIO

    key = jax.random.PRNGKey(0)
    kit = iter(jax.random.split(key, 64))

    def w(shape, scale=0.05):
        return (scale * jax.random.normal(next(kit), shape)).astype(jnp.float32)

    params = {}
    for pre in ("ff1", "ff2"):
        params[pre + "_ln_g"] = jnp.ones((1, D), jnp.float32)
        params[pre + "_ln_b"] = jnp.zeros((1, D), jnp.float32)
        params[pre + "_w1"] = w((D, Dff)); params[pre + "_b1"] = w((1, Dff))
        params[pre + "_w2"] = w((Dff, D)); params[pre + "_b2"] = w((1, D))
    for pre in ("satt", "catt"):
        params[pre + "_ln_g"] = jnp.ones((1, D), jnp.float32)
        params[pre + "_ln_b"] = jnp.zeros((1, D), jnp.float32)
        for nm in ("q", "k", "v", "o"):
            params[pre + "_w" + nm] = w((D, D))
            params[pre + "_b" + nm] = w((1, D))
    params["conv_ln_g"] = jnp.ones((1, D), jnp.float32)
    params["conv_ln_b"] = jnp.zeros((1, D), jnp.float32)
    params["conv_w_pw1"] = w((D, 2 * D)); params["conv_b_pw1"] = w((1, 2 * D))
    params["conv_w_dw"] = w((K, D));      params["conv_b_dw"] = w((1, D))
    params["conv_bn_g"] = jnp.ones((1, D), jnp.float32)
    params["conv_bn_b"] = jnp.zeros((1, D), jnp.float32)
    params["conv_bn_rm"] = 0.1 * jax.random.normal(next(kit), (1, D), dtype=jnp.float32)
    params["conv_bn_rv"] = 1.0 + 0.1 * jnp.abs(jax.random.normal(next(kit), (1, D), dtype=jnp.float32))
    params["conv_w_pw2"] = w((D, D));     params["conv_b_pw2"] = w((1, D))
    params["final_ln_g"] = jnp.ones((1, D), jnp.float32)
    params["final_ln_b"] = jnp.zeros((1, D), jnp.float32)

    x = jax.random.normal(next(kit), (B, T, D), dtype=jnp.float32)
    x_enc = jax.random.normal(next(kit), (B, T_enc, D), dtype=jnp.float32)

    block = jax.jit(functools.partial(cross_conformer_block,
                                      num_heads=H, conv_kernel_size=K))
    y, att_maps, hidden = block(x, x_enc, params)
    jax.block_until_ready((y, att_maps["self"], att_maps["cross"]))

    y_ref, sa_ref, ca_ref = cross_conformer_block_ref(x, x_enc, params, H, K)
    assert jnp.allclose(y, y_ref, atol=2e-2, rtol=2e-2), "output mismatch vs reference"
    assert jnp.allclose(att_maps["self"].astype(jnp.float32), sa_ref, atol=2e-2, rtol=2e-2), \
        "self-attention map mismatch vs reference"
    assert jnp.allclose(att_maps["cross"].astype(jnp.float32), ca_ref, atol=2e-2, rtol=2e-2), \
        "cross-attention map mismatch vs reference"

    print("KERNEL_OK")
</pallas_src>

<mosaic_0001>
module attributes {stable_mosaic.version = 11 : i64} {
  func.func @_ffn_half_kernel(%arg0: i32, %arg1: memref<32x32xf32, #tpu.memory_space<vmem>>, %arg2: memref<1x32xf32, #tpu.memory_space<vmem>>, %arg3: memref<1x32xf32, #tpu.memory_space<vmem>>, %arg4: memref<32x128xbf16, #tpu.memory_space<vmem>>, %arg5: memref<1x128xf32, #tpu.memory_space<vmem>>, %arg6: memref<128x32xbf16, #tpu.memory_space<vmem>>, %arg7: memref<1x32xf32, #tpu.memory_space<vmem>>, %arg8: memref<1x32xf32, #tpu.memory_space<vmem>>, %arg9: memref<1x32xf32, #tpu.memory_space<vmem>>, %arg10: memref<32x32xf32, #tpu.memory_space<vmem>>) attributes {dimension_semantics = [#tpu.dimension_semantics<parallel>], iteration_bounds = array<i64: 1>, scalar_prefetch = 0 : i64, scratch_operands = 0 : i64, tpu.core_type = #tpu.core_type<tc>, window_params = [{transform_indices = @transform_0, window_bounds = array<i64: 32, 32>}, {pipeline_mode = #tpu.pipeline_mode<synchronous>, transform_indices = @transform_1, window_bounds = array<i64: 1, 32>}, {pipeline_mode = #tpu.pipeline_mode<synchronous>, transform_indices = @transform_2, window_bounds = array<i64: 1, 32>}, {pipeline_mode = #tpu.pipeline_mode<synchronous>, transform_indices = @transform_3, window_bounds = array<i64: 32, 128>}, {pipeline_mode = #tpu.pipeline_mode<synchronous>, transform_indices = @transform_4, window_bounds = array<i64: 1, 128>}, {pipeline_mode = #tpu.pipeline_mode<synchronous>, transform_indices = @transform_5, window_bounds = array<i64: 128, 32>}, {pipeline_mode = #tpu.pipeline_mode<synchronous>, transform_indices = @transform_6, window_bounds = array<i64: 1, 32>}, {pipeline_mode = #tpu.pipeline_mode<synchronous>, transform_indices = @transform_7, window_bounds = array<i64: 1, 32>}, {pipeline_mode = #tpu.pipeline_mode<synchronous>, transform_indices = @transform_8, window_bounds = array<i64: 1, 32>}, {transform_indices = @transform_9, window_bounds = array<i64: 32, 32>}]} {
    %c0 = arith.constant 0 : index
    %c0_0 = arith.constant 0 : index
    %0 = vector.load %arg1[%c0, %c0_0] : memref<32x32xf32, #tpu.memory_space<vmem>>, vector<32x32xf32>
    %c0_1 = arith.constant 0 : index
    %c0_2 = arith.constant 0 : index
    %1 = vector.load %arg2[%c0_1, %c0_2] : memref<1x32xf32, #tpu.memory_space<vmem>>, vector<1x32xf32>
    %c0_3 = arith.constant 0 : index
    %c0_4 = arith.constant 0 : index
    %2 = vector.load %arg3[%c0_3, %c0_4] : memref<1x32xf32, #tpu.memory_space<vmem>>, vector<1x32xf32>
    %cst = arith.constant dense<0.000000e+00> : vector<32xf32>
    %3 = vector.multi_reduction <add>, %0, %cst [1] : vector<32x32xf32> to vector<32xf32>
    %4 = vector.shape_cast %3 : vector<32xf32> to vector<32x1xf32>
    %cst_5 = arith.constant 3.200000e+01 : f32
    %5 = vector.broadcast %cst_5 : f32 to vector<32x1xf32>
    %6 = arith.divf %4, %5 : vector<32x1xf32>
    %7 = vector.broadcast %6 : vector<32x1xf32> to vector<32x32xf32>
    %8 = arith.subf %0, %7 : vector<32x32xf32>
    %9 = arith.mulf %8, %8 : vector<32x32xf32>
    %cst_6 = arith.constant dense<0.000000e+00> : vector<32xf32>
    %10 = vector.multi_reduction <add>, %9, %cst_6 [1] : vector<32x32xf32> to vector<32xf32>
    %11 = vector.shape_cast %10 : vector<32xf32> to vector<32x1xf32>
    %cst_7 = arith.constant 3.200000e+01 : f32
    %12 = vector.broadcast %cst_7 : f32 to vector<32x1xf32>
    %13 = arith.divf %11, %12 : vector<32x1xf32>
    %14 = vector.broadcast %6 : vector<32x1xf32> to vector<32x32xf32>
    %15 = arith.subf %0, %14 : vector<32x32xf32>
    %cst_8 = arith.constant 9.99999974E-6 : f32
    %16 = vector.broadcast %cst_8 : f32 to vector<32x1xf32>
    %17 = arith.addf %13, %16 : vector<32x1xf32>
    %18 = math.rsqrt %17 : vector<32x1xf32>
    %19 = vector.broadcast %18 : vector<32x1xf32> to vector<32x32xf32>
    %20 = arith.mulf %15, %19 : vector<32x32xf32>
    %21 = vector.broadcast %1 : vector<1x32xf32> to vector<32x32xf32>
    %22 = arith.mulf %20, %21 : vector<32x32xf32>
    %23 = vector.broadcast %2 : vector<1x32xf32> to vector<32x32xf32>
    %24 = arith.addf %22, %23 : vector<32x32xf32>
    %25 = arith.truncf %24 : vector<32x32xf32> to vector<32x32xbf16>
    %c0_9 = arith.constant 0 : index
    %c0_10 = arith.constant 0 : index
    %26 = vector.load %arg4[%c0_9, %c0_10] : memref<32x128xbf16, #tpu.memory_space<vmem>>, vector<32x128xbf16>
    %cst_11 = arith.constant dense<0.000000e+00> : vector<32x128xf32>
    %27 = tpu.matmul %25, %26, %cst_11 {dimension_numbers = #tpu.dot_dimension_numbers<[1], [0], [0], [1], [0, 0, 1, 1], [], []>} : vector<32x32xbf16>, vector<32x128xbf16>, vector<32x128xf32> -> vector<32x128xf32>
    %c0_12 = arith.constant 0 : index
    %c0_13 = arith.constant 0 : index
    %28 = vector.load %arg5[%c0_12, %c0_13] : memref<1x128xf32, #tpu.memory_space<vmem>>, vector<1x128xf32>
    %29 = vector.broadcast %28 : vector<1x128xf32> to vector<32x128xf32>
    %30 = arith.addf %27, %29 : vector<32x128xf32>
    %cst_14 = arith.constant 0.000000e+00 : f32
    %31 = vector.broadcast %cst_14 : f32 to vector<32x128xf32>
    %32 = arith.subf %31, %30 : vector<32x128xf32>
    %33 = math.exp %32 : vector<32x128xf32>
    %cst_15 = arith.constant 1.000000e+00 : f32
    %34 = vector.broadcast %cst_15 : f32 to vector<32x128xf32>
    %35 = arith.addf %34, %33 : vector<32x128xf32>
    %cst_16 = arith.constant 1.000000e+00 : f32
    %36 = vector.broadcast %cst_16 : f32 to vector<32x128xf32>
    %37 = arith.divf %36, %35 : vector<32x128xf32>
    %38 = arith.mulf %30, %37 : vector<32x128xf32>
    %39 = arith.truncf %38 : vector<32x128xf32> to vector<32x128xbf16>
    %c0_17 = arith.constant 0 : index
    %c0_18 = arith.constant 0 : index
    %40 = vector.load %arg6[%c0_17, %c0_18] : memref<128x32xbf16, #tpu.memory_space<vmem>>, vector<128x32xbf16>
    %cst_19 = arith.constant dense<0.000000e+00> : vector<32x32xf32>
    %41 = tpu.matmul %39, %40, %cst_19 {dimension_numbers = #tpu.dot_dimension_numbers<[1], [0], [0], [1], [0, 0, 1, 1], [], []>} : vector<32x128xbf16>, vector<128x32xbf16>, vector<32x32xf32> -> vector<32x32xf32>
    %c0_20 = arith.constant 0 : index
    %c0_21 = arith.constant 0 : index
    %42 = vector.load %arg7[%c0_20, %c0_21] : memref<1x32xf32, #tpu.memory_space<vmem>>, vector<1x32xf32>
    %43 = vector.broadcast %42 : vector<1x32xf32> to vector<32x32xf32>
    %44 = arith.addf %41, %43 : vector<32x32xf32>
    %cst_22 = arith.constant 5.000000e-01 : f32
    %45 = vector.broadcast %cst_22 : f32 to vector<32x32xf32>
    %46 = arith.mulf %45, %44 : vector<32x32xf32>
    %47 = arith.addf %0, %46 : vector<32x32xf32>
    %c0_23 = arith.constant 0 : index
    %c0_24 = arith.constant 0 : index
    %48 = vector.load %arg10[%c0_23, %c0_24] : memref<32x32xf32, #tpu.memory_space<vmem>>, vector<32x32xf32>
    tpu.vector_store %arg10[%c0_23, %c0_24], %47 {strides = array<i32>} : memref<32x32xf32, #tpu.memory_space<vmem>>, vector<32x32xf32>,
    return
  }
  func.func @transform_0(%arg0: i32) -> (i32, i32) {
    %c0_i32 = arith.constant 0 : i32
    %c0_i32_0 = arith.constant 0 : i32
    return %arg0, %c0_i32 : i32, i32
  }
  func.func @transform_1(%arg0: i32) -> (i32, i32) {
    %c0_i32 = arith.constant 0 : i32
    %c0_i32_0 = arith.constant 0 : i32
    %c0_i32_1 = arith.constant 0 : i32
    return %c0_i32, %c0_i32_0 : i32, i32
  }
  func.func @transform_2(%arg0: i32) -> (i32, i32) {
    %c0_i32 = arith.constant 0 : i32
    %c0_i32_0 = arith.constant 0 : i32
    %c0_i32_1 = arith.constant 0 : i32
    return %c0_i32, %c0_i32_0 : i32, i32
  }
  func.func @transform_3(%arg0: i32) -> (i32, i32) {
    %c0_i32 = arith.constant 0 : i32
    %c0_i32_0 = arith.constant 0 : i32
    %c0_i32_1 = arith.constant 0 : i32
    return %c0_i32, %c0_i32_0 : i32, i32
  }
  func.func @transform_4(%arg0: i32) -> (i32, i32) {
    %c0_i32 = arith.constant 0 : i32
    %c0_i32_0 = arith.constant 0 : i32
    %c0_i32_1 = arith.constant 0 : i32
    return %c0_i32, %c0_i32_0 : i32, i32
  }
  func.func @transform_5(%arg0: i32) -> (i32, i32) {
    %c0_i32 = arith.constant 0 : i32
    %c0_i32_0 = arith.constant 0 : i32
    %c0_i32_1 = arith.constant 0 : i32
    return %c0_i32, %c0_i32_0 : i32, i32
  }
  func.func @transform_6(%arg0: i32) -> (i32, i32) {
    %c0_i32 = arith.constant 0 : i32
    %c0_i32_0 = arith.constant 0 : i32
    %c0_i32_1 = arith.constant 0 : i32
    return %c0_i32, %c0_i32_0 : i32, i32
  }
  func.func @transform_7(%arg0: i32) -> (i32, i32) {
    %c0_i32 = arith.constant 0 : i32
    %c0_i32_0 = arith.constant 0 : i32
    %c0_i32_1 = arith.constant 0 : i32
    return %c0_i32, %c0_i32_0 : i32, i32
  }
  func.func @transform_8(%arg0: i32) -> (i32, i32) {
    %c0_i32 = arith.constant 0 : i32
    %c0_i32_0 = arith.constant 0 : i32
    %c0_i32_1 = arith.constant 0 : i32
    return %c0_i32, %c0_i32_0 : i32, i32
  }
  func.func @transform_9(%arg0: i32) -> (i32, i32) {
    %c0_i32 = arith.constant 0 : i32
    %c0_i32_0 = arith.constant 0 : i32
    return %arg0, %c0_i32 : i32, i32
  }
}

module attributes {stable_mosaic.version = 11 : i64} {
  func.func @_mha_kernel(%arg0: i32, %arg1: i32, %arg2: memref<1x16x32xf32, #tpu.memory_space<vmem>>, %arg3: memref<1x16x32xbf16, #tpu.memory_space<vmem>>, %arg4: memref<1x16x32xbf16, #tpu.memory_space<vmem>>, %arg5: memref<1x32xf32, #tpu.memory_space<vmem>>, %arg6: memref<1x32xf32, #tpu.memory_space<vmem>>, %arg7: memref<32x32xbf16, #tpu.memory_space<vmem>>, %arg8: memref<1x32xf32, #tpu.memory_space<vmem>>, %arg9: memref<32x32xbf16, #tpu.memory_space<vmem>>, %arg10: memref<1x32xf32, #tpu.memory_space<vmem>>, %arg11: memref<1x16x32xf32, #tpu.memory_space<vmem>>, %arg12: memref<1x4x16x16xbf16, #tpu.memory_space<vmem>>) attributes {dimension_semantics = [#tpu.dimension_semantics<parallel>, #tpu.dimension_semantics<parallel>], iteration_bounds = array<i64: 2, 1>, scalar_prefetch = 0 : i64, scratch_operands = 0 : i64, tpu.core_type = #tpu.core_type<tc>, window_params = [{transform_indices = @transform_0, window_bounds = array<i64: 1, 16, 32>}, {transform_indices = @transform_1, window_bounds = array<i64: 1, 16, 32>}, {transform_indices = @transform_2, window_bounds = array<i64: 1, 16, 32>}, {pipeline_mode = #tpu.pipeline_mode<synchronous>, transform_indices = @transform_3, window_bounds = array<i64: 1, 32>}, {pipeline_mode = #tpu.pipeline_mode<synchronous>, transform_indices = @transform_4, window_bounds = array<i64: 1, 32>}, {pipeline_mode = #tpu.pipeline_mode<synchronous>, transform_indices = @transform_5, window_bounds = array<i64: 32, 32>}, {pipeline_mode = #tpu.pipeline_mode<synchronous>, transform_indices = @transform_6, window_bounds = array<i64: 1, 32>}, {pipeline_mode = #tpu.pipeline_mode<synchronous>, transform_indices = @transform_7, window_bounds = array<i64: 32, 32>}, {pipeline_mode = #tpu.pipeline_mode<synchronous>, transform_indices = @transform_8, window_bounds = array<i64: 1, 32>}, {transform_indices = @transform_9, window_bounds = array<i64: 1, 16, 32>}, {transform_indices = @transform_10, window_bounds = array<i64: 1, 4, 16, 16>}]} {
    %c0 = arith.constant 0 : index
    %c0_0 = arith.constant 0 : index
    %c0_1 = arith.constant 0 : index
    %0 = vector.load %arg2[%c0, %c0_0, %c0_1] : memref<1x16x32xf32, #tpu.memory_space<vmem>>, vector<1x16x32xf32>
    %1 = vector.shape_cast %0 : vector<1x16x32xf32> to vector<16x32xf32>
    %c0_2 = arith.constant 0 : index
    %c0_3 = arith.constant 0 : index
    %2 = vector.load %arg5[%c0_2, %c0_3] : memref<1x32xf32, #tpu.memory_space<vmem>>, vector<1x32xf32>
    %c0_4 = arith.constant 0 : index
    %c0_5 = arith.constant 0 : index
    %3 = vector.load %arg6[%c0_4, %c0_5] : memref<1x32xf32, #tpu.memory_space<vmem>>, vector<1x32xf32>
    %cst = arith.constant dense<0.000000e+00> : vector<16xf32>
    %4 = vector.multi_reduction <add>, %1, %cst [1] : vector<16x32xf32> to vector<16xf32>
    %5 = vector.shape_cast %4 : vector<16xf32> to vector<16x1xf32>
    %cst_6 = arith.constant 3.200000e+01 : f32
    %6 = vector.broadcast %cst_6 : f32 to vector<16x1xf32>
    %7 = arith.divf %5, %6 : vector<16x1xf32>
    %8 = vector.broadcast %7 : vector<16x1xf32> to vector<16x32xf32>
    %9 = arith.subf %1, %8 : vector<16x32xf32>
    %10 = arith.mulf %9, %9 : vector<16x32xf32>
    %cst_7 = arith.constant dense<0.000000e+00> : vector<16xf32>
    %11 = vector.multi_reduction <add>, %10, %cst_7 [1] : vector<16x32xf32> to vector<16xf32>
    %12 = vector.shape_cast %11 : vector<16xf32> to vector<16x1xf32>
    %cst_8 = arith.constant 3.200000e+01 : f32
    %13 = vector.broadcast %cst_8 : f32 to vector<16x1xf32>
    %14 = arith.divf %12, %13 : vector<16x1xf32>
    %15 = vector.broadcast %7 : vector<16x1xf32> to vector<16x32xf32>
    %16 = arith.subf %1, %15 : vector<16x32xf32>
    %cst_9 = arith.constant 9.99999974E-6 : f32
    %17 = vector.broadcast %cst_9 : f32 to vector<16x1xf32>
    %18 = arith.addf %14, %17 : vector<16x1xf32>
    %19 = math.rsqrt %18 : vector<16x1xf32>
    %20 = vector.broadcast %19 : vector<16x1xf32> to vector<16x32xf32>
    %21 = arith.mulf %16, %20 : vector<16x32xf32>
    %22 = vector.broadcast %2 : vector<1x32xf32> to vector<16x32xf32>
    %23 = arith.mulf %21, %22 : vector<16x32xf32>
    %24 = vector.broadcast %3 : vector<1x32xf32> to vector<16x32xf32>
    %25 = arith.addf %23, %24 : vector<16x32xf32>
    %26 = arith.truncf %25 : vector<16x32xf32> to vector<16x32xbf16>
    %c0_10 = arith.constant 0 : index
    %c0_11 = arith.constant 0 : index
    %27 = vector.load %arg7[%c0_10, %c0_11] : memref<32x32xbf16, #tpu.memory_space<vmem>>, vector<32x32xbf16>
    %cst_12 = arith.constant dense<0.000000e+00> : vector<16x32xf32>
    %28 = tpu.matmul %26, %27, %cst_12 {dimension_numbers = #tpu.dot_dimension_numbers<[1], [0], [0], [1], [0, 0, 1, 1], [], []>} : vector<16x32xbf16>, vector<32x32xbf16>, vector<16x32xf32> -> vector<16x32xf32>
    %c0_13 = arith.constant 0 : index
    %c0_14 = arith.constant 0 : index
    %29 = vector.load %arg8[%c0_13, %c0_14] : memref<1x32xf32, #tpu.memory_space<vmem>>, vector<1x32xf32>
    %30 = vector.broadcast %29 : vector<1x32xf32> to vector<16x32xf32>
    %31 = arith.addf %28, %30 : vector<16x32xf32>
    %c0_15 = arith.constant 0 : index
    %c0_16 = arith.constant 0 : index
    %c0_17 = arith.constant 0 : index
    %32 = vector.load %arg3[%c0_15, %c0_16, %c0_17] : memref<1x16x32xbf16, #tpu.memory_space<vmem>>, vector<1x16x32xbf16>
    %33 = vector.shape_cast %32 : vector<1x16x32xbf16> to vector<16x32xbf16>
    %c0_18 = arith.constant 0 : index
    %c0_19 = arith.constant 0 : index
    %c0_20 = arith.constant 0 : index
    %34 = vector.load %arg4[%c0_18, %c0_19, %c0_20] : memref<1x16x32xbf16, #tpu.memory_space<vmem>>, vector<1x16x32xbf16>
    %35 = vector.shape_cast %34 : vector<1x16x32xbf16> to vector<16x32xbf16>
    %cst_21 = arith.constant 0.000000e+00 : f32
    %36 = vector.broadcast %cst_21 : f32 to vector<16x32xf32>
    %37 = vector.extract_strided_slice %31 {offsets = [0, 0], sizes = [16, 8], strides = [1, 1]} : vector<16x32xf32> to vector<16x8xf32>
    %cst_22 = arith.constant 0.353553385 : f32
    %38 = vector.broadcast %cst_22 : f32 to vector<16x8xf32>
    %39 = arith.mulf %37, %38 : vector<16x8xf32>
    %40 = arith.truncf %39 : vector<16x8xf32> to vector<16x8xbf16>
    %41 = vector.extract_strided_slice %33 {offsets = [0, 0], sizes = [16, 8], strides = [1, 1]} : vector<16x32xbf16> to vector<16x8xbf16>
    %cst_23 = arith.constant dense<0.000000e+00> : vector<16x16xf32>
    %42 = tpu.matmul %40, %41, %cst_23 {dimension_numbers = #tpu.dot_dimension_numbers<[1], [1], [0], [0], [0, 0, 1, 0], [], []>} : vector<16x8xbf16>, vector<16x8xbf16>, vector<16x16xf32> -> vector<16x16xf32>
    %cst_24 = arith.constant dense<0xFF800000> : vector<16xf32>
    %43 = vector.multi_reduction <maximumf>, %42, %cst_24 [1] : vector<16x16xf32> to vector<16xf32>
    %44 = vector.shape_cast %43 : vector<16xf32> to vector<16x1xf32>
    %45 = vector.broadcast %44 : vector<16x1xf32> to vector<16x16xf32>
    %46 = arith.subf %42, %45 : vector<16x16xf32>
    %47 = math.exp %46 : vector<16x16xf32>
    %cst_25 = arith.constant dense<0.000000e+00> : vector<16xf32>
    %48 = vector.multi_reduction <add>, %47, %cst_25 [1] : vector<16x16xf32> to vector<16xf32>
    %49 = vector.shape_cast %48 : vector<16xf32> to vector<16x1xf32>
    %50 = tpu.reciprocal %49 {approx = true} : vector<16x1xf32> -> vector<16x1xf32>
    %51 = vector.broadcast %50 : vector<16x1xf32> to vector<16x16xf32>
    %52 = arith.mulf %47, %51 : vector<16x16xf32>
    %53 = arith.truncf %52 : vector<16x16xf32> to vector<16x16xbf16>
    %c0_26 = arith.constant 0 : index
    %c0_27 = arith.constant 0 : index
    %c0_28 = arith.constant 0 : index
    %c0_29 = arith.constant 0 : index
    %54 = vector.load %arg12[%c0_26, %c0_27, %c0_28, %c0_29] : memref<1x4x16x16xbf16, #tpu.memory_space<vmem>>, vector<1x1x16x16xbf16>
    %55 = vector.shape_cast %54 : vector<1x1x16x16xbf16> to vector<16x16xbf16>
    %56 = vector.shape_cast %53 : vector<16x16xbf16> to vector<1x1x16x16xbf16>
    tpu.vector_store %arg12[%c0_26, %c0_27, %c0_28, %c0_29], %56 {strides = array<i32>} : memref<1x4x16x16xbf16, #tpu.memory_space<vmem>>, vector<1x1x16x16xbf16>,
    %57 = arith.truncf %52 : vector<16x16xf32> to vector<16x16xbf16>
    %58 = vector.extract_strided_slice %35 {offsets = [0, 0], sizes = [16, 8], strides = [1, 1]} : vector<16x32xbf16> to vector<16x8xbf16>
    %cst_30 = arith.constant dense<0.000000e+00> : vector<16x8xf32>
    %59 = tpu.matmul %57, %58, %cst_30 {dimension_numbers = #tpu.dot_dimension_numbers<[1], [0], [0], [1], [0, 0, 1, 1], [], []>} : vector<16x16xbf16>, vector<16x8xbf16>, vector<16x8xf32> -> vector<16x8xf32>
    %60 = arith.truncf %59 : vector<16x8xf32> to vector<16x8xbf16>
    %c0_31 = arith.constant 0 : index
    %c0_32 = arith.constant 0 : index
    %61 = vector.load %arg9[%c0_31, %c0_32] : memref<32x32xbf16, #tpu.memory_space<vmem>>, vector<8x32xbf16>
    %cst_33 = arith.constant dense<0.000000e+00> : vector<16x32xf32>
    %62 = tpu.matmul %60, %61, %cst_33 {dimension_numbers = #tpu.dot_dimension_numbers<[1], [0], [0], [1], [0, 0, 1, 1], [], []>} : vector<16x8xbf16>, vector<8x32xbf16>, vector<16x32xf32> -> vector<16x32xf32>
    %63 = arith.addf %36, %62 : vector<16x32xf32>
    %64 = vector.extract_strided_slice %31 {offsets = [0, 8], sizes = [16, 8], strides = [1, 1]} : vector<16x32xf32> to vector<16x8xf32>
    %cst_34 = arith.constant 0.353553385 : f32
    %65 = vector.broadcast %cst_34 : f32 to vector<16x8xf32>
    %66 = arith.mulf %64, %65 : vector<16x8xf32>
    %67 = arith.truncf %66 : vector<16x8xf32> to vector<16x8xbf16>
    %68 = vector.extract_strided_slice %33 {offsets = [0, 8], sizes = [16, 8], strides = [1, 1]} : vector<16x32xbf16> to vector<16x8xbf16>
    %cst_35 = arith.constant dense<0.000000e+00> : vector<16x16xf32>
    %69 = tpu.matmul %67, %68, %cst_35 {dimension_numbers = #tpu.dot_dimension_numbers<[1], [1], [0], [0], [0, 0, 1, 0], [], []>} : vector<16x8xbf16>, vector<16x8xbf16>, vector<16x16xf32> -> vector<16x16xf32>
    %cst_36 = arith.constant dense<0xFF800000> : vector<16xf32>
    %70 = vector.multi_reduction <maximumf>, %69, %cst_36 [1] : vector<16x16xf32> to vector<16xf32>
    %71 = vector.shape_cast %70 : vector<16xf32> to vector<16x1xf32>
    %72 = vector.broadcast %71 : vector<16x1xf32> to vector<16x16xf32>
    %73 = arith.subf %69, %72 : vector<16x16xf32>
    %74 = math.exp %73 : vector<16x16xf32>
    %cst_37 = arith.constant dense<0.000000e+00> : vector<16xf32>
    %75 = vector.multi_reduction <add>, %74, %cst_37 [1] : vector<16x16xf32> to vector<16xf32>
    %76 = vector.shape_cast %75 : vector<16xf32> to vector<16x1xf32>
    %77 = tpu.reciprocal %76 {approx = true} : vector<16x1xf32> -> vector<16x1xf32>
    %78 = vector.broadcast %77 : vector<16x1xf32> to vector<16x16xf32>
    %79 = arith.mulf %74, %78 : vector<16x16xf32>
    %80 = arith.truncf %79 : vector<16x16xf32> to vector<16x16xbf16>
    %c0_38 = arith.constant 0 : index
    %c1 = arith.constant 1 : index
    %c0_39 = arith.constant 0 : index
    %c0_40 = arith.constant 0 : index
    %81 = vector.load %arg12[%c0_38, %c1, %c0_39, %c0_40] : memref<1x4x16x16xbf16, #tpu.memory_space<vmem>>, vector<1x1x16x16xbf16>
    %82 = vector.shape_cast %81 : vector<1x1x16x16xbf16> to vector<16x16xbf16>
    %83 = vector.shape_cast %80 : vector<16x16xbf16> to vector<1x1x16x16xbf16>
    tpu.vector_store %arg12[%c0_38, %c1, %c0_39, %c0_40], %83 {strides = array<i32>} : memref<1x4x16x16xbf16, #tpu.memory_space<vmem>>, vector<1x1x16x16xbf16>,
    %84 = arith.truncf %79 : vector<16x16xf32> to vector<16x16xbf16>
    %85 = vector.extract_strided_slice %35 {offsets = [0, 8], sizes = [16, 8], strides = [1, 1]} : vector<16x32xbf16> to vector<16x8xbf16>
    %cst_41 = arith.constant dense<0.000000e+00> : vector<16x8xf32>
    %86 = tpu.matmul %84, %85, %cst_41 {dimension_numbers = #tpu.dot_dimension_numbers<[1], [0], [0], [1], [0, 0, 1, 1], [], []>} : vector<16x16xbf16>, vector<16x8xbf16>, vector<16x8xf32> -> vector<16x8xf32>
    %87 = arith.truncf %86 : vector<16x8xf32> to vector<16x8xbf16>
    %c8 = arith.constant 8 : index
    %c0_42 = arith.constant 0 : index
    %88 = vector.load %arg9[%c8, %c0_42] : memref<32x32xbf16, #tpu.memory_space<vmem>>, vector<8x32xbf16>
    %cst_43 = arith.constant dense<0.000000e+00> : vector<16x32xf32>
    %89 = tpu.matmul %87, %88, %cst_43 {dimension_numbers = #tpu.dot_dimension_numbers<[1], [0], [0], [1], [0, 0, 1, 1], [], []>} : vector<16x8xbf16>, vector<8x32xbf16>, vector<16x32xf32> -> vector<16x32xf32>
    %90 = arith.addf %63, %89 : vector<16x32xf32>
    %91 = vector.extract_strided_slice %31 {offsets = [0, 16], sizes = [16, 8], strides = [1, 1]} : vector<16x32xf32> to vector<16x8xf32>
    %cst_44 = arith.constant 0.353553385 : f32
    %92 = vector.broadcast %cst_44 : f32 to vector<16x8xf32>
    %93 = arith.mulf %91, %92 : vector<16x8xf32>
    %94 = arith.truncf %93 : vector<16x8xf32> to vector<16x8xbf16>
    %95 = vector.extract_strided_slice %33 {offsets = [0, 16], sizes = [16, 8], strides = [1, 1]} : vector<16x32xbf16> to vector<16x8xbf16>
    %cst_45 = arith.constant dense<0.000000e+00> : vector<16x16xf32>
    %96 = tpu.matmul %94, %95, %cst_45 {dimension_numbers = #tpu.dot_dimension_numbers<[1], [1], [0], [0], [0, 0, 1, 0], [], []>} : vector<16x8xbf16>, vector<16x8xbf16>, vector<16x16xf32> -> vector<16x16xf32>
    %cst_46 = arith.constant dense<0xFF800000> : vector<16xf32>
    %97 = vector.multi_reduction <maximumf>, %96, %cst_46 [1] : vector<16x16xf32> to vector<16xf32>
    %98 = vector.shape_cast %97 : vector<16xf32> to vector<16x1xf32>
    %99 = vector.broadcast %98 : vector<16x1xf32> to vector<16x16xf32>
    %100 = arith.subf %96, %99 : vector<16x16xf32>
    %101 = math.exp %100 : vector<16x16xf32>
    %cst_47 = arith.constant dense<0.000000e+00> : vector<16xf32>
    %102 = vector.multi_reduction <add>, %101, %cst_47 [1] : vector<16x16xf32> to vector<16xf32>
    %103 = vector.shape_cast %102 : vector<16xf32> to vector<16x1xf32>
    %104 = tpu.reciprocal %103 {approx = true} : vector<16x1xf32> -> vector<16x1xf32>
    %105 = vector.broadcast %104 : vector<16x1xf32> to vector<16x16xf32>
    %106 = arith.mulf %101, %105 : vector<16x16xf32>
    %107 = arith.truncf %106 : vector<16x16xf32> to vector<16x16xbf16>
    %c0_48 = arith.constant 0 : index
    %c2 = arith.constant 2 : index
    %c0_49 = arith.constant 0 : index
    %c0_50 = arith.constant 0 : index
    %108 = vector.load %arg12[%c0_48, %c2, %c0_49, %c0_50] : memref<1x4x16x16xbf16, #tpu.memory_space<vmem>>, vector<1x1x16x16xbf16>
    %109 = vector.shape_cast %108 : vector<1x1x16x16xbf16> to vector<16x16xbf16>
    %110 = vector.shape_cast %107 : vector<16x16xbf16> to vector<1x1x16x16xbf16>
    tpu.vector_store %arg12[%c0_48, %c2, %c0_49, %c0_50], %110 {strides = array<i32>} : memref<1x4x16x16xbf16, #tpu.memory_space<vmem>>, vector<1x1x16x16xbf16>,
    %111 = arith.truncf %106 : vector<16x16xf32> to vector<16x16xbf16>
    %112 = vector.extract_strided_slice %35 {offsets = [0, 16], sizes = [16, 8], strides = [1, 1]} : vector<16x32xbf16> to vector<16x8xbf16>
    %cst_51 = arith.constant dense<0.000000e+00> : vector<16x8xf32>
    %113 = tpu.matmul %111, %112, %cst_51 {dimension_numbers = #tpu.dot_dimension_numbers<[1], [0], [0], [1], [0, 0, 1, 1], [], []>} : vector<16x16xbf16>, vector<16x8xbf16>, vector<16x8xf32> -> vector<16x8xf32>
    %114 = arith.truncf %113 : vector<16x8xf32> to vector<16x8xbf16>
    %c16 = arith.constant 16 : index
    %c0_52 = arith.constant 0 : index
    %115 = vector.load %arg9[%c16, %c0_52] : memref<32x32xbf16, #tpu.memory_space<vmem>>, vector<8x32xbf16>
    %cst_53 = arith.constant dense<0.000000e+00> : vector<16x32xf32>
    %116 = tpu.matmul %114, %115, %cst_53 {dimension_numbers = #tpu.dot_dimension_numbers<[1], [0], [0], [1], [0, 0, 1, 1], [], []>} : vector<16x8xbf16>, vector<8x32xbf16>, vector<16x32xf32> -> vector<16x32xf32>
    %117 = arith.addf %90, %116 : vector<16x32xf32>
    %118 = vector.extract_strided_slice %31 {offsets = [0, 24], sizes = [16, 8], strides = [1, 1]} : vector<16x32xf32> to vector<16x8xf32>
    %cst_54 = arith.constant 0.353553385 : f32
    %119 = vector.broadcast %cst_54 : f32 to vector<16x8xf32>
    %120 = arith.mulf %118, %119 : vector<16x8xf32>
    %121 = arith.truncf %120 : vector<16x8xf32> to vector<16x8xbf16>
    %122 = vector.extract_strided_slice %33 {offsets = [0, 24], sizes = [16, 8], strides = [1, 1]} : vector<16x32xbf16> to vector<16x8xbf16>
    %cst_55 = arith.constant dense<0.000000e+00> : vector<16x16xf32>
    %123 = tpu.matmul %121, %122, %cst_55 {dimension_numbers = #tpu.dot_dimension_numbers<[1], [1], [0], [0], [0, 0, 1, 0], [], []>} : vector<16x8xbf16>, vector<16x8xbf16>, vector<16x16xf32> -> vector<16x16xf32>
    %cst_56 = arith.constant dense<0xFF800000> : vector<16xf32>
    %124 = vector.multi_reduction <maximumf>, %123, %cst_56 [1] : vector<16x16xf32> to vector<16xf32>
    %125 = vector.shape_cast %124 : vector<16xf32> to vector<16x1xf32>
    %126 = vector.broadcast %125 : vector<16x1xf32> to vector<16x16xf32>
    %127 = arith.subf %123, %126 : vector<16x16xf32>
    %128 = math.exp %127 : vector<16x16xf32>
    %cst_57 = arith.constant dense<0.000000e+00> : vector<16xf32>
    %129 = vector.multi_reduction <add>, %128, %cst_57 [1] : vector<16x16xf32> to vector<16xf32>
    %130 = vector.shape_cast %129 : vector<16xf32> to vector<16x1xf32>
    %131 = tpu.reciprocal %130 {approx = true} : vector<16x1xf32> -> vector<16x1xf32>
    %132 = vector.broadcast %131 : vector<16x1xf32> to vector<16x16xf32>
    %133 = arith.mulf %128, %132 : vector<16x16xf32>
    %134 = arith.truncf %133 : vector<16x16xf32> to vector<16x16xbf16>
    %c0_58 = arith.constant 0 : index
    %c3 = arith.constant 3 : index
    %c0_59 = arith.constant 0 : index
    %c0_60 = arith.constant 0 : index
    %135 = vector.load %arg12[%c0_58, %c3, %c0_59, %c0_60] : memref<1x4x16x16xbf16, #tpu.memory_space<vmem>>, vector<1x1x16x16xbf16>
    %136 = vector.shape_cast %135 : vector<1x1x16x16xbf16> to vector<16x16xbf16>
    %137 = vector.shape_cast %134 : vector<16x16xbf16> to vector<1x1x16x16xbf16>
    tpu.vector_store %arg12[%c0_58, %c3, %c0_59, %c0_60], %137 {strides = array<i32>} : memref<1x4x16x16xbf16, #tpu.memory_space<vmem>>, vector<1x1x16x16xbf16>,
    %138 = arith.truncf %133 : vector<16x16xf32> to vector<16x16xbf16>
    %139 = vector.extract_strided_slice %35 {offsets = [0, 24], sizes = [16, 8], strides = [1, 1]} : vector<16x32xbf16> to vector<16x8xbf16>
    %cst_61 = arith.constant dense<0.000000e+00> : vector<16x8xf32>
    %140 = tpu.matmul %138, %139, %cst_61 {dimension_numbers = #tpu.dot_dimension_numbers<[1], [0], [0], [1], [0, 0, 1, 1], [], []>} : vector<16x16xbf16>, vector<16x8xbf16>, vector<16x8xf32> -> vector<16x8xf32>
    %141 = arith.truncf %140 : vector<16x8xf32> to vector<16x8xbf16>
    %c24 = arith.constant 24 : index
    %c0_62 = arith.constant 0 : index
    %142 = vector.load %arg9[%c24, %c0_62] : memref<32x32xbf16, #tpu.memory_space<vmem>>, vector<8x32xbf16>
    %cst_63 = arith.constant dense<0.000000e+00> : vector<16x32xf32>
    %143 = tpu.matmul %141, %142, %cst_63 {dimension_numbers = #tpu.dot_dimension_numbers<[1], [0], [0], [1], [0, 0, 1, 1], [], []>} : vector<16x8xbf16>, vector<8x32xbf16>, vector<16x32xf32> -> vector<16x32xf32>
    %144 = arith.addf %117, %143 : vector<16x32xf32>
    %145 = arith.addf %1, %144 : vector<16x32xf32>
    %c0_64 = arith.constant 0 : index
    %c0_65 = arith.constant 0 : index
    %146 = vector.load %arg10[%c0_64, %c0_65] : memref<1x32xf32, #tpu.memory_space<vmem>>, vector<1x32xf32>
    %147 = vector.broadcast %146 : vector<1x32xf32> to vector<16x32xf32>
    %148 = arith.addf %145, %147 : vector<16x32xf32>
    %c0_66 = arith.constant 0 : index
    %c0_67 = arith.constant 0 : index
    %c0_68 = arith.constant 0 : index
    %149 = vector.load %arg11[%c0_66, %c0_67, %c0_68] : memref<1x16x32xf32, #tpu.memory_space<vmem>>, vector<1x16x32xf32>
    %150 = vector.shape_cast %149 : vector<1x16x32xf32> to vector<16x32xf32>
    %151 = vector.shape_cast %148 : vector<16x32xf32> to vector<1x16x32xf32>
    tpu.vector_store %arg11[%c0_66, %c0_67, %c0_68], %151 {strides = array<i32>} : memref<1x16x32xf32, #tpu.memory_space<vmem>>, vector<1x16x32xf32>,
    return
  }
  func.func @transform_0(%arg0: i32, %arg1: i32) -> (i32, i32, i32) {
    %c0_i32 = arith.constant 0 : i32
    %c0_i32_0 = arith.constant 0 : i32
    return %arg0, %arg1, %c0_i32 : i32, i32, i32
  }
  func.func @transform_1(%arg0: i32, %arg1: i32) -> (i32, i32, i32) {
    %c0_i32 = arith.constant 0 : i32
    %c0_i32_0 = arith.constant 0 : i32
    %c0_i32_1 = arith.constant 0 : i32
    return %arg0, %c0_i32, %c0_i32_0 : i32, i32, i32
  }
  func.func @transform_2(%arg0: i32, %arg1: i32) -> (i32, i32, i32) {
    %c0_i32 = arith.constant 0 : i32
    %c0_i32_0 = arith.constant 0 : i32
    %c0_i32_1 = arith.constant 0 : i32
    return %arg0, %c0_i32, %c0_i32_0 : i32, i32, i32
  }
  func.func @transform_3(%arg0: i32, %arg1: i32) -> (i32, i32) {
    %c0_i32 = arith.constant 0 : i32
    %c0_i32_0 = arith.constant 0 : i32
    %c0_i32_1 = arith.constant 0 : i32
    return %c0_i32, %c0_i32_0 : i32, i32
  }
  func.func @transform_4(%arg0: i32, %arg1: i32) -> (i32, i32) {
    %c0_i32 = arith.constant 0 : i32
    %c0_i32_0 = arith.constant 0 : i32
    %c0_i32_1 = arith.constant 0 : i32
    return %c0_i32, %c0_i32_0 : i32, i32
  }
  func.func @transform_5(%arg0: i32, %arg1: i32) -> (i32, i32) {
    %c0_i32 = arith.constant 0 : i32
    %c0_i32_0 = arith.constant 0 : i32
    %c0_i32_1 = arith.constant 0 : i32
    return %c0_i32, %c0_i32_0 : i32, i32
  }
  func.func @transform_6(%arg0: i32, %arg1: i32) -> (i32, i32) {
    %c0_i32 = arith.constant 0 : i32
    %c0_i32_0 = arith.constant 0 : i32
    %c0_i32_1 = arith.constant 0 : i32
    return %c0_i32, %c0_i32_0 : i32, i32
  }
  func.func @transform_7(%arg0: i32, %arg1: i32) -> (i32, i32) {
    %c0_i32 = arith.constant 0 : i32
    %c0_i32_0 = arith.constant 0 : i32
    %c0_i32_1 = arith.constant 0 : i32
    return %c0_i32, %c0_i32_0 : i32, i32
  }
  func.func @transform_8(%arg0: i32, %arg1: i32) -> (i32, i32) {
    %c0_i32 = arith.constant 0 : i32
    %c0_i32_0 = arith.constant 0 : i32
    %c0_i32_1 = arith.constant 0 : i32
    return %c0_i32, %c0_i32_0 : i32, i32
  }
  func.func @transform_9(%arg0: i32, %arg1: i32) -> (i32, i32, i32) {
    %c0_i32 = arith.constant 0 : i32
    %c0_i32_0 = arith.constant 0 : i32
    return %arg0, %arg1, %c0_i32 : i32, i32, i32
  }
  func.func @transform_10(%arg0: i32, %arg1: i32) -> (i32, i32, i32, i32) {
    %c0_i32 = arith.constant 0 : i32
    %c0_i32_0 = arith.constant 0 : i32
    %c0_i32_1 = arith.constant 0 : i32
    return %arg0, %c0_i32, %arg1, %c0_i32_0 : i32, i32, i32, i32
  }
}

module attributes {stable_mosaic.version = 11 : i64} {
  func.func @_kv_proj_kernel(%arg0: i32, %arg1: memref<32x32xf32, #tpu.memory_space<vmem>>, %arg2: memref<1x32xf32, #tpu.memory_space<vmem>>, %arg3: memref<1x32xf32, #tpu.memory_space<vmem>>, %arg4: memref<32x32xbf16, #tpu.memory_space<vmem>>, %arg5: memref<1x32xf32, #tpu.memory_space<vmem>>, %arg6: memref<32x32xbf16, #tpu.memory_space<vmem>>, %arg7: memref<1x32xf32, #tpu.memory_space<vmem>>, %arg8: memref<32x32xbf16, #tpu.memory_space<vmem>>, %arg9: memref<32x32xbf16, #tpu.memory_space<vmem>>) attributes {dimension_semantics = [#tpu.dimension_semantics<parallel>], iteration_bounds = array<i64: 1>, scalar_prefetch = 0 : i64, scratch_operands = 0 : i64, tpu.core_type = #tpu.core_type<tc>, window_params = [{transform_indices = @transform_0, window_bounds = array<i64: 32, 32>}, {pipeline_mode = #tpu.pipeline_mode<synchronous>, transform_indices = @transform_1, window_bounds = array<i64: 1, 32>}, {pipeline_mode = #tpu.pipeline_mode<synchronous>, transform_indices = @transform_2, window_bounds = array<i64: 1, 32>}, {pipeline_mode = #tpu.pipeline_mode<synchronous>, transform_indices = @transform_3, window_bounds = array<i64: 32, 32>}, {pipeline_mode = #tpu.pipeline_mode<synchronous>, transform_indices = @transform_4, window_bounds = array<i64: 1, 32>}, {pipeline_mode = #tpu.pipeline_mode<synchronous>, transform_indices = @transform_5, window_bounds = array<i64: 32, 32>}, {pipeline_mode = #tpu.pipeline_mode<synchronous>, transform_indices = @transform_6, window_bounds = array<i64: 1, 32>}, {transform_indices = @transform_7, window_bounds = array<i64: 32, 32>}, {transform_indices = @transform_8, window_bounds = array<i64: 32, 32>}]} {
    %c0 = arith.constant 0 : index
    %c0_0 = arith.constant 0 : index
    %0 = vector.load %arg1[%c0, %c0_0] : memref<32x32xf32, #tpu.memory_space<vmem>>, vector<32x32xf32>
    %c0_1 = arith.constant 0 : index
    %c0_2 = arith.constant 0 : index
    %1 = vector.load %arg2[%c0_1, %c0_2] : memref<1x32xf32, #tpu.memory_space<vmem>>, vector<1x32xf32>
    %c0_3 = arith.constant 0 : index
    %c0_4 = arith.constant 0 : index
    %2 = vector.load %arg3[%c0_3, %c0_4] : memref<1x32xf32, #tpu.memory_space<vmem>>, vector<1x32xf32>
    %cst = arith.constant dense<0.000000e+00> : vector<32xf32>
    %3 = vector.multi_reduction <add>, %0, %cst [1] : vector<32x32xf32> to vector<32xf32>
    %4 = vector.shape_cast %3 : vector<32xf32> to vector<32x1xf32>
    %cst_5 = arith.constant 3.200000e+01 : f32
    %5 = vector.broadcast %cst_5 : f32 to vector<32x1xf32>
    %6 = arith.divf %4, %5 : vector<32x1xf32>
    %7 = vector.broadcast %6 : vector<32x1xf32> to vector<32x32xf32>
    %8 = arith.subf %0, %7 : vector<32x32xf32>
    %9 = arith.mulf %8, %8 : vector<32x32xf32>
    %cst_6 = arith.constant dense<0.000000e+00> : vector<32xf32>
    %10 = vector.multi_reduction <add>, %9, %cst_6 [1] : vector<32x32xf32> to vector<32xf32>
    %11 = vector.shape_cast %10 : vector<32xf32> to vector<32x1xf32>
    %cst_7 = arith.constant 3.200000e+01 : f32
    %12 = vector.broadcast %cst_7 : f32 to vector<32x1xf32>
    %13 = arith.divf %11, %12 : vector<32x1xf32>
    %14 = vector.broadcast %6 : vector<32x1xf32> to vector<32x32xf32>
    %15 = arith.subf %0, %14 : vector<32x32xf32>
    %cst_8 = arith.constant 9.99999974E-6 : f32
    %16 = vector.broadcast %cst_8 : f32 to vector<32x1xf32>
    %17 = arith.addf %13, %16 : vector<32x1xf32>
    %18 = math.rsqrt %17 : vector<32x1xf32>
    %19 = vector.broadcast %18 : vector<32x1xf32> to vector<32x32xf32>
    %20 = arith.mulf %15, %19 : vector<32x32xf32>
    %21 = vector.broadcast %1 : vector<1x32xf32> to vector<32x32xf32>
    %22 = arith.mulf %20, %21 : vector<32x32xf32>
    %23 = vector.broadcast %2 : vector<1x32xf32> to vector<32x32xf32>
    %24 = arith.addf %22, %23 : vector<32x32xf32>
    %25 = arith.truncf %24 : vector<32x32xf32> to vector<32x32xbf16>
    %c0_9 = arith.constant 0 : index
    %c0_10 = arith.constant 0 : index
    %26 = vector.load %arg4[%c0_9, %c0_10] : memref<32x32xbf16, #tpu.memory_space<vmem>>, vector<32x32xbf16>
    %cst_11 = arith.constant dense<0.000000e+00> : vector<32x32xf32>
    %27 = tpu.matmul %25, %26, %cst_11 {dimension_numbers = #tpu.dot_dimension_numbers<[1], [0], [0], [1], [0, 0, 1, 1], [], []>} : vector<32x32xbf16>, vector<32x32xbf16>, vector<32x32xf32> -> vector<32x32xf32>
    %c0_12 = arith.constant 0 : index
    %c0_13 = arith.constant 0 : index
    %28 = vector.load %arg5[%c0_12, %c0_13] : memref<1x32xf32, #tpu.memory_space<vmem>>, vector<1x32xf32>
    %29 = vector.broadcast %28 : vector<1x32xf32> to vector<32x32xf32>
    %30 = arith.addf %27, %29 : vector<32x32xf32>
    %c0_14 = arith.constant 0 : index
    %c0_15 = arith.constant 0 : index
    %31 = vector.load %arg6[%c0_14, %c0_15] : memref<32x32xbf16, #tpu.memory_space<vmem>>, vector<32x32xbf16>
    %cst_16 = arith.constant dense<0.000000e+00> : vector<32x32xf32>
    %32 = tpu.matmul %25, %31, %cst_16 {dimension_numbers = #tpu.dot_dimension_numbers<[1], [0], [0], [1], [0, 0, 1, 1], [], []>} : vector<32x32xbf16>, vector<32x32xbf16>, vector<32x32xf32> -> vector<32x32xf32>
    %c0_17 = arith.constant 0 : index
    %c0_18 = arith.constant 0 : index
    %33 = vector.load %arg7[%c0_17, %c0_18] : memref<1x32xf32, #tpu.memory_space<vmem>>, vector<1x32xf32>
    %34 = vector.broadcast %33 : vector<1x32xf32> to vector<32x32xf32>
    %35 = arith.addf %32, %34 : vector<32x32xf32>
    %36 = arith.truncf %30 : vector<32x32xf32> to vector<32x32xbf16>
    %c0_19 = arith.constant 0 : index
    %c0_20 = arith.constant 0 : index
    %37 = vector.load %arg8[%c0_19, %c0_20] : memref<32x32xbf16, #tpu.memory_space<vmem>>, vector<32x32xbf16>
    tpu.vector_store %arg8[%c0_19, %c0_20], %36 {strides = array<i32>} : memref<32x32xbf16, #tpu.memory_space<vmem>>, vector<32x32xbf16>,
    %38 = arith.truncf %35 : vector<32x32xf32> to vector<32x32xbf16>
    %c0_21 = arith.constant 0 : index
    %c0_22 = arith.constant 0 : index
    %39 = vector.load %arg9[%c0_21, %c0_22] : memref<32x32xbf16, #tpu.memory_space<vmem>>, vector<32x32xbf16>
    tpu.vector_store %arg9[%c0_21, %c0_22], %38 {strides = array<i32>} : memref<32x32xbf16, #tpu.memory_space<vmem>>, vector<32x32xbf16>,
    return
  }
  func.func @transform_0(%arg0: i32) -> (i32, i32) {
    %c0_i32 = arith.constant 0 : i32
    %c0_i32_0 = arith.constant 0 : i32
    return %arg0, %c0_i32 : i32, i32
  }
  func.func @transform_1(%arg0: i32) -> (i32, i32) {
    %c0_i32 = arith.constant 0 : i32
    %c0_i32_0 = arith.constant 0 : i32
    %c0_i32_1 = arith.constant 0 : i32
    return %c0_i32, %c0_i32_0 : i32, i32
  }
  func.func @transform_2(%arg0: i32) -> (i32, i32) {
    %c0_i32 = arith.constant 0 : i32
    %c0_i32_0 = arith.constant 0 : i32
    %c0_i32_1 = arith.constant 0 : i32
    return %c0_i32, %c0_i32_0 : i32, i32
  }
  func.func @transform_3(%arg0: i32) -> (i32, i32) {
    %c0_i32 = arith.constant 0 : i32
    %c0_i32_0 = arith.constant 0 : i32
    %c0_i32_1 = arith.constant 0 : i32
    return %c0_i32, %c0_i32_0 : i32, i32
  }
  func.func @transform_4(%arg0: i32) -> (i32, i32) {
    %c0_i32 = arith.constant 0 : i32
    %c0_i32_0 = arith.constant 0 : i32
    %c0_i32_1 = arith.constant 0 : i32
    return %c0_i32, %c0_i32_0 : i32, i32
  }
  func.func @transform_5(%arg0: i32) -> (i32, i32) {
    %c0_i32 = arith.constant 0 : i32
    %c0_i32_0 = arith.constant 0 : i32
    %c0_i32_1 = arith.constant 0 : i32
    return %c0_i32, %c0_i32_0 : i32, i32
  }
  func.func @transform_6(%arg0: i32) -> (i32, i32) {
    %c0_i32 = arith.constant 0 : i32
    %c0_i32_0 = arith.constant 0 : i32
    %c0_i32_1 = arith.constant 0 : i32
    return %c0_i32, %c0_i32_0 : i32, i32
  }
  func.func @transform_7(%arg0: i32) -> (i32, i32) {
    %c0_i32 = arith.constant 0 : i32
    %c0_i32_0 = arith.constant 0 : i32
    return %arg0, %c0_i32 : i32, i32
  }
  func.func @transform_8(%arg0: i32) -> (i32, i32) {
    %c0_i32 = arith.constant 0 : i32
    %c0_i32_0 = arith.constant 0 : i32
    return %arg0, %c0_i32 : i32, i32
  }
}

module attributes {stable_mosaic.version = 11 : i64} {
  func.func @_kv_proj_kernel(%arg0: i32, %arg1: memref<48x32xf32, #tpu.memory_space<vmem>>, %arg2: memref<1x32xf32, #tpu.memory_space<vmem>>, %arg3: memref<1x32xf32, #tpu.memory_space<vmem>>, %arg4: memref<32x32xbf16, #tpu.memory_space<vmem>>, %arg5: memref<1x32xf32, #tpu.memory_space<vmem>>, %arg6: memref<32x32xbf16, #tpu.memory_space<vmem>>, %arg7: memref<1x32xf32, #tpu.memory_space<vmem>>, %arg8: memref<48x32xbf16, #tpu.memory_space<vmem>>, %arg9: memref<48x32xbf16, #tpu.memory_space<vmem>>) attributes {dimension_semantics = [#tpu.dimension_semantics<parallel>], iteration_bounds = array<i64: 1>, scalar_prefetch = 0 : i64, scratch_operands = 0 : i64, tpu.core_type = #tpu.core_type<tc>, window_params = [{transform_indices = @transform_0, window_bounds = array<i64: 48, 32>}, {pipeline_mode = #tpu.pipeline_mode<synchronous>, transform_indices = @transform_1, window_bounds = array<i64: 1, 32>}, {pipeline_mode = #tpu.pipeline_mode<synchronous>, transform_indices = @transform_2, window_bounds = array<i64: 1, 32>}, {pipeline_mode = #tpu.pipeline_mode<synchronous>, transform_indices = @transform_3, window_bounds = array<i64: 32, 32>}, {pipeline_mode = #tpu.pipeline_mode<synchronous>, transform_indices = @transform_4, window_bounds = array<i64: 1, 32>}, {pipeline_mode = #tpu.pipeline_mode<synchronous>, transform_indices = @transform_5, window_bounds = array<i64: 32, 32>}, {pipeline_mode = #tpu.pipeline_mode<synchronous>, transform_indices = @transform_6, window_bounds = array<i64: 1, 32>}, {transform_indices = @transform_7, window_bounds = array<i64: 48, 32>}, {transform_indices = @transform_8, window_bounds = array<i64: 48, 32>}]} {
    %c0 = arith.constant 0 : index
    %c0_0 = arith.constant 0 : index
    %0 = vector.load %arg1[%c0, %c0_0] : memref<48x32xf32, #tpu.memory_space<vmem>>, vector<48x32xf32>
    %1 = arith.truncf %0 : vector<48x32xf32> to vector<48x32xbf16>
    %c0_1 = arith.constant 0 : index
    %c0_2 = arith.constant 0 : index
    %2 = vector.load %arg4[%c0_1, %c0_2] : memref<32x32xbf16, #tpu.memory_space<vmem>>, vector<32x32xbf16>
    %cst = arith.constant dense<0.000000e+00> : vector<48x32xf32>
    %3 = tpu.matmul %1, %2, %cst {dimension_numbers = #tpu.dot_dimension_numbers<[1], [0], [0], [1], [0, 0, 1, 1], [], []>} : vector<48x32xbf16>, vector<32x32xbf16>, vector<48x32xf32> -> vector<48x32xf32>
    %c0_3 = arith.constant 0 : index
    %c0_4 = arith.constant 0 : index
    %4 = vector.load %arg5[%c0_3, %c0_4] : memref<1x32xf32, #tpu.memory_space<vmem>>, vector<1x32xf32>
    %5 = vector.broadcast %4 : vector<1x32xf32> to vector<48x32xf32>
    %6 = arith.addf %3, %5 : vector<48x32xf32>
    %c0_5 = arith.constant 0 : index
    %c0_6 = arith.constant 0 : index
    %7 = vector.load %arg6[%c0_5, %c0_6] : memref<32x32xbf16, #tpu.memory_space<vmem>>, vector<32x32xbf16>
    %cst_7 = arith.constant dense<0.000000e+00> : vector<48x32xf32>
    %8 = tpu.matmul %1, %7, %cst_7 {dimension_numbers = #tpu.dot_dimension_numbers<[1], [0], [0], [1], [0, 0, 1, 1], [], []>} : vector<48x32xbf16>, vector<32x32xbf16>, vector<48x32xf32> -> vector<48x32xf32>
    %c0_8 = arith.constant 0 : index
    %c0_9 = arith.constant 0 : index
    %9 = vector.load %arg7[%c0_8, %c0_9] : memref<1x32xf32, #tpu.memory_space<vmem>>, vector<1x32xf32>
    %10 = vector.broadcast %9 : vector<1x32xf32> to vector<48x32xf32>
    %11 = arith.addf %8, %10 : vector<48x32xf32>
    %12 = arith.truncf %6 : vector<48x32xf32> to vector<48x32xbf16>
    %c0_10 = arith.constant 0 : index
    %c0_11 = arith.constant 0 : index
    %13 = vector.load %arg8[%c0_10, %c0_11] : memref<48x32xbf16, #tpu.memory_space<vmem>>, vector<48x32xbf16>
    tpu.vector_store %arg8[%c0_10, %c0_11], %12 {strides = array<i32>} : memref<48x32xbf16, #tpu.memory_space<vmem>>, vector<48x32xbf16>,
    %14 = arith.truncf %11 : vector<48x32xf32> to vector<48x32xbf16>
    %c0_12 = arith.constant 0 : index
    %c0_13 = arith.constant 0 : index
    %15 = vector.load %arg9[%c0_12, %c0_13] : memref<48x32xbf16, #tpu.memory_space<vmem>>, vector<48x32xbf16>
    tpu.vector_store %arg9[%c0_12, %c0_13], %14 {strides = array<i32>} : memref<48x32xbf16, #tpu.memory_space<vmem>>, vector<48x32xbf16>,
    return
  }
  func.func @transform_0(%arg0: i32) -> (i32, i32) {
    %c0_i32 = arith.constant 0 : i32
    %c0_i32_0 = arith.constant 0 : i32
    return %arg0, %c0_i32 : i32, i32
  }
  func.func @transform_1(%arg0: i32) -> (i32, i32) {
    %c0_i32 = arith.constant 0 : i32
    %c0_i32_0 = arith.constant 0 : i32
    %c0_i32_1 = arith.constant 0 : i32
    return %c0_i32, %c0_i32_0 : i32, i32
  }
  func.func @transform_2(%arg0: i32) -> (i32, i32) {
    %c0_i32 = arith.constant 0 : i32
    %c0_i32_0 = arith.constant 0 : i32
    %c0_i32_1 = arith.constant 0 : i32
    return %c0_i32, %c0_i32_0 : i32, i32
  }
  func.func @transform_3(%arg0: i32) -> (i32, i32) {
    %c0_i32 = arith.constant 0 : i32
    %c0_i32_0 = arith.constant 0 : i32
    %c0_i32_1 = arith.constant 0 : i32
    return %c0_i32, %c0_i32_0 : i32, i32
  }
  func.func @transform_4(%arg0: i32) -> (i32, i32) {
    %c0_i32 = arith.constant 0 : i32
    %c0_i32_0 = arith.constant 0 : i32
    %c0_i32_1 = arith.constant 0 : i32
    return %c0_i32, %c0_i32_0 : i32, i32
  }
  func.func @transform_5(%arg0: i32) -> (i32, i32) {
    %c0_i32 = arith.constant 0 : i32
    %c0_i32_0 = arith.constant 0 : i32
    %c0_i32_1 = arith.constant 0 : i32
    return %c0_i32, %c0_i32_0 : i32, i32
  }
  func.func @transform_6(%arg0: i32) -> (i32, i32) {
    %c0_i32 = arith.constant 0 : i32
    %c0_i32_0 = arith.constant 0 : i32
    %c0_i32_1 = arith.constant 0 : i32
    return %c0_i32, %c0_i32_0 : i32, i32
  }
  func.func @transform_7(%arg0: i32) -> (i32, i32) {
    %c0_i32 = arith.constant 0 : i32
    %c0_i32_0 = arith.constant 0 : i32
    return %arg0, %c0_i32 : i32, i32
  }
  func.func @transform_8(%arg0: i32) -> (i32, i32) {
    %c0_i32 = arith.constant 0 : i32
    %c0_i32_0 = arith.constant 0 : i32
    return %arg0, %c0_i32 : i32, i32
  }
}

module attributes {stable_mosaic.version = 11 : i64} {
  func.func @_mha_kernel(%arg0: i32, %arg1: i32, %arg2: memref<1x16x32xf32, #tpu.memory_space<vmem>>, %arg3: memref<1x24x32xbf16, #tpu.memory_space<vmem>>, %arg4: memref<1x24x32xbf16, #tpu.memory_space<vmem>>, %arg5: memref<1x32xf32, #tpu.memory_space<vmem>>, %arg6: memref<1x32xf32, #tpu.memory_space<vmem>>, %arg7: memref<32x32xbf16, #tpu.memory_space<vmem>>, %arg8: memref<1x32xf32, #tpu.memory_space<vmem>>, %arg9: memref<32x32xbf16, #tpu.memory_space<vmem>>, %arg10: memref<1x32xf32, #tpu.memory_space<vmem>>, %arg11: memref<1x16x32xf32, #tpu.memory_space<vmem>>, %arg12: memref<1x4x16x24xbf16, #tpu.memory_space<vmem>>) attributes {dimension_semantics = [#tpu.dimension_semantics<parallel>, #tpu.dimension_semantics<parallel>], iteration_bounds = array<i64: 2, 1>, scalar_prefetch = 0 : i64, scratch_operands = 0 : i64, tpu.core_type = #tpu.core_type<tc>, window_params = [{transform_indices = @transform_0, window_bounds = array<i64: 1, 16, 32>}, {transform_indices = @transform_1, window_bounds = array<i64: 1, 24, 32>}, {transform_indices = @transform_2, window_bounds = array<i64: 1, 24, 32>}, {pipeline_mode = #tpu.pipeline_mode<synchronous>, transform_indices = @transform_3, window_bounds = array<i64: 1, 32>}, {pipeline_mode = #tpu.pipeline_mode<synchronous>, transform_indices = @transform_4, window_bounds = array<i64: 1, 32>}, {pipeline_mode = #tpu.pipeline_mode<synchronous>, transform_indices = @transform_5, window_bounds = array<i64: 32, 32>}, {pipeline_mode = #tpu.pipeline_mode<synchronous>, transform_indices = @transform_6, window_bounds = array<i64: 1, 32>}, {pipeline_mode = #tpu.pipeline_mode<synchronous>, transform_indices = @transform_7, window_bounds = array<i64: 32, 32>}, {pipeline_mode = #tpu.pipeline_mode<synchronous>, transform_indices = @transform_8, window_bounds = array<i64: 1, 32>}, {transform_indices = @transform_9, window_bounds = array<i64: 1, 16, 32>}, {transform_indices = @transform_10, window_bounds = array<i64: 1, 4, 16, 24>}]} {
    %c0 = arith.constant 0 : index
    %c0_0 = arith.constant 0 : index
    %c0_1 = arith.constant 0 : index
    %0 = vector.load %arg2[%c0, %c0_0, %c0_1] : memref<1x16x32xf32, #tpu.memory_space<vmem>>, vector<1x16x32xf32>
    %1 = vector.shape_cast %0 : vector<1x16x32xf32> to vector<16x32xf32>
    %c0_2 = arith.constant 0 : index
    %c0_3 = arith.constant 0 : index
    %2 = vector.load %arg5[%c0_2, %c0_3] : memref<1x32xf32, #tpu.memory_space<vmem>>, vector<1x32xf32>
    %c0_4 = arith.constant 0 : index
    %c0_5 = arith.constant 0 : index
    %3 = vector.load %arg6[%c0_4, %c0_5] : memref<1x32xf32, #tpu.memory_space<vmem>>, vector<1x32xf32>
    %cst = arith.constant dense<0.000000e+00> : vector<16xf32>
    %4 = vector.multi_reduction <add>, %1, %cst [1] : vector<16x32xf32> to vector<16xf32>
    %5 = vector.shape_cast %4 : vector<16xf32> to vector<16x1xf32>
    %cst_6 = arith.constant 3.200000e+01 : f32
    %6 = vector.broadcast %cst_6 : f32 to vector<16x1xf32>
    %7 = arith.divf %5, %6 : vector<16x1xf32>
    %8 = vector.broadcast %7 : vector<16x1xf32> to vector<16x32xf32>
    %9 = arith.subf %1, %8 : vector<16x32xf32>
    %10 = arith.mulf %9, %9 : vector<16x32xf32>
    %cst_7 = arith.constant dense<0.000000e+00> : vector<16xf32>
    %11 = vector.multi_reduction <add>, %10, %cst_7 [1] : vector<16x32xf32> to vector<16xf32>
    %12 = vector.shape_cast %11 : vector<16xf32> to vector<16x1xf32>
    %cst_8 = arith.constant 3.200000e+01 : f32
    %13 = vector.broadcast %cst_8 : f32 to vector<16x1xf32>
    %14 = arith.divf %12, %13 : vector<16x1xf32>
    %15 = vector.broadcast %7 : vector<16x1xf32> to vector<16x32xf32>
    %16 = arith.subf %1, %15 : vector<16x32xf32>
    %cst_9 = arith.constant 9.99999974E-6 : f32
    %17 = vector.broadcast %cst_9 : f32 to vector<16x1xf32>
    %18 = arith.addf %14, %17 : vector<16x1xf32>
    %19 = math.rsqrt %18 : vector<16x1xf32>
    %20 = vector.broadcast %19 : vector<16x1xf32> to vector<16x32xf32>
    %21 = arith.mulf %16, %20 : vector<16x32xf32>
    %22 = vector.broadcast %2 : vector<1x32xf32> to vector<16x32xf32>
    %23 = arith.mulf %21, %22 : vector<16x32xf32>
    %24 = vector.broadcast %3 : vector<1x32xf32> to vector<16x32xf32>
    %25 = arith.addf %23, %24 : vector<16x32xf32>
    %26 = arith.truncf %25 : vector<16x32xf32> to vector<16x32xbf16>
    %c0_10 = arith.constant 0 : index
    %c0_11 = arith.constant 0 : index
    %27 = vector.load %arg7[%c0_10, %c0_11] : memref<32x32xbf16, #tpu.memory_space<vmem>>, vector<32x32xbf16>
    %cst_12 = arith.constant dense<0.000000e+00> : vector<16x32xf32>
    %28 = tpu.matmul %26, %27, %cst_12 {dimension_numbers = #tpu.dot_dimension_numbers<[1], [0], [0], [1], [0, 0, 1, 1], [], []>} : vector<16x32xbf16>, vector<32x32xbf16>, vector<16x32xf32> -> vector<16x32xf32>
    %c0_13 = arith.constant 0 : index
    %c0_14 = arith.constant 0 : index
    %29 = vector.load %arg8[%c0_13, %c0_14] : memref<1x32xf32, #tpu.memory_space<vmem>>, vector<1x32xf32>
    %30 = vector.broadcast %29 : vector<1x32xf32> to vector<16x32xf32>
    %31 = arith.addf %28, %30 : vector<16x32xf32>
    %c0_15 = arith.constant 0 : index
    %c0_16 = arith.constant 0 : index
    %c0_17 = arith.constant 0 : index
    %32 = vector.load %arg3[%c0_15, %c0_16, %c0_17] : memref<1x24x32xbf16, #tpu.memory_space<vmem>>, vector<1x24x32xbf16>
    %33 = vector.shape_cast %32 : vector<1x24x32xbf16> to vector<24x32xbf16>
    %c0_18 = arith.constant 0 : index
    %c0_19 = arith.constant 0 : index
    %c0_20 = arith.constant 0 : index
    %34 = vector.load %arg4[%c0_18, %c0_19, %c0_20] : memref<1x24x32xbf16, #tpu.memory_space<vmem>>, vector<1x24x32xbf16>
    %35 = vector.shape_cast %34 : vector<1x24x32xbf16> to vector<24x32xbf16>
    %cst_21 = arith.constant 0.000000e+00 : f32
    %36 = vector.broadcast %cst_21 : f32 to vector<16x32xf32>
    %37 = vector.extract_strided_slice %31 {offsets = [0, 0], sizes = [16, 8], strides = [1, 1]} : vector<16x32xf32> to vector<16x8xf32>
    %cst_22 = arith.constant 0.353553385 : f32
    %38 = vector.broadcast %cst_22 : f32 to vector<16x8xf32>
    %39 = arith.mulf %37, %38 : vector<16x8xf32>
    %40 = arith.truncf %39 : vector<16x8xf32> to vector<16x8xbf16>
    %41 = vector.extract_strided_slice %33 {offsets = [0, 0], sizes = [24, 8], strides = [1, 1]} : vector<24x32xbf16> to vector<24x8xbf16>
    %cst_23 = arith.constant dense<0.000000e+00> : vector<16x24xf32>
    %42 = tpu.matmul %40, %41, %cst_23 {dimension_numbers = #tpu.dot_dimension_numbers<[1], [1], [0], [0], [0, 0, 1, 0], [], []>} : vector<16x8xbf16>, vector<24x8xbf16>, vector<16x24xf32> -> vector<16x24xf32>
    %cst_24 = arith.constant dense<0xFF800000> : vector<16xf32>
    %43 = vector.multi_reduction <maximumf>, %42, %cst_24 [1] : vector<16x24xf32> to vector<16xf32>
    %44 = vector.shape_cast %43 : vector<16xf32> to vector<16x1xf32>
    %45 = vector.broadcast %44 : vector<16x1xf32> to vector<16x24xf32>
    %46 = arith.subf %42, %45 : vector<16x24xf32>
    %47 = math.exp %46 : vector<16x24xf32>
    %cst_25 = arith.constant dense<0.000000e+00> : vector<16xf32>
    %48 = vector.multi_reduction <add>, %47, %cst_25 [1] : vector<16x24xf32> to vector<16xf32>
    %49 = vector.shape_cast %48 : vector<16xf32> to vector<16x1xf32>
    %50 = tpu.reciprocal %49 {approx = true} : vector<16x1xf32> -> vector<16x1xf32>
    %51 = vector.broadcast %50 : vector<16x1xf32> to vector<16x24xf32>
    %52 = arith.mulf %47, %51 : vector<16x24xf32>
    %53 = arith.truncf %52 : vector<16x24xf32> to vector<16x24xbf16>
    %c0_26 = arith.constant 0 : index
    %c0_27 = arith.constant 0 : index
    %c0_28 = arith.constant 0 : index
    %c0_29 = arith.constant 0 : index
    %54 = vector.load %arg12[%c0_26, %c0_27, %c0_28, %c0_29] : memref<1x4x16x24xbf16, #tpu.memory_space<vmem>>, vector<1x1x16x24xbf16>
    %55 = vector.shape_cast %54 : vector<1x1x16x24xbf16> to vector<16x24xbf16>
    %56 = vector.shape_cast %53 : vector<16x24xbf16> to vector<1x1x16x24xbf16>
    tpu.vector_store %arg12[%c0_26, %c0_27, %c0_28, %c0_29], %56 {strides = array<i32>} : memref<1x4x16x24xbf16, #tpu.memory_space<vmem>>, vector<1x1x16x24xbf16>,
    %57 = arith.truncf %52 : vector<16x24xf32> to vector<16x24xbf16>
    %58 = vector.extract_strided_slice %35 {offsets = [0, 0], sizes = [24, 8], strides = [1, 1]} : vector<24x32xbf16> to vector<24x8xbf16>
    %cst_30 = arith.constant dense<0.000000e+00> : vector<16x8xf32>
    %59 = tpu.matmul %57, %58, %cst_30 {dimension_numbers = #tpu.dot_dimension_numbers<[1], [0], [0], [1], [0, 0, 1, 1], [], []>} : vector<16x24xbf16>, vector<24x8xbf16>, vector<16x8xf32> -> vector<16x8xf32>
    %60 = arith.truncf %59 : vector<16x8xf32> to vector<16x8xbf16>
    %c0_31 = arith.constant 0 : index
    %c0_32 = arith.constant 0 : index
    %61 = vector.load %arg9[%c0_31, %c0_32] : memref<32x32xbf16, #tpu.memory_space<vmem>>, vector<8x32xbf16>
    %cst_33 = arith.constant dense<0.000000e+00> : vector<16x32xf32>
    %62 = tpu.matmul %60, %61, %cst_33 {dimension_numbers = #tpu.dot_dimension_numbers<[1], [0], [0], [1], [0, 0, 1, 1], [], []>} : vector<16x8xbf16>, vector<8x32xbf16>, vector<16x32xf32> -> vector<16x32xf32>
    %63 = arith.addf %36, %62 : vector<16x32xf32>
    %64 = vector.extract_strided_slice %31 {offsets = [0, 8], sizes = [16, 8], strides = [1, 1]} : vector<16x32xf32> to vector<16x8xf32>
    %cst_34 = arith.constant 0.353553385 : f32
    %65 = vector.broadcast %cst_34 : f32 to vector<16x8xf32>
    %66 = arith.mulf %64, %65 : vector<16x8xf32>
    %67 = arith.truncf %66 : vector<16x8xf32> to vector<16x8xbf16>
    %68 = vector.extract_strided_slice %33 {offsets = [0, 8], sizes = [24, 8], strides = [1, 1]} : vector<24x32xbf16> to vector<24x8xbf16>
    %cst_35 = arith.constant dense<0.000000e+00> : vector<16x24xf32>
    %69 = tpu.matmul %67, %68, %cst_35 {dimension_numbers = #tpu.dot_dimension_numbers<[1], [1], [0], [0], [0, 0, 1, 0], [], []>} : vector<16x8xbf16>, vector<24x8xbf16>, vector<16x24xf32> -> vector<16x24xf32>
    %cst_36 = arith.constant dense<0xFF800000> : vector<16xf32>
    %70 = vector.multi_reduction <maximumf>, %69, %cst_36 [1] : vector<16x24xf32> to vector<16xf32>
    %71 = vector.shape_cast %70 : vector<16xf32> to vector<16x1xf32>
    %72 = vector.broadcast %71 : vector<16x1xf32> to vector<16x24xf32>
    %73 = arith.subf %69, %72 : vector<16x24xf32>
    %74 = math.exp %73 : vector<16x24xf32>
    %cst_37 = arith.constant dense<0.000000e+00> : vector<16xf32>
    %75 = vector.multi_reduction <add>, %74, %cst_37 [1] : vector<16x24xf32> to vector<16xf32>
    %76 = vector.shape_cast %75 : vector<16xf32> to vector<16x1xf32>
    %77 = tpu.reciprocal %76 {approx = true} : vector<16x1xf32> -> vector<16x1xf32>
    %78 = vector.broadcast %77 : vector<16x1xf32> to vector<16x24xf32>
    %79 = arith.mulf %74, %78 : vector<16x24xf32>
    %80 = arith.truncf %79 : vector<16x24xf32> to vector<16x24xbf16>
    %c0_38 = arith.constant 0 : index
    %c1 = arith.constant 1 : index
    %c0_39 = arith.constant 0 : index
    %c0_40 = arith.constant 0 : index
    %81 = vector.load %arg12[%c0_38, %c1, %c0_39, %c0_40] : memref<1x4x16x24xbf16, #tpu.memory_space<vmem>>, vector<1x1x16x24xbf16>
    %82 = vector.shape_cast %81 : vector<1x1x16x24xbf16> to vector<16x24xbf16>
    %83 = vector.shape_cast %80 : vector<16x24xbf16> to vector<1x1x16x24xbf16>
    tpu.vector_store %arg12[%c0_38, %c1, %c0_39, %c0_40], %83 {strides = array<i32>} : memref<1x4x16x24xbf16, #tpu.memory_space<vmem>>, vector<1x1x16x24xbf16>,
    %84 = arith.truncf %79 : vector<16x24xf32> to vector<16x24xbf16>
    %85 = vector.extract_strided_slice %35 {offsets = [0, 8], sizes = [24, 8], strides = [1, 1]} : vector<24x32xbf16> to vector<24x8xbf16>
    %cst_41 = arith.constant dense<0.000000e+00> : vector<16x8xf32>
    %86 = tpu.matmul %84, %85, %cst_41 {dimension_numbers = #tpu.dot_dimension_numbers<[1], [0], [0], [1], [0, 0, 1, 1], [], []>} : vector<16x24xbf16>, vector<24x8xbf16>, vector<16x8xf32> -> vector<16x8xf32>
    %87 = arith.truncf %86 : vector<16x8xf32> to vector<16x8xbf16>
    %c8 = arith.constant 8 : index
    %c0_42 = arith.constant 0 : index
    %88 = vector.load %arg9[%c8, %c0_42] : memref<32x32xbf16, #tpu.memory_space<vmem>>, vector<8x32xbf16>
    %cst_43 = arith.constant dense<0.000000e+00> : vector<16x32xf32>
    %89 = tpu.matmul %87, %88, %cst_43 {dimension_numbers = #tpu.dot_dimension_numbers<[1], [0], [0], [1], [0, 0, 1, 1], [], []>} : vector<16x8xbf16>, vector<8x32xbf16>, vector<16x32xf32> -> vector<16x32xf32>
    %90 = arith.addf %63, %89 : vector<16x32xf32>
    %91 = vector.extract_strided_slice %31 {offsets = [0, 16], sizes = [16, 8], strides = [1, 1]} : vector<16x32xf32> to vector<16x8xf32>
    %cst_44 = arith.constant 0.353553385 : f32
    %92 = vector.broadcast %cst_44 : f32 to vector<16x8xf32>
    %93 = arith.mulf %91, %92 : vector<16x8xf32>
    %94 = arith.truncf %93 : vector<16x8xf32> to vector<16x8xbf16>
    %95 = vector.extract_strided_slice %33 {offsets = [0, 16], sizes = [24, 8], strides = [1, 1]} : vector<24x32xbf16> to vector<24x8xbf16>
    %cst_45 = arith.constant dense<0.000000e+00> : vector<16x24xf32>
    %96 = tpu.matmul %94, %95, %cst_45 {dimension_numbers = #tpu.dot_dimension_numbers<[1], [1], [0], [0], [0, 0, 1, 0], [], []>} : vector<16x8xbf16>, vector<24x8xbf16>, vector<16x24xf32> -> vector<16x24xf32>
    %cst_46 = arith.constant dense<0xFF800000> : vector<16xf32>
    %97 = vector.multi_reduction <maximumf>, %96, %cst_46 [1] : vector<16x24xf32> to vector<16xf32>
    %98 = vector.shape_cast %97 : vector<16xf32> to vector<16x1xf32>
    %99 = vector.broadcast %98 : vector<16x1xf32> to vector<16x24xf32>
    %100 = arith.subf %96, %99 : vector<16x24xf32>
    %101 = math.exp %100 : vector<16x24xf32>
    %cst_47 = arith.constant dense<0.000000e+00> : vector<16xf32>
    %102 = vector.multi_reduction <add>, %101, %cst_47 [1] : vector<16x24xf32> to vector<16xf32>
    %103 = vector.shape_cast %102 : vector<16xf32> to vector<16x1xf32>
    %104 = tpu.reciprocal %103 {approx = true} : vector<16x1xf32> -> vector<16x1xf32>
    %105 = vector.broadcast %104 : vector<16x1xf32> to vector<16x24xf32>
    %106 = arith.mulf %101, %105 : vector<16x24xf32>
    %107 = arith.truncf %106 : vector<16x24xf32> to vector<16x24xbf16>
    %c0_48 = arith.constant 0 : index
    %c2 = arith.constant 2 : index
    %c0_49 = arith.constant 0 : index
    %c0_50 = arith.constant 0 : index
    %108 = vector.load %arg12[%c0_48, %c2, %c0_49, %c0_50] : memref<1x4x16x24xbf16, #tpu.memory_space<vmem>>, vector<1x1x16x24xbf16>
    %109 = vector.shape_cast %108 : vector<1x1x16x24xbf16> to vector<16x24xbf16>
    %110 = vector.shape_cast %107 : vector<16x24xbf16> to vector<1x1x16x24xbf16>
    tpu.vector_store %arg12[%c0_48, %c2, %c0_49, %c0_50], %110 {strides = array<i32>} : memref<1x4x16x24xbf16, #tpu.memory_space<vmem>>, vector<1x1x16x24xbf16>,
    %111 = arith.truncf %106 : vector<16x24xf32> to vector<16x24xbf16>
    %112 = vector.extract_strided_slice %35 {offsets = [0, 16], sizes = [24, 8], strides = [1, 1]} : vector<24x32xbf16> to vector<24x8xbf16>
    %cst_51 = arith.constant dense<0.000000e+00> : vector<16x8xf32>
    %113 = tpu.matmul %111, %112, %cst_51 {dimension_numbers = #tpu.dot_dimension_numbers<[1], [0], [0], [1], [0, 0, 1, 1], [], []>} : vector<16x24xbf16>, vector<24x8xbf16>, vector<16x8xf32> -> vector<16x8xf32>
    %114 = arith.truncf %113 : vector<16x8xf32> to vector<16x8xbf16>
    %c16 = arith.constant 16 : index
    %c0_52 = arith.constant 0 : index
    %115 = vector.load %arg9[%c16, %c0_52] : memref<32x32xbf16, #tpu.memory_space<vmem>>, vector<8x32xbf16>
    %cst_53 = arith.constant dense<0.000000e+00> : vector<16x32xf32>
    %116 = tpu.matmul %114, %115, %cst_53 {dimension_numbers = #tpu.dot_dimension_numbers<[1], [0], [0], [1], [0, 0, 1, 1], [], []>} : vector<16x8xbf16>, vector<8x32xbf16>, vector<16x32xf32> -> vector<16x32xf32>
    %117 = arith.addf %90, %116 : vector<16x32xf32>
    %118 = vector.extract_strided_slice %31 {offsets = [0, 24], sizes = [16, 8], strides = [1, 1]} : vector<16x32xf32> to vector<16x8xf32>
    %cst_54 = arith.constant 0.353553385 : f32
    %119 = vector.broadcast %cst_54 : f32 to vector<16x8xf32>
    %120 = arith.mulf %118, %119 : vector<16x8xf32>
    %121 = arith.truncf %120 : vector<16x8xf32> to vector<16x8xbf16>
    %122 = vector.extract_strided_slice %33 {offsets = [0, 24], sizes = [24, 8], strides = [1, 1]} : vector<24x32xbf16> to vector<24x8xbf16>
    %cst_55 = arith.constant dense<0.000000e+00> : vector<16x24xf32>
    %123 = tpu.matmul %121, %122, %cst_55 {dimension_numbers = #tpu.dot_dimension_numbers<[1], [1], [0], [0], [0, 0, 1, 0], [], []>} : vector<16x8xbf16>, vector<24x8xbf16>, vector<16x24xf32> -> vector<16x24xf32>
    %cst_56 = arith.constant dense<0xFF800000> : vector<16xf32>
    %124 = vector.multi_reduction <maximumf>, %123, %cst_56 [1] : vector<16x24xf32> to vector<16xf32>
    %125 = vector.shape_cast %124 : vector<16xf32> to vector<16x1xf32>
    %126 = vector.broadcast %125 : vector<16x1xf32> to vector<16x24xf32>
    %127 = arith.subf %123, %126 : vector<16x24xf32>
    %128 = math.exp %127 : vector<16x24xf32>
    %cst_57 = arith.constant dense<0.000000e+00> : vector<16xf32>
    %129 = vector.multi_reduction <add>, %128, %cst_57 [1] : vector<16x24xf32> to vector<16xf32>
    %130 = vector.shape_cast %129 : vector<16xf32> to vector<16x1xf32>
    %131 = tpu.reciprocal %130 {approx = true} : vector<16x1xf32> -> vector<16x1xf32>
    %132 = vector.broadcast %131 : vector<16x1xf32> to vector<16x24xf32>
    %133 = arith.mulf %128, %132 : vector<16x24xf32>
    %134 = arith.truncf %133 : vector<16x24xf32> to vector<16x24xbf16>
    %c0_58 = arith.constant 0 : index
    %c3 = arith.constant 3 : index
    %c0_59 = arith.constant 0 : index
    %c0_60 = arith.constant 0 : index
    %135 = vector.load %arg12[%c0_58, %c3, %c0_59, %c0_60] : memref<1x4x16x24xbf16, #tpu.memory_space<vmem>>, vector<1x1x16x24xbf16>
    %136 = vector.shape_cast %135 : vector<1x1x16x24xbf16> to vector<16x24xbf16>
    %137 = vector.shape_cast %134 : vector<16x24xbf16> to vector<1x1x16x24xbf16>
    tpu.vector_store %arg12[%c0_58, %c3, %c0_59, %c0_60], %137 {strides = array<i32>} : memref<1x4x16x24xbf16, #tpu.memory_space<vmem>>, vector<1x1x16x24xbf16>,
    %138 = arith.truncf %133 : vector<16x24xf32> to vector<16x24xbf16>
    %139 = vector.extract_strided_slice %35 {offsets = [0, 24], sizes = [24, 8], strides = [1, 1]} : vector<24x32xbf16> to vector<24x8xbf16>
    %cst_61 = arith.constant dense<0.000000e+00> : vector<16x8xf32>
    %140 = tpu.matmul %138, %139, %cst_61 {dimension_numbers = #tpu.dot_dimension_numbers<[1], [0], [0], [1], [0, 0, 1, 1], [], []>} : vector<16x24xbf16>, vector<24x8xbf16>, vector<16x8xf32> -> vector<16x8xf32>
    %141 = arith.truncf %140 : vector<16x8xf32> to vector<16x8xbf16>
    %c24 = arith.constant 24 : index
    %c0_62 = arith.constant 0 : index
    %142 = vector.load %arg9[%c24, %c0_62] : memref<32x32xbf16, #tpu.memory_space<vmem>>, vector<8x32xbf16>
    %cst_63 = arith.constant dense<0.000000e+00> : vector<16x32xf32>
    %143 = tpu.matmul %141, %142, %cst_63 {dimension_numbers = #tpu.dot_dimension_numbers<[1], [0], [0], [1], [0, 0, 1, 1], [], []>} : vector<16x8xbf16>, vector<8x32xbf16>, vector<16x32xf32> -> vector<16x32xf32>
    %144 = arith.addf %117, %143 : vector<16x32xf32>
    %145 = arith.addf %1, %144 : vector<16x32xf32>
    %c0_64 = arith.constant 0 : index
    %c0_65 = arith.constant 0 : index
    %146 = vector.load %arg10[%c0_64, %c0_65] : memref<1x32xf32, #tpu.memory_space<vmem>>, vector<1x32xf32>
    %147 = vector.broadcast %146 : vector<1x32xf32> to vector<16x32xf32>
    %148 = arith.addf %145, %147 : vector<16x32xf32>
    %c0_66 = arith.constant 0 : index
    %c0_67 = arith.constant 0 : index
    %c0_68 = arith.constant 0 : index
    %149 = vector.load %arg11[%c0_66, %c0_67, %c0_68] : memref<1x16x32xf32, #tpu.memory_space<vmem>>, vector<1x16x32xf32>
    %150 = vector.shape_cast %149 : vector<1x16x32xf32> to vector<16x32xf32>
    %151 = vector.shape_cast %148 : vector<16x32xf32> to vector<1x16x32xf32>
    tpu.vector_store %arg11[%c0_66, %c0_67, %c0_68], %151 {strides = array<i32>} : memref<1x16x32xf32, #tpu.memory_space<vmem>>, vector<1x16x32xf32>,
    return
  }
  func.func @transform_0(%arg0: i32, %arg1: i32) -> (i32, i32, i32) {
    %c0_i32 = arith.constant 0 : i32
    %c0_i32_0 = arith.constant 0 : i32
    return %arg0, %arg1, %c0_i32 : i32, i32, i32
  }
  func.func @transform_1(%arg0: i32, %arg1: i32) -> (i32, i32, i32) {
    %c0_i32 = arith.constant 0 : i32
    %c0_i32_0 = arith.constant 0 : i32
    %c0_i32_1 = arith.constant 0 : i32
    return %arg0, %c0_i32, %c0_i32_0 : i32, i32, i32
  }
  func.func @transform_2(%arg0: i32, %arg1: i32) -> (i32, i32, i32) {
    %c0_i32 = arith.constant 0 : i32
    %c0_i32_0 = arith.constant 0 : i32
    %c0_i32_1 = arith.constant 0 : i32
    return %arg0, %c0_i32, %c0_i32_0 : i32, i32, i32
  }
  func.func @transform_3(%arg0: i32, %arg1: i32) -> (i32, i32) {
    %c0_i32 = arith.constant 0 : i32
    %c0_i32_0 = arith.constant 0 : i32
    %c0_i32_1 = arith.constant 0 : i32
    return %c0_i32, %c0_i32_0 : i32, i32
  }
  func.func @transform_4(%arg0: i32, %arg1: i32) -> (i32, i32) {
    %c0_i32 = arith.constant 0 : i32
    %c0_i32_0 = arith.constant 0 : i32
    %c0_i32_1 = arith.constant 0 : i32
    return %c0_i32, %c0_i32_0 : i32, i32
  }
  func.func @transform_5(%arg0: i32, %arg1: i32) -> (i32, i32) {
    %c0_i32 = arith.constant 0 : i32
    %c0_i32_0 = arith.constant 0 : i32
    %c0_i32_1 = arith.constant 0 : i32
    return %c0_i32, %c0_i32_0 : i32, i32
  }
  func.func @transform_6(%arg0: i32, %arg1: i32) -> (i32, i32) {
    %c0_i32 = arith.constant 0 : i32
    %c0_i32_0 = arith.constant 0 : i32
    %c0_i32_1 = arith.constant 0 : i32
    return %c0_i32, %c0_i32_0 : i32, i32
  }
  func.func @transform_7(%arg0: i32, %arg1: i32) -> (i32, i32) {
    %c0_i32 = arith.constant 0 : i32
    %c0_i32_0 = arith.constant 0 : i32
    %c0_i32_1 = arith.constant 0 : i32
    return %c0_i32, %c0_i32_0 : i32, i32
  }
  func.func @transform_8(%arg0: i32, %arg1: i32) -> (i32, i32) {
    %c0_i32 = arith.constant 0 : i32
    %c0_i32_0 = arith.constant 0 : i32
    %c0_i32_1 = arith.constant 0 : i32
    return %c0_i32, %c0_i32_0 : i32, i32
  }
  func.func @transform_9(%arg0: i32, %arg1: i32) -> (i32, i32, i32) {
    %c0_i32 = arith.constant 0 : i32
    %c0_i32_0 = arith.constant 0 : i32
    return %arg0, %arg1, %c0_i32 : i32, i32, i32
  }
  func.func @transform_10(%arg0: i32, %arg1: i32) -> (i32, i32, i32, i32) {
    %c0_i32 = arith.constant 0 : i32
    %c0_i32_0 = arith.constant 0 : i32
    %c0_i32_1 = arith.constant 0 : i32
    return %arg0, %c0_i32, %arg1, %c0_i32_0 : i32, i32, i32, i32
  }
}

module attributes {stable_mosaic.version = 11 : i64} {
  func.func @_conv_module_kernel(%arg0: i32, %arg1: memref<1x16x32xf32, #tpu.memory_space<vmem>>, %arg2: memref<1x32xf32, #tpu.memory_space<vmem>>, %arg3: memref<1x32xf32, #tpu.memory_space<vmem>>, %arg4: memref<32x64xbf16, #tpu.memory_space<vmem>>, %arg5: memref<1x64xf32, #tpu.memory_space<vmem>>, %arg6: memref<3x32xf32, #tpu.memory_space<vmem>>, %arg7: memref<1x32xf32, #tpu.memory_space<vmem>>, %arg8: memref<1x32xf32, #tpu.memory_space<vmem>>, %arg9: memref<1x32xf32, #tpu.memory_space<vmem>>, %arg10: memref<1x32xf32, #tpu.memory_space<vmem>>, %arg11: memref<1x32xf32, #tpu.memory_space<vmem>>, %arg12: memref<32x32xbf16, #tpu.memory_space<vmem>>, %arg13: memref<1x32xf32, #tpu.memory_space<vmem>>, %arg14: memref<1x16x32xf32, #tpu.memory_space<vmem>>, %arg15: memref<18x32xf32, #tpu.memory_space<vmem>>) attributes {dimension_semantics = [#tpu.dimension_semantics<parallel>], iteration_bounds = array<i64: 2>, scalar_prefetch = 0 : i64, scratch_operands = 1 : i64, tpu.core_type = #tpu.core_type<tc>, window_params = [{transform_indices = @transform_0, window_bounds = array<i64: 1, 16, 32>}, {pipeline_mode = #tpu.pipeline_mode<synchronous>, transform_indices = @transform_1, window_bounds = array<i64: 1, 32>}, {pipeline_mode = #tpu.pipeline_mode<synchronous>, transform_indices = @transform_2, window_bounds = array<i64: 1, 32>}, {pipeline_mode = #tpu.pipeline_mode<synchronous>, transform_indices = @transform_3, window_bounds = array<i64: 32, 64>}, {pipeline_mode = #tpu.pipeline_mode<synchronous>, transform_indices = @transform_4, window_bounds = array<i64: 1, 64>}, {pipeline_mode = #tpu.pipeline_mode<synchronous>, transform_indices = @transform_5, window_bounds = array<i64: 3, 32>}, {pipeline_mode = #tpu.pipeline_mode<synchronous>, transform_indices = @transform_6, window_bounds = array<i64: 1, 32>}, {pipeline_mode = #tpu.pipeline_mode<synchronous>, transform_indices = @transform_7, window_bounds = array<i64: 1, 32>}, {pipeline_mode = #tpu.pipeline_mode<synchronous>, transform_indices = @transform_8, window_bounds = array<i64: 1, 32>}, {pipeline_mode = #tpu.pipeline_mode<synchronous>, transform_indices = @transform_9, window_bounds = array<i64: 1, 32>}, {pipeline_mode = #tpu.pipeline_mode<synchronous>, transform_indices = @transform_10, window_bounds = array<i64: 1, 32>}, {pipeline_mode = #tpu.pipeline_mode<synchronous>, transform_indices = @transform_11, window_bounds = array<i64: 32, 32>}, {pipeline_mode = #tpu.pipeline_mode<synchronous>, transform_indices = @transform_12, window_bounds = array<i64: 1, 32>}, {transform_indices = @transform_13, window_bounds = array<i64: 1, 16, 32>}]} {
    %c0 = arith.constant 0 : index
    %c0_0 = arith.constant 0 : index
    %c0_1 = arith.constant 0 : index
    %0 = vector.load %arg1[%c0, %c0_0, %c0_1] : memref<1x16x32xf32, #tpu.memory_space<vmem>>, vector<1x16x32xf32>
    %1 = vector.shape_cast %0 : vector<1x16x32xf32> to vector<16x32xf32>
    %c0_2 = arith.constant 0 : index
    %c0_3 = arith.constant 0 : index
    %2 = vector.load %arg2[%c0_2, %c0_3] : memref<1x32xf32, #tpu.memory_space<vmem>>, vector<1x32xf32>
    %c0_4 = arith.constant 0 : index
    %c0_5 = arith.constant 0 : index
    %3 = vector.load %arg3[%c0_4, %c0_5] : memref<1x32xf32, #tpu.memory_space<vmem>>, vector<1x32xf32>
    %cst = arith.constant dense<0.000000e+00> : vector<16xf32>
    %4 = vector.multi_reduction <add>, %1, %cst [1] : vector<16x32xf32> to vector<16xf32>
    %5 = vector.shape_cast %4 : vector<16xf32> to vector<16x1xf32>
    %cst_6 = arith.constant 3.200000e+01 : f32
    %6 = vector.broadcast %cst_6 : f32 to vector<16x1xf32>
    %7 = arith.divf %5, %6 : vector<16x1xf32>
    %8 = vector.broadcast %7 : vector<16x1xf32> to vector<16x32xf32>
    %9 = arith.subf %1, %8 : vector<16x32xf32>
    %10 = arith.mulf %9, %9 : vector<16x32xf32>
    %cst_7 = arith.constant dense<0.000000e+00> : vector<16xf32>
    %11 = vector.multi_reduction <add>, %10, %cst_7 [1] : vector<16x32xf32> to vector<16xf32>
    %12 = vector.shape_cast %11 : vector<16xf32> to vector<16x1xf32>
    %cst_8 = arith.constant 3.200000e+01 : f32
    %13 = vector.broadcast %cst_8 : f32 to vector<16x1xf32>
    %14 = arith.divf %12, %13 : vector<16x1xf32>
    %15 = vector.broadcast %7 : vector<16x1xf32> to vector<16x32xf32>
    %16 = arith.subf %1, %15 : vector<16x32xf32>
    %cst_9 = arith.constant 9.99999974E-6 : f32
    %17 = vector.broadcast %cst_9 : f32 to vector<16x1xf32>
    %18 = arith.addf %14, %17 : vector<16x1xf32>
    %19 = math.rsqrt %18 : vector<16x1xf32>
    %20 = vector.broadcast %19 : vector<16x1xf32> to vector<16x32xf32>
    %21 = arith.mulf %16, %20 : vector<16x32xf32>
    %22 = vector.broadcast %2 : vector<1x32xf32> to vector<16x32xf32>
    %23 = arith.mulf %21, %22 : vector<16x32xf32>
    %24 = vector.broadcast %3 : vector<1x32xf32> to vector<16x32xf32>
    %25 = arith.addf %23, %24 : vector<16x32xf32>
    %26 = arith.truncf %25 : vector<16x32xf32> to vector<16x32xbf16>
    %c0_10 = arith.constant 0 : index
    %c0_11 = arith.constant 0 : index
    %27 = vector.load %arg4[%c0_10, %c0_11] : memref<32x64xbf16, #tpu.memory_space<vmem>>, vector<32x64xbf16>
    %cst_12 = arith.constant dense<0.000000e+00> : vector<16x64xf32>
    %28 = tpu.matmul %26, %27, %cst_12 {dimension_numbers = #tpu.dot_dimension_numbers<[1], [0], [0], [1], [0, 0, 1, 1], [], []>} : vector<16x32xbf16>, vector<32x64xbf16>, vector<16x64xf32> -> vector<16x64xf32>
    %c0_13 = arith.constant 0 : index
    %c0_14 = arith.constant 0 : index
    %29 = vector.load %arg5[%c0_13, %c0_14] : memref<1x64xf32, #tpu.memory_space<vmem>>, vector<1x64xf32>
    %30 = vector.broadcast %29 : vector<1x64xf32> to vector<16x64xf32>
    %31 = arith.addf %28, %30 : vector<16x64xf32>
    %32 = vector.extract_strided_slice %31 {offsets = [0, 0], sizes = [16, 32], strides = [1, 1]} : vector<16x64xf32> to vector<16x32xf32>
    %33 = vector.extract_strided_slice %31 {offsets = [0, 32], sizes = [16, 32], strides = [1, 1]} : vector<16x64xf32> to vector<16x32xf32>
    %cst_15 = arith.constant 0.000000e+00 : f32
    %34 = vector.broadcast %cst_15 : f32 to vector<16x32xf32>
    %35 = arith.subf %34, %33 : vector<16x32xf32>
    %36 = math.exp %35 : vector<16x32xf32>
    %cst_16 = arith.constant 1.000000e+00 : f32
    %37 = vector.broadcast %cst_16 : f32 to vector<16x32xf32>
    %38 = arith.addf %37, %36 : vector<16x32xf32>
    %cst_17 = arith.constant 1.000000e+00 : f32
    %39 = vector.broadcast %cst_17 : f32 to vector<16x32xf32>
    %40 = arith.divf %39, %38 : vector<16x32xf32>
    %41 = arith.mulf %32, %40 : vector<16x32xf32>
    %cst_18 = arith.constant 0.000000e+00 : f32
    %42 = vector.broadcast %cst_18 : f32 to vector<18x32xf32>
    %c0_19 = arith.constant 0 : index
    %c0_20 = arith.constant 0 : index
    %43 = vector.load %arg15[%c0_19, %c0_20] : memref<18x32xf32, #tpu.memory_space<vmem>>, vector<18x32xf32>
    tpu.vector_store %arg15[%c0_19, %c0_20], %42 {strides = array<i32>} : memref<18x32xf32, #tpu.memory_space<vmem>>, vector<18x32xf32>,
    %c1 = arith.constant 1 : index
    %c0_21 = arith.constant 0 : index
    %44 = vector.load %arg15[%c1, %c0_21] : memref<18x32xf32, #tpu.memory_space<vmem>>, vector<16x32xf32>
    tpu.vector_store %arg15[%c1, %c0_21], %41 {strides = array<i32>} : memref<18x32xf32, #tpu.memory_space<vmem>>, vector<16x32xf32>,
    %c0_22 = arith.constant 0 : index
    %c0_23 = arith.constant 0 : index
    %45 = vector.load %arg6[%c0_22, %c0_23] : memref<3x32xf32, #tpu.memory_space<vmem>>, vector<3x32xf32>
    %cst_24 = arith.constant 0.000000e+00 : f32
    %46 = vector.broadcast %cst_24 : f32 to vector<16x32xf32>
    %c0_25 = arith.constant 0 : index
    %c0_26 = arith.constant 0 : index
    %47 = vector.load %arg15[%c0_25, %c0_26] : memref<18x32xf32, #tpu.memory_space<vmem>>, vector<16x32xf32>
    %48 = vector.extract_strided_slice %45 {offsets = [0, 0], sizes = [1, 32], strides = [1, 1]} : vector<3x32xf32> to vector<1x32xf32>
    %49 = vector.broadcast %48 : vector<1x32xf32> to vector<16x32xf32>
    %50 = arith.mulf %47, %49 : vector<16x32xf32>
    %51 = arith.addf %46, %50 : vector<16x32xf32>
    %c1_27 = arith.constant 1 : index
    %c0_28 = arith.constant 0 : index
    %52 = vector.load %arg15[%c1_27, %c0_28] : memref<18x32xf32, #tpu.memory_space<vmem>>, vector<16x32xf32>
    %53 = vector.extract_strided_slice %45 {offsets = [1, 0], sizes = [1, 32], strides = [1, 1]} : vector<3x32xf32> to vector<1x32xf32>
    %54 = vector.broadcast %53 : vector<1x32xf32> to vector<16x32xf32>
    %55 = arith.mulf %52, %54 : vector<16x32xf32>
    %56 = arith.addf %51, %55 : vector<16x32xf32>
    %c2 = arith.constant 2 : index
    %c0_29 = arith.constant 0 : index
    %57 = vector.load %arg15[%c2, %c0_29] : memref<18x32xf32, #tpu.memory_space<vmem>>, vector<16x32xf32>
    %58 = vector.extract_strided_slice %45 {offsets = [2, 0], sizes = [1, 32], strides = [1, 1]} : vector<3x32xf32> to vector<1x32xf32>
    %59 = vector.broadcast %58 : vector<1x32xf32> to vector<16x32xf32>
    %60 = arith.mulf %57, %59 : vector<16x32xf32>
    %61 = arith.addf %56, %60 : vector<16x32xf32>
    %c0_30 = arith.constant 0 : index
    %c0_31 = arith.constant 0 : index
    %62 = vector.load %arg7[%c0_30, %c0_31] : memref<1x32xf32, #tpu.memory_space<vmem>>, vector<1x32xf32>
    %63 = vector.broadcast %62 : vector<1x32xf32> to vector<16x32xf32>
    %64 = arith.addf %61, %63 : vector<16x32xf32>
    %c0_32 = arith.constant 0 : index
    %c0_33 = arith.constant 0 : index
    %65 = vector.load %arg10[%c0_32, %c0_33] : memref<1x32xf32, #tpu.memory_space<vmem>>, vector<1x32xf32>
    %66 = vector.broadcast %65 : vector<1x32xf32> to vector<16x32xf32>
    %67 = arith.subf %64, %66 : vector<16x32xf32>
    %c0_34 = arith.constant 0 : index
    %c0_35 = arith.constant 0 : index
    %68 = vector.load %arg11[%c0_34, %c0_35] : memref<1x32xf32, #tpu.memory_space<vmem>>, vector<1x32xf32>
    %cst_36 = arith.constant 9.99999974E-6 : f32
    %69 = vector.broadcast %cst_36 : f32 to vector<1x32xf32>
    %70 = arith.addf %68, %69 : vector<1x32xf32>
    %71 = math.rsqrt %70 : vector<1x32xf32>
    %72 = vector.broadcast %71 : vector<1x32xf32> to vector<16x32xf32>
    %73 = arith.mulf %67, %72 : vector<16x32xf32>
    %c0_37 = arith.constant 0 : index
    %c0_38 = arith.constant 0 : index
    %74 = vector.load %arg8[%c0_37, %c0_38] : memref<1x32xf32, #tpu.memory_space<vmem>>, vector<1x32xf32>
    %75 = vector.broadcast %74 : vector<1x32xf32> to vector<16x32xf32>
    %76 = arith.mulf %73, %75 : vector<16x32xf32>
    %c0_39 = arith.constant 0 : index
    %c0_40 = arith.constant 0 : index
    %77 = vector.load %arg9[%c0_39, %c0_40] : memref<1x32xf32, #tpu.memory_space<vmem>>, vector<1x32xf32>
    %78 = vector.broadcast %77 : vector<1x32xf32> to vector<16x32xf32>
    %79 = arith.addf %76, %78 : vector<16x32xf32>
    %cst_41 = arith.constant 0.000000e+00 : f32
    %80 = vector.broadcast %cst_41 : f32 to vector<16x32xf32>
    %81 = arith.subf %80, %79 : vector<16x32xf32>
    %82 = math.exp %81 : vector<16x32xf32>
    %cst_42 = arith.constant 1.000000e+00 : f32
    %83 = vector.broadcast %cst_42 : f32 to vector<16x32xf32>
    %84 = arith.addf %83, %82 : vector<16x32xf32>
    %cst_43 = arith.constant 1.000000e+00 : f32
    %85 = vector.broadcast %cst_43 : f32 to vector<16x32xf32>
    %86 = arith.divf %85, %84 : vector<16x32xf32>
    %87 = arith.mulf %79, %86 : vector<16x32xf32>
    %88 = arith.truncf %87 : vector<16x32xf32> to vector<16x32xbf16>
    %c0_44 = arith.constant 0 : index
    %c0_45 = arith.constant 0 : index
    %89 = vector.load %arg12[%c0_44, %c0_45] : memref<32x32xbf16, #tpu.memory_space<vmem>>, vector<32x32xbf16>
    %cst_46 = arith.constant dense<0.000000e+00> : vector<16x32xf32>
    %90 = tpu.matmul %88, %89, %cst_46 {dimension_numbers = #tpu.dot_dimension_numbers<[1], [0], [0], [1], [0, 0, 1, 1], [], []>} : vector<16x32xbf16>, vector<32x32xbf16>, vector<16x32xf32> -> vector<16x32xf32>
    %c0_47 = arith.constant 0 : index
    %c0_48 = arith.constant 0 : index
    %91 = vector.load %arg13[%c0_47, %c0_48] : memref<1x32xf32, #tpu.memory_space<vmem>>, vector<1x32xf32>
    %92 = vector.broadcast %91 : vector<1x32xf32> to vector<16x32xf32>
    %93 = arith.addf %90, %92 : vector<16x32xf32>
    %94 = arith.addf %1, %93 : vector<16x32xf32>
    %c0_49 = arith.constant 0 : index
    %c0_50 = arith.constant 0 : index
    %c0_51 = arith.constant 0 : index
    %95 = vector.load %arg14[%c0_49, %c0_50, %c0_51] : memref<1x16x32xf32, #tpu.memory_space<vmem>>, vector<1x16x32xf32>
    %96 = vector.shape_cast %95 : vector<1x16x32xf32> to vector<16x32xf32>
    %97 = vector.shape_cast %94 : vector<16x32xf32> to vector<1x16x32xf32>
    tpu.vector_store %arg14[%c0_49, %c0_50, %c0_51], %97 {strides = array<i32>} : memref<1x16x32xf32, #tpu.memory_space<vmem>>, vector<1x16x32xf32>,
    return
  }
  func.func @transform_0(%arg0: i32) -> (i32, i32, i32) {
    %c0_i32 = arith.constant 0 : i32
    %c0_i32_0 = arith.constant 0 : i32
    %c0_i32_1 = arith.constant 0 : i32
    return %arg0, %c0_i32, %c0_i32_0 : i32, i32, i32
  }
  func.func @transform_1(%arg0: i32) -> (i32, i32) {
    %c0_i32 = arith.constant 0 : i32
    %c0_i32_0 = arith.constant 0 : i32
    %c0_i32_1 = arith.constant 0 : i32
    return %c0_i32, %c0_i32_0 : i32, i32
  }
  func.func @transform_2(%arg0: i32) -> (i32, i32) {
    %c0_i32 = arith.constant 0 : i32
    %c0_i32_0 = arith.constant 0 : i32
    %c0_i32_1 = arith.constant 0 : i32
    return %c0_i32, %c0_i32_0 : i32, i32
  }
  func.func @transform_3(%arg0: i32) -> (i32, i32) {
    %c0_i32 = arith.constant 0 : i32
    %c0_i32_0 = arith.constant 0 : i32
    %c0_i32_1 = arith.constant 0 : i32
    return %c0_i32, %c0_i32_0 : i32, i32
  }
  func.func @transform_4(%arg0: i32) -> (i32, i32) {
    %c0_i32 = arith.constant 0 : i32
    %c0_i32_0 = arith.constant 0 : i32
    %c0_i32_1 = arith.constant 0 : i32
    return %c0_i32, %c0_i32_0 : i32, i32
  }
  func.func @transform_5(%arg0: i32) -> (i32, i32) {
    %c0_i32 = arith.constant 0 : i32
    %c0_i32_0 = arith.constant 0 : i32
    %c0_i32_1 = arith.constant 0 : i32
    return %c0_i32, %c0_i32_0 : i32, i32
  }
  func.func @transform_6(%arg0: i32) -> (i32, i32) {
    %c0_i32 = arith.constant 0 : i32
    %c0_i32_0 = arith.constant 0 : i32
    %c0_i32_1 = arith.constant 0 : i32
    return %c0_i32, %c0_i32_0 : i32, i32
  }
  func.func @transform_7(%arg0: i32) -> (i32, i32) {
    %c0_i32 = arith.constant 0 : i32
    %c0_i32_0 = arith.constant 0 : i32
    %c0_i32_1 = arith.constant 0 : i32
    return %c0_i32, %c0_i32_0 : i32, i32
  }
  func.func @transform_8(%arg0: i32) -> (i32, i32) {
    %c0_i32 = arith.constant 0 : i32
    %c0_i32_0 = arith.constant 0 : i32
    %c0_i32_1 = arith.constant 0 : i32
    return %c0_i32, %c0_i32_0 : i32, i32
  }
  func.func @transform_9(%arg0: i32) -> (i32, i32) {
    %c0_i32 = arith.constant 0 : i32
    %c0_i32_0 = arith.constant 0 : i32
    %c0_i32_1 = arith.constant 0 : i32
    return %c0_i32, %c0_i32_0 : i32, i32
  }
  func.func @transform_10(%arg0: i32) -> (i32, i32) {
    %c0_i32 = arith.constant 0 : i32
    %c0_i32_0 = arith.constant 0 : i32
    %c0_i32_1 = arith.constant 0 : i32
    return %c0_i32, %c0_i32_0 : i32, i32
  }
  func.func @transform_11(%arg0: i32) -> (i32, i32) {
    %c0_i32 = arith.constant 0 : i32
    %c0_i32_0 = arith.constant 0 : i32
    %c0_i32_1 = arith.constant 0 : i32
    return %c0_i32, %c0_i32_0 : i32, i32
  }
  func.func @transform_12(%arg0: i32) -> (i32, i32) {
    %c0_i32 = arith.constant 0 : i32
    %c0_i32_0 = arith.constant 0 : i32
    %c0_i32_1 = arith.constant 0 : i32
    return %c0_i32, %c0_i32_0 : i32, i32
  }
  func.func @transform_13(%arg0: i32) -> (i32, i32, i32) {
    %c0_i32 = arith.constant 0 : i32
    %c0_i32_0 = arith.constant 0 : i32
    %c0_i32_1 = arith.constant 0 : i32
    return %arg0, %c0_i32, %c0_i32_0 : i32, i32, i32
  }
}

module attributes {stable_mosaic.version = 11 : i64} {
  func.func @_ffn_half_kernel(%arg0: i32, %arg1: memref<32x32xf32, #tpu.memory_space<vmem>>, %arg2: memref<1x32xf32, #tpu.memory_space<vmem>>, %arg3: memref<1x32xf32, #tpu.memory_space<vmem>>, %arg4: memref<32x128xbf16, #tpu.memory_space<vmem>>, %arg5: memref<1x128xf32, #tpu.memory_space<vmem>>, %arg6: memref<128x32xbf16, #tpu.memory_space<vmem>>, %arg7: memref<1x32xf32, #tpu.memory_space<vmem>>, %arg8: memref<1x32xf32, #tpu.memory_space<vmem>>, %arg9: memref<1x32xf32, #tpu.memory_space<vmem>>, %arg10: memref<32x32xf32, #tpu.memory_space<vmem>>) attributes {dimension_semantics = [#tpu.dimension_semantics<parallel>], iteration_bounds = array<i64: 1>, scalar_prefetch = 0 : i64, scratch_operands = 0 : i64, tpu.core_type = #tpu.core_type<tc>, window_params = [{transform_indices = @transform_0, window_bounds = array<i64: 32, 32>}, {pipeline_mode = #tpu.pipeline_mode<synchronous>, transform_indices = @transform_1, window_bounds = array<i64: 1, 32>}, {pipeline_mode = #tpu.pipeline_mode<synchronous>, transform_indices = @transform_2, window_bounds = array<i64: 1, 32>}, {pipeline_mode = #tpu.pipeline_mode<synchronous>, transform_indices = @transform_3, window_bounds = array<i64: 32, 128>}, {pipeline_mode = #tpu.pipeline_mode<synchronous>, transform_indices = @transform_4, window_bounds = array<i64: 1, 128>}, {pipeline_mode = #tpu.pipeline_mode<synchronous>, transform_indices = @transform_5, window_bounds = array<i64: 128, 32>}, {pipeline_mode = #tpu.pipeline_mode<synchronous>, transform_indices = @transform_6, window_bounds = array<i64: 1, 32>}, {pipeline_mode = #tpu.pipeline_mode<synchronous>, transform_indices = @transform_7, window_bounds = array<i64: 1, 32>}, {pipeline_mode = #tpu.pipeline_mode<synchronous>, transform_indices = @transform_8, window_bounds = array<i64: 1, 32>}, {transform_indices = @transform_9, window_bounds = array<i64: 32, 32>}]} {
    %c0 = arith.constant 0 : index
    %c0_0 = arith.constant 0 : index
    %0 = vector.load %arg1[%c0, %c0_0] : memref<32x32xf32, #tpu.memory_space<vmem>>, vector<32x32xf32>
    %c0_1 = arith.constant 0 : index
    %c0_2 = arith.constant 0 : index
    %1 = vector.load %arg2[%c0_1, %c0_2] : memref<1x32xf32, #tpu.memory_space<vmem>>, vector<1x32xf32>
    %c0_3 = arith.constant 0 : index
    %c0_4 = arith.constant 0 : index
    %2 = vector.load %arg3[%c0_3, %c0_4] : memref<1x32xf32, #tpu.memory_space<vmem>>, vector<1x32xf32>
    %cst = arith.constant dense<0.000000e+00> : vector<32xf32>
    %3 = vector.multi_reduction <add>, %0, %cst [1] : vector<32x32xf32> to vector<32xf32>
    %4 = vector.shape_cast %3 : vector<32xf32> to vector<32x1xf32>
    %cst_5 = arith.constant 3.200000e+01 : f32
    %5 = vector.broadcast %cst_5 : f32 to vector<32x1xf32>
    %6 = arith.divf %4, %5 : vector<32x1xf32>
    %7 = vector.broadcast %6 : vector<32x1xf32> to vector<32x32xf32>
    %8 = arith.subf %0, %7 : vector<32x32xf32>
    %9 = arith.mulf %8, %8 : vector<32x32xf32>
    %cst_6 = arith.constant dense<0.000000e+00> : vector<32xf32>
    %10 = vector.multi_reduction <add>, %9, %cst_6 [1] : vector<32x32xf32> to vector<32xf32>
    %11 = vector.shape_cast %10 : vector<32xf32> to vector<32x1xf32>
    %cst_7 = arith.constant 3.200000e+01 : f32
    %12 = vector.broadcast %cst_7 : f32 to vector<32x1xf32>
    %13 = arith.divf %11, %12 : vector<32x1xf32>
    %14 = vector.broadcast %6 : vector<32x1xf32> to vector<32x32xf32>
    %15 = arith.subf %0, %14 : vector<32x32xf32>
    %cst_8 = arith.constant 9.99999974E-6 : f32
    %16 = vector.broadcast %cst_8 : f32 to vector<32x1xf32>
    %17 = arith.addf %13, %16 : vector<32x1xf32>
    %18 = math.rsqrt %17 : vector<32x1xf32>
    %19 = vector.broadcast %18 : vector<32x1xf32> to vector<32x32xf32>
    %20 = arith.mulf %15, %19 : vector<32x32xf32>
    %21 = vector.broadcast %1 : vector<1x32xf32> to vector<32x32xf32>
    %22 = arith.mulf %20, %21 : vector<32x32xf32>
    %23 = vector.broadcast %2 : vector<1x32xf32> to vector<32x32xf32>
    %24 = arith.addf %22, %23 : vector<32x32xf32>
    %25 = arith.truncf %24 : vector<32x32xf32> to vector<32x32xbf16>
    %c0_9 = arith.constant 0 : index
    %c0_10 = arith.constant 0 : index
    %26 = vector.load %arg4[%c0_9, %c0_10] : memref<32x128xbf16, #tpu.memory_space<vmem>>, vector<32x128xbf16>
    %cst_11 = arith.constant dense<0.000000e+00> : vector<32x128xf32>
    %27 = tpu.matmul %25, %26, %cst_11 {dimension_numbers = #tpu.dot_dimension_numbers<[1], [0], [0], [1], [0, 0, 1, 1], [], []>} : vector<32x32xbf16>, vector<32x128xbf16>, vector<32x128xf32> -> vector<32x128xf32>
    %c0_12 = arith.constant 0 : index
    %c0_13 = arith.constant 0 : index
    %28 = vector.load %arg5[%c0_12, %c0_13] : memref<1x128xf32, #tpu.memory_space<vmem>>, vector<1x128xf32>
    %29 = vector.broadcast %28 : vector<1x128xf32> to vector<32x128xf32>
    %30 = arith.addf %27, %29 : vector<32x128xf32>
    %cst_14 = arith.constant 0.000000e+00 : f32
    %31 = vector.broadcast %cst_14 : f32 to vector<32x128xf32>
    %32 = arith.subf %31, %30 : vector<32x128xf32>
    %33 = math.exp %32 : vector<32x128xf32>
    %cst_15 = arith.constant 1.000000e+00 : f32
    %34 = vector.broadcast %cst_15 : f32 to vector<32x128xf32>
    %35 = arith.addf %34, %33 : vector<32x128xf32>
    %cst_16 = arith.constant 1.000000e+00 : f32
    %36 = vector.broadcast %cst_16 : f32 to vector<32x128xf32>
    %37 = arith.divf %36, %35 : vector<32x128xf32>
    %38 = arith.mulf %30, %37 : vector<32x128xf32>
    %39 = arith.truncf %38 : vector<32x128xf32> to vector<32x128xbf16>
    %c0_17 = arith.constant 0 : index
    %c0_18 = arith.constant 0 : index
    %40 = vector.load %arg6[%c0_17, %c0_18] : memref<128x32xbf16, #tpu.memory_space<vmem>>, vector<128x32xbf16>
    %cst_19 = arith.constant dense<0.000000e+00> : vector<32x32xf32>
    %41 = tpu.matmul %39, %40, %cst_19 {dimension_numbers = #tpu.dot_dimension_numbers<[1], [0], [0], [1], [0, 0, 1, 1], [], []>} : vector<32x128xbf16>, vector<128x32xbf16>, vector<32x32xf32> -> vector<32x32xf32>
    %c0_20 = arith.constant 0 : index
    %c0_21 = arith.constant 0 : index
    %42 = vector.load %arg7[%c0_20, %c0_21] : memref<1x32xf32, #tpu.memory_space<vmem>>, vector<1x32xf32>
    %43 = vector.broadcast %42 : vector<1x32xf32> to vector<32x32xf32>
    %44 = arith.addf %41, %43 : vector<32x32xf32>
    %cst_22 = arith.constant 5.000000e-01 : f32
    %45 = vector.broadcast %cst_22 : f32 to vector<32x32xf32>
    %46 = arith.mulf %45, %44 : vector<32x32xf32>
    %47 = arith.addf %0, %46 : vector<32x32xf32>
    %c0_23 = arith.constant 0 : index
    %c0_24 = arith.constant 0 : index
    %48 = vector.load %arg8[%c0_23, %c0_24] : memref<1x32xf32, #tpu.memory_space<vmem>>, vector<1x32xf32>
    %c0_25 = arith.constant 0 : index
    %c0_26 = arith.constant 0 : index
    %49 = vector.load %arg9[%c0_25, %c0_26] : memref<1x32xf32, #tpu.memory_space<vmem>>, vector<1x32xf32>
    %cst_27 = arith.constant dense<0.000000e+00> : vector<32xf32>
    %50 = vector.multi_reduction <add>, %47, %cst_27 [1] : vector<32x32xf32> to vector<32xf32>
    %51 = vector.shape_cast %50 : vector<32xf32> to vector<32x1xf32>
    %cst_28 = arith.constant 3.200000e+01 : f32
    %52 = vector.broadcast %cst_28 : f32 to vector<32x1xf32>
    %53 = arith.divf %51, %52 : vector<32x1xf32>
    %54 = vector.broadcast %53 : vector<32x1xf32> to vector<32x32xf32>
    %55 = arith.subf %47, %54 : vector<32x32xf32>
    %56 = arith.mulf %55, %55 : vector<32x32xf32>
    %cst_29 = arith.constant dense<0.000000e+00> : vector<32xf32>
    %57 = vector.multi_reduction <add>, %56, %cst_29 [1] : vector<32x32xf32> to vector<32xf32>
    %58 = vector.shape_cast %57 : vector<32xf32> to vector<32x1xf32>
    %cst_30 = arith.constant 3.200000e+01 : f32
    %59 = vector.broadcast %cst_30 : f32 to vector<32x1xf32>
    %60 = arith.divf %58, %59 : vector<32x1xf32>
    %61 = vector.broadcast %53 : vector<32x1xf32> to vector<32x32xf32>
    %62 = arith.subf %47, %61 : vector<32x32xf32>
    %cst_31 = arith.constant 9.99999974E-6 : f32
    %63 = vector.broadcast %cst_31 : f32 to vector<32x1xf32>
    %64 = arith.addf %60, %63 : vector<32x1xf32>
    %65 = math.rsqrt %64 : vector<32x1xf32>
    %66 = vector.broadcast %65 : vector<32x1xf32> to vector<32x32xf32>
    %67 = arith.mulf %62, %66 : vector<32x32xf32>
    %68 = vector.broadcast %48 : vector<1x32xf32> to vector<32x32xf32>
    %69 = arith.mulf %67, %68 : vector<32x32xf32>
    %70 = vector.broadcast %49 : vector<1x32xf32> to vector<32x32xf32>
    %71 = arith.addf %69, %70 : vector<32x32xf32>
    %c0_32 = arith.constant 0 : index
    %c0_33 = arith.constant 0 : index
    %72 = vector.load %arg10[%c0_32, %c0_33] : memref<32x32xf32, #tpu.memory_space<vmem>>, vector<32x32xf32>
    tpu.vector_store %arg10[%c0_32, %c0_33], %71 {strides = array<i32>} : memref<32x32xf32, #tpu.memory_space<vmem>>, vector<32x32xf32>,
    return
  }
  func.func @transform_0(%arg0: i32) -> (i32, i32) {
    %c0_i32 = arith.constant 0 : i32
    %c0_i32_0 = arith.constant 0 : i32
    return %arg0, %c0_i32 : i32, i32
  }
  func.func @transform_1(%arg0: i32) -> (i32, i32) {
    %c0_i32 = arith.constant 0 : i32
    %c0_i32_0 = arith.constant 0 : i32
    %c0_i32_1 = arith.constant 0 : i32
    return %c0_i32, %c0_i32_0 : i32, i32
  }
  func.func @transform_2(%arg0: i32) -> (i32, i32) {
    %c0_i32 = arith.constant 0 : i32
    %c0_i32_0 = arith.constant 0 : i32
    %c0_i32_1 = arith.constant 0 : i32
    return %c0_i32, %c0_i32_0 : i32, i32
  }
  func.func @transform_3(%arg0: i32) -> (i32, i32) {
    %c0_i32 = arith.constant 0 : i32
    %c0_i32_0 = arith.constant 0 : i32
    %c0_i32_1 = arith.constant 0 : i32
    return %c0_i32, %c0_i32_0 : i32, i32
  }
  func.func @transform_4(%arg0: i32) -> (i32, i32) {
    %c0_i32 = arith.constant 0 : i32
    %c0_i32_0 = arith.constant 0 : i32
    %c0_i32_1 = arith.constant 0 : i32
    return %c0_i32, %c0_i32_0 : i32, i32
  }
  func.func @transform_5(%arg0: i32) -> (i32, i32) {
    %c0_i32 = arith.constant 0 : i32
    %c0_i32_0 = arith.constant 0 : i32
    %c0_i32_1 = arith.constant 0 : i32
    return %c0_i32, %c0_i32_0 : i32, i32
  }
  func.func @transform_6(%arg0: i32) -> (i32, i32) {
    %c0_i32 = arith.constant 0 : i32
    %c0_i32_0 = arith.constant 0 : i32
    %c0_i32_1 = arith.constant 0 : i32
    return %c0_i32, %c0_i32_0 : i32, i32
  }
  func.func @transform_7(%arg0: i32) -> (i32, i32) {
    %c0_i32 = arith.constant 0 : i32
    %c0_i32_0 = arith.constant 0 : i32
    %c0_i32_1 = arith.constant 0 : i32
    return %c0_i32, %c0_i32_0 : i32, i32
  }
  func.func @transform_8(%arg0: i32) -> (i32, i32) {
    %c0_i32 = arith.constant 0 : i32
    %c0_i32_0 = arith.constant 0 : i32
    %c0_i32_1 = arith.constant 0 : i32
    return %c0_i32, %c0_i32_0 : i32, i32
  }
  func.func @transform_9(%arg0: i32) -> (i32, i32) {
    %c0_i32 = arith.constant 0 : i32
    %c0_i32_0 = arith.constant 0 : i32
    return %arg0, %c0_i32 : i32, i32
  }
}

</mosaic_0001>

<bundles_post_ra>
// kernel: cross_conformer_block.7
= control target key start
LH: loop header
LB: loop body
LE: loop exit
PB: predicated region body
PF: predicated region fallthrough
CT: control target
= control target key end

     0   :  { %vm39_vm0 = vcmask 261120   ;;  %s601_s0 = inlined_call_operand.vmem [shape: f32[32,32], index: 0, kind: input, shape index: {}]   ;;  %s602_s7 = inlined_call_operand.vmem [shape: f32[1,32], index: 7, kind: input, shape index: {}, may-alias: {1,7}]   ;;  %s603_s8 = inlined_call_operand.vmem [shape: f32[1,32], index: 8, kind: input, shape index: {}, may-alias: {2,8}]   ;;  %s604_s3 = inlined_call_operand.vmem [shape: bf16[32,128], index: 3, kind: input, shape index: {}]   ;;  %s605_s1 = inlined_call_operand.vmem [shape: f32[1,32], index: 1, kind: input, shape index: {}, may-alias: {1,7}]   ;;  %s606_s2 = inlined_call_operand.vmem [shape: f32[1,32], index: 2, kind: input, shape index: {}, may-alias: {2,8}]   ;;  %s607_s5 = inlined_call_operand.vmem [shape: bf16[128,32], index: 5, kind: input, shape index: {}]   ;;  %s608_s4 = inlined_call_operand.vmem [shape: f32[1,128], index: 4, kind: input, shape index: {}]   ;;  %s609_s6 = inlined_call_operand.vmem [shape: f32[1,32], index: 6, kind: input, shape index: {}]   ;;  %s610_s9 = inlined_call_operand.vmem [shape: f32[32,32], index: 9, kind: output, shape index: {}]  }
   0x1   :  { %v504_v0 = vld [vmem:[%s601_s0] sm:$0xff]  ;;  %v509_v1 = vld [vmem:[%s601_s0 + $0x10] sm:$0xff]  ;;  %v514_v2 = vld [vmem:[%s601_s0 + $0x8] sm:$0xff] }
   0x2   :  { %v40_v3 = vsel %vm39_vm0, %v504_v0, 0.0  ;;  %v46_v4 = vsel %vm39_vm0, %v509_v1, 0.0  ;;  %v523_v5 = vld [vmem:[%s601_s0 + $0x18] sm:$0xff]  ;;  %v43_v6 = vsel %vm39_vm0, %v514_v2, 0.0  ;;  %v417_v28 = vld [vmem:[%s604_s3 + $0x8] sm:$0xff]   ;;  %v418_v29 = vld [vmem:[%s604_s3] sm:$0xff]  }
   0x3   :  { %41 = vadd.xlane.f32.xlu0 %v40_v3  ;;  %47 = vadd.xlane.f32.xlu1 %v46_v4  ;;  %v49_v7 = vsel %vm39_vm0, %v523_v5, 0.0  ;;  %v359_v44 = vld [vmem:[%s605_s1] ss:$0 sm:$0xff]  ;;  %v419_v62 = vld [vmem:[%s607_s5 + $0x38] sm:$0xff]   ;;  %v420_v63 = vld [vmem:[%s607_s5 + $0x30] sm:$0xff]  }
   0x4   :  { %389 = vmatprep.subr.bf16.mxu0 %v417_v28  ;;  %v360_v49 = vld [vmem:[%s606_s2] ss:$0 sm:$0xff]  ;;  %397 = vmatprep.subr.bf16.mxu1 %v419_v62  ;;  %v421_v3 = vld [vmem:[%s607_s5 + $0x28] sm:$0xff]  }
   0x5   :  { %390 = vmatpush3.bf16.msra.mxu0 %v417_v28  ;;  %398 = vmatpush3.bf16.msra.mxu1 %v419_v62  ;;  %v422_v4 = vld [vmem:[%s607_s5 + $0x20] sm:$0xff]  }
   0x6   :  { %391 = vmatprep.subr.bf16.mxu0 %v418_v29  ;;  %399 = vmatprep.subr.bf16.mxu1 %v420_v63 }
   0x7   :  { %44 = vadd.xlane.f32.xlu0 %v43_v6  ;;  %50 = vadd.xlane.f32.xlu1 %v49_v7  ;;  %v423_v6 = vld [vmem:[%s607_s5 + $0x18] sm:$0xff]   ;;  %v424_v7 = vld [vmem:[%s607_s5 + $0x10] sm:$0xff]  }
   0x9   :  { %392 = vmatpush3.bf16.msra.mxu0 %v418_v29  ;;  %400 = vmatpush3.bf16.msra.mxu1 %v420_v63 }
   0xa   :  { %401 = vmatprep.subr.bf16.mxu1 %v421_v3 }
   0xd   :  { %402 = vmatpush3.bf16.msra.mxu1 %v421_v3 }
   0xe   :  { %403 = vmatprep.subr.bf16.mxu1 %v422_v4 }
  0x11   :  { %404 = vmatpush3.bf16.msra.mxu1 %v422_v4 }
  0x12   :  { %405 = vmatprep.subr.bf16.mxu1 %v423_v6 }
  0x15   :  { %406 = vmatpush3.bf16.msra.mxu1 %v423_v6 }
  0x16   :  { %407 = vmatprep.subr.bf16.mxu1 %v424_v7 }
  0x19   :  { %408 = vmatpush3.bf16.msra.mxu1 %v424_v7 }
  0x8c   :  { %v42_v8 = vpop.xlane.xlu0 %41  ;;  %v48_v9 = vpop.xlane.xlu1 %47 }
  0x8d   :  { %v53_v10 = vmul.f32 0.03125, %v42_v8  ;;  %v55_v11 = vmul.f32 0.03125, %v48_v9  ;;  %v425_v8 = vld [vmem:[%s607_s5 + $0x8] sm:$0xff]   ;;  %v426_v9 = vld [vmem:[%s607_s5] sm:$0xff]  }
  0x8e   :  { %409 = vmatprep.subr.bf16.mxu1 %v425_v8 }
  0x8f   :  { %v57_v12 = vsub.f32 %v504_v0, %v53_v10  ;;  %v59_v13 = vsub.f32 %v509_v1, %v55_v11  ;;  %410 = vmatpush3.bf16.msra.mxu1 %v425_v8  ;;  %v361_v10 = vld [vmem:[%s608_s4] ss:$0 sm:$0xff] }
  0x90   :  { %v45_v14 = vpop.xlane.xlu0 %44  ;;  %v51_v15 = vpop.xlane.xlu1 %50  ;;  %411 = vmatprep.subr.bf16.mxu1 %v426_v9 }
  0x91   :  { %v54_v16 = vmul.f32 0.03125, %v45_v14  ;;  %v56_v17 = vmul.f32 0.03125, %v51_v15  ;;  %v61_v18 = vmul.f32 %v57_v12, %v57_v12  ;;  %v63_v19 = vmul.f32 %v59_v13, %v59_v13 }
  0x93   :  { %v58_v20 = vsub.f32 %v514_v2, %v54_v16  ;;  %v60_v21 = vsub.f32 %v523_v5, %v56_v17  ;;  %v65_v22 = vsel %vm39_vm0, %v61_v18, 0.0  ;;  %v71_v23 = vsel %vm39_vm0, %v63_v19, 0.0  ;;  %412 = vmatpush3.bf16.msra.mxu1 %v426_v9 }
  0x94   :  { %66 = vadd.xlane.f32.xlu0 %v65_v22 }
  0x95   :  { %v62_v24 = vmul.f32 %v58_v20, %v58_v20  ;;  %v64_v25 = vmul.f32 %v60_v21, %v60_v21 }
  0x97   :  { %v68_v26 = vsel %vm39_vm0, %v62_v24, 0.0  ;;  %v74_v27 = vsel %vm39_vm0, %v64_v25, 0.0 }
  0x98   :  { %72 = vadd.xlane.f32.xlu0 %v71_v23  ;;  %69 = vadd.xlane.f32.xlu1 %v68_v26 }
  0x9c   :  { %75 = vadd.xlane.f32.xlu1 %v74_v27 }
 0x11d   :  { %v67_v30 = vpop.xlane.xlu0 %66 }
 0x11e   :  { %v77_v31 = vmul.f32 0.03125, %v67_v30 }
 0x120   :  { %v81_v32 = vadd.f32 1e-05, %v77_v31 }
 0x121   :  { %v70_v33 = vpop.xlane.xlu1 %69  ;;  %v73_v34 = vpop.xlane.xlu0 %72 }
 0x122   :  { %427 = vrsqrt.f32 %v81_v32  ;;  %v78_v35 = vmul.f32 0.03125, %v70_v33  ;;  %v79_v36 = vmul.f32 0.03125, %v73_v34 }
 0x124   :  { %v82_v37 = vadd.f32 1e-05, %v78_v35  ;;  %v83_v38 = vadd.f32 1e-05, %v79_v36 }
 0x125   :  { %v76_v39 = vpop.xlane.xlu1 %75 }
 0x126   :  { %429 = vrsqrt.f32 %v82_v37  ;;  %v80_v40 = vmul.f32 0.03125, %v76_v39 }
 0x127   :  { %431 = vrsqrt.f32 %v83_v38 }
 0x128   :  { %v84_v41 = vadd.f32 1e-05, %v80_v40 }
 0x12a   :  { %433 = vrsqrt.f32 %v84_v41 }
 0x12f   :  { %v428_v42 = vpop.eup %427 }
 0x130   :  { %v89_v43 = vmul.f32 %v428_v42, %v57_v12 }
 0x132   :  { %v99_v48 = vmul.f32 %v359_v44, %v89_v43 }
 0x133   :  { %v430_v45 = vpop.eup %429 }
 0x134   :  { %v432_v46 = vpop.eup %431  ;;  %v90_v47 = vmul.f32 %v430_v45, %v58_v20  ;;  %v109_v53 = vadd.f32 %v360_v49, %v99_v48  ;;  %v366_v45 = vld [vmem:[%s609_s6] ss:$0 sm:$0xff] }
 0x135   :  { %v91_v50 = vmul.f32 %v432_v46, %v59_v13 }
 0x136   :  { %v100_v51 = vmul.f32 %v359_v44, %v90_v47 }
 0x137   :  { %v434_v52 = vpop.eup %433  ;;  %v101_v56 = vmul.f32 %v359_v44, %v91_v50 }
 0x138   :  { %v110_v54 = vadd.f32 %v360_v49, %v100_v51  ;;  %v92_v55 = vmul.f32 %v434_v52, %v60_v21 }
 0x139   :  { %v111_v59 = vadd.f32 %v360_v49, %v101_v56 }
 0x13a   :  { %v113_v57 = vpack.c.bf16 %v110_v54, %v109_v53  ;;  %v102_v58 = vmul.f32 %v359_v44, %v92_v55 }
 0x13c   :  { %393 = vmatprep.mubr.msk.bf16.mxu0 %vm39_vm0, %v113_v57  ;;  %v112_v60 = vadd.f32 %v360_v49, %v102_v58 }
 0x13e   :  { %v114_v61 = vpack.c.bf16 %v112_v60, %v111_v59 }
 0x140   :  { %394 = vmatmul.mubr.msk.bf16.vlgmr.msra.gmra.mxu0 %vm39_vm0, %v114_v61 }
 0x200   :  { %v395_v11 = vpop.f32.mrf.mxu0 }
 0x201   :  { %v187_v12 = vadd.f32 %v395_v11, %v361_v10 }
 0x202   :  { %v178_v13 = vpop.f32.mrf.mxu0 }
 0x203   :  { %v195_v14 = vsub.f32 0.0, %v187_v12  ;;  %v179_v15 = vadd.f32 %v361_v10, %v178_v13 }
 0x204   :  { %v396_v16 = vpop.f32.mrf.mxu0 }
 0x205   :  { %v201_v17 = vmul.f32 1.442695, %v195_v14  ;;  %v193_v18 = vsub.f32 0.0, %v179_v15  ;;  %v190_v19 = vadd.f32 %v396_v16, %v361_v10 }
 0x206   :  { %v181_v20 = vpop.f32.mrf.mxu0 }
 0x207   :  { %v197_v21 = vmul.f32 1.442695, %v193_v18  ;;  %v196_v22 = vsub.f32 0.0, %v190_v19  ;;  %v182_v23 = vadd.f32 %v361_v10, %v181_v20  ;;  %435 = vpow2.f32 %v201_v17 }
 0x209   :  { %437 = vpow2.f32 %v197_v21  ;;  %v203_v24 = vmul.f32 1.442695, %v196_v22  ;;  %v194_v25 = vsub.f32 0.0, %v182_v23 }
 0x20b   :  { %439 = vpow2.f32 %v203_v24  ;;  %v199_v26 = vmul.f32 1.442695, %v194_v25 }
 0x20d   :  { %441 = vpow2.f32 %v199_v26 }
 0x214   :  { %v436_v27 = vpop.eup %435 }
 0x215   :  { %v207_v31 = vadd.f32 1.0, %v436_v27 }
 0x216   :  { %v438_v28 = vpop.eup %437 }
 0x217   :  { %v205_v29 = vadd.f32 1.0, %v438_v28 }
 0x218   :  { %v440_v30 = vpop.eup %439 }
 0x219   :  { %v208_v32 = vadd.f32 1.0, %v440_v30  ;;  %443 = vrcp.f32 %v205_v29 }
 0x21a   :  { %v442_v33 = vpop.eup %441 }
 0x21b   :  { %445 = vrcp.f32 %v208_v32  ;;  %v206_v34 = vadd.f32 1.0, %v442_v33 }
 0x21c   :  { %447 = vrcp.f32 %v207_v31 }
 0x21d   :  { %449 = vrcp.f32 %v206_v34 }
 0x226   :  { %v444_v35 = vpop.eup %443 }
 0x227   :  { %v217_v40 = vmul.f32 %v444_v35, %v179_v15 }
 0x228   :  { %v446_v36 = vpop.eup %445 }
 0x229   :  { %v448_v37 = vpop.eup %447  ;;  %v220_v39 = vmul.f32 %v446_v36, %v190_v19 }
 0x22a   :  { %v450_v38 = vpop.eup %449  ;;  %v219_v42 = vmul.f32 %v448_v37, %v187_v12 }
 0x22b   :  { %v218_v41 = vmul.f32 %v450_v38, %v182_v23 }
 0x22c   :  { %v222_v44 = vpack.c.bf16 %v220_v39, %v219_v42 }
 0x22d   :  { %v221_v43 = vpack.c.bf16 %v218_v41, %v217_v40 }
 0x22f   :  { %413 = vmatprep.mubr.bf16.mxu1 %v221_v43 }
 0x230   :  { %414 = vmatmul.mubr.bf16.vlgmr.msra.gmra.mxu1 %v222_v44 }
 0x2f0   :  { %v415_v46 = vpop.f32.mrf.mxu1 }
 0x2f1   :  { %v337_v47 = vadd.f32 %v415_v46, %v366_v45 }
 0x2f2   :  { %v328_v48 = vpop.f32.mrf.mxu1 }
 0x2f3   :  { %v345_v49 = vmul.f32 0.5, %v337_v47  ;;  %v329_v50 = vadd.f32 %v366_v45, %v328_v48 }
 0x2f4   :  { %v416_v51 = vpop.f32.mrf.mxu1 }
 0x2f5   :  { %v349_v52 = vadd.f32 %v345_v49, %v509_v1  ;;  %v343_v53 = vmul.f32 0.5, %v329_v50  ;;  %v340_v54 = vadd.f32 %v416_v51, %v366_v45 }
 0x2f6   :  { %v331_v55 = vpop.f32.mrf.mxu1 }
 0x2f7   :  { %353 = vst.msk [vmem:[%s610_s9 + $0x10] sm:$0xff] %vm39_vm0, %v349_v52  ;;  %v347_v56 = vadd.f32 %v343_v53, %v504_v0  ;;  %v346_v57 = vmul.f32 0.5, %v340_v54  ;;  %v332_v58 = vadd.f32 %v366_v45, %v331_v55 }
 0x2f9   :  { %351 = vst.msk [vmem:[%s610_s9] sm:$0xff] %vm39_vm0, %v347_v56  ;;  %v350_v59 = vadd.f32 %v346_v57, %v523_v5  ;;  %v344_v1 = vmul.f32 0.5, %v332_v58 }
 0x2fb   :  { %354 = vst.msk [vmem:[%s610_s9 + $0x18] sm:$0xff] %vm39_vm0, %v350_v59  ;;  %v348_v60 = vadd.f32 %v344_v1, %v514_v2 }
 0x2fd   :  { %352 = vst.msk [vmem:[%s610_s9 + $0x8] sm:$0xff] %vm39_vm0, %v348_v60 }

// kernel: cross_conformer_block.10
= control target key start
LH: loop header
LB: loop body
LE: loop exit
PB: predicated region body
PF: predicated region fallthrough
CT: control target
= control target key end

     0   :  { %v361_v0 = vmov 0.0   ;;  %vm362_vm0 = vmmov 0   ;;  %vm61_vm1 = vcmask 261120   ;;  %vm232_vm2 = vcmask 257024   ;;  %s504_s1 = inlined_call_operand.vmem [shape: f32[1,32], index: 1, kind: input, shape index: {}]   ;;  %s505_s2 = inlined_call_operand.vmem [shape: f32[1,32], index: 2, kind: input, shape index: {}]   ;;  %s506_s3 = inlined_call_operand.vmem [shape: bf16[32,32], index: 3, kind: input, shape index: {}]   ;;  %s507_s5 = inlined_call_operand.vmem [shape: bf16[32,32], index: 5, kind: input, shape index: {}]   ;;  %s508_s0 = inlined_call_operand.vmem [shape: f32[48,32], index: 0, kind: input, shape index: {}]   ;;  %s509_s4 = inlined_call_operand.vmem [shape: f32[1,32], index: 4, kind: input, shape index: {}]   ;;  %s510_s6 = inlined_call_operand.vmem [shape: f32[1,32], index: 6, kind: input, shape index: {}]   ;;  %s511_s7 = inlined_call_operand.vmem [shape: bf16[48,32], index: 7, kind: output, shape index: {0}]   ;;  %s512_s8 = inlined_call_operand.vmem [shape: bf16[48,32], index: 8, kind: output, shape index: {1}]  }
   0x1   :  { %323 = vmatprep.subr.bf16.mxu0 %v361_v0  ;;  %339 = vmatprep.subr.bf16.mxu1 %v361_v0  ;;  %v357_v1 = vld [vmem:[%s506_s3 + $0x8] sm:$0xff]   ;;  %v359_v3 = vld [vmem:[%s506_s3] sm:$0xff]   ;;  %v31_v8 = vld [vmem:[%s508_s0 + $0x10] sm:$0xff] }
   0x2   :  { %v358_v2 = vld [vmem:[%s507_s5 + $0x8] sm:$0xff]   ;;  %327 = vmatprep.mubr.msk.bf16.mxu0 %vm362_vm0, %v361_v0  ;;  %343 = vmatprep.mubr.msk.bf16.mxu1 %vm362_vm0, %v361_v0  ;;  %v360_v4 = vld [vmem:[%s507_s5] sm:$0xff]   ;;  %v32_v9 = vld [vmem:[%s508_s0 + $0x18] sm:$0xff] }
   0x3   :  { %324 = vmatpush3.bf16.msra.mxu0 %v357_v1  ;;  %340 = vmatpush3.bf16.msra.mxu1 %v358_v2  ;;  %v29_v5 = vld [vmem:[%s508_s0] sm:$0xff]  ;;  %v30_v6 = vld [vmem:[%s508_s0 + $0x8] sm:$0xff]  ;;  %v36_v10 = vpack.c.bf16 %v32_v9, %v31_v8 }
   0x4   :  { %325 = vmatprep.subr.bf16.mxu0 %v361_v0  ;;  %341 = vmatprep.subr.bf16.mxu1 %v361_v0  ;;  %v35_v7 = vpack.c.bf16 %v30_v6, %v29_v5  ;;  %v33_v11 = vld [vmem:[%s508_s0 + $0x20] sm:$0xff]  ;;  %v34_v12 = vld [vmem:[%s508_s0 + $0x28] sm:$0xff] }
   0x5   :  { %v37_v13 = vpack.c.bf16 %v34_v12, %v33_v11  ;;  %v277_v14 = vld [vmem:[%s509_s4] ss:$0 sm:$0xff] }
   0x6   :  { %v283_v15 = vld [vmem:[%s510_s6] ss:$0 sm:$0xff] }
   0x7   :  { %326 = vmatpush3.bf16.msra.mxu0 %v359_v3  ;;  %342 = vmatpush3.bf16.msra.mxu1 %v360_v4 }
   0xa   :  { %328 = vmatmul.mubr.msk.bf16.vlgmr.msra.gmra.mxu0 %vm61_vm1, %v35_v7  ;;  %344 = vmatmul.mubr.msk.bf16.vlgmr.msra.gmra.mxu1 %vm61_vm1, %v35_v7 }
   0xb   :  { %331 = vmatprep.mubr.msk.bf16.mxu0 %vm362_vm0, %v361_v0  ;;  %347 = vmatprep.mubr.msk.bf16.mxu1 %vm362_vm0, %v361_v0 }
  0x12   :  { %332 = vmatmul.mubr.msk.bf16.gmra.mxu0 %vm61_vm1, %v36_v10  ;;  %348 = vmatmul.mubr.msk.bf16.gmra.mxu1 %vm61_vm1, %v36_v10 }
  0x13   :  { %335 = vmatprep.mubr.msk.bf16.mxu0 %vm362_vm0, %v361_v0  ;;  %351 = vmatprep.mubr.msk.bf16.mxu1 %vm362_vm0, %v361_v0 }
  0x1a   :  { %336 = vmatmul.mubr.msk.bf16.gmra.mxu0 %vm61_vm1, %v37_v13  ;;  %352 = vmatmul.mubr.msk.bf16.gmra.mxu1 %vm61_vm1, %v37_v13 }
  0xca   :  { %v105_v16 = vpop.f32.mrf.mxu0  ;;  %v185_v18 = vpop.f32.mrf.mxu1 }
  0xcb   :  { %v106_v17 = vadd.f32 %v277_v14, %v105_v16  ;;  %v186_v19 = vadd.f32 %v283_v15, %v185_v18 }
  0xcc   :  { %v329_v20 = vpop.f32.mrf.mxu0  ;;  %v345_v22 = vpop.f32.mrf.mxu1 }
  0xcd   :  { %v301_v21 = vpack.c.bf16 %v106_v17, %v106_v17  ;;  %v307_v23 = vpack.c.bf16 %v186_v19, %v186_v19 }
  0xce   :  { %v108_v24 = vpop.f32.mrf.mxu0  ;;  %v188_v26 = vpop.f32.mrf.mxu1 }
  0xcf   :  { %233 = vst.msk [vmem:[%s511_s7] sm:$0xf] %vm232_vm2, %v301_v21  ;;  %v109_v25 = vadd.f32 %v277_v14, %v108_v24  ;;  %263 = vst.msk [vmem:[%s512_s8] sm:$0xf] %vm232_vm2, %v307_v23  ;;  %v189_v27 = vadd.f32 %v283_v15, %v188_v26 }
  0xd0   :  { %v330_v28 = vpop.f32.mrf.mxu0  ;;  %v346_v30 = vpop.f32.mrf.mxu1 }
  0xd1   :  { %v302_v29 = vpack.c.bf16 %v109_v25, %v109_v25  ;;  %v308_v31 = vpack.c.bf16 %v189_v27, %v189_v27 }
  0xd2   :  { %v113_v32 = vpop.f32.mrf.mxu0  ;;  %v193_v34 = vpop.f32.mrf.mxu1 }
  0xd3   :  { %234 = vst.msk [vmem:[%s511_s7 + $0x4] sm:$0xf] %vm232_vm2, %v302_v29  ;;  %v114_v33 = vadd.f32 %v277_v14, %v113_v32  ;;  %264 = vst.msk [vmem:[%s512_s8 + $0x4] sm:$0xf] %vm232_vm2, %v308_v31  ;;  %v194_v35 = vadd.f32 %v283_v15, %v193_v34 }
  0xd4   :  { %v333_v36 = vpop.f32.mrf.mxu0  ;;  %v349_v38 = vpop.f32.mrf.mxu1 }
  0xd5   :  { %v303_v37 = vpack.c.bf16 %v114_v33, %v114_v33  ;;  %v309_v39 = vpack.c.bf16 %v194_v35, %v194_v35 }
  0xd6   :  { %v116_v40 = vpop.f32.mrf.mxu0  ;;  %v196_v42 = vpop.f32.mrf.mxu1 }
  0xd7   :  { %235 = vst.msk [vmem:[%s511_s7 + $0x8] sm:$0xf] %vm232_vm2, %v303_v37  ;;  %v117_v41 = vadd.f32 %v277_v14, %v116_v40  ;;  %265 = vst.msk [vmem:[%s512_s8 + $0x8] sm:$0xf] %vm232_vm2, %v309_v39  ;;  %v197_v43 = vadd.f32 %v283_v15, %v196_v42 }
  0xd8   :  { %v334_v44 = vpop.f32.mrf.mxu0  ;;  %v350_v46 = vpop.f32.mrf.mxu1 }
  0xd9   :  { %v304_v45 = vpack.c.bf16 %v117_v41, %v117_v41  ;;  %v310_v47 = vpack.c.bf16 %v197_v43, %v197_v43 }
  0xda   :  { %v121_v48 = vpop.f32.mrf.mxu0  ;;  %v201_v50 = vpop.f32.mrf.mxu1 }
  0xdb   :  { %236 = vst.msk [vmem:[%s511_s7 + $0xc] sm:$0xf] %vm232_vm2, %v304_v45  ;;  %v122_v49 = vadd.f32 %v277_v14, %v121_v48  ;;  %266 = vst.msk [vmem:[%s512_s8 + $0xc] sm:$0xf] %vm232_vm2, %v310_v47  ;;  %v202_v51 = vadd.f32 %v283_v15, %v201_v50 }
  0xdc   :  { %v337_v52 = vpop.f32.mrf.mxu0  ;;  %v353_v54 = vpop.f32.mrf.mxu1 }
  0xdd   :  { %v305_v53 = vpack.c.bf16 %v122_v49, %v122_v49  ;;  %v311_v55 = vpack.c.bf16 %v202_v51, %v202_v51 }
  0xde   :  { %v124_v56 = vpop.f32.mrf.mxu0  ;;  %v204_v58 = vpop.f32.mrf.mxu1 }
  0xdf   :  { %237 = vst.msk [vmem:[%s511_s7 + $0x10] sm:$0xf] %vm232_vm2, %v305_v53  ;;  %v125_v57 = vadd.f32 %v277_v14, %v124_v56  ;;  %267 = vst.msk [vmem:[%s512_s8 + $0x10] sm:$0xf] %vm232_vm2, %v311_v55  ;;  %v205_v59 = vadd.f32 %v283_v15, %v204_v58 }
  0xe0   :  { %v338_v60 = vpop.f32.mrf.mxu0  ;;  %v354_v62 = vpop.f32.mrf.mxu1 }
  0xe1   :  { %v306_v61 = vpack.c.bf16 %v125_v57, %v125_v57  ;;  %v312_v63 = vpack.c.bf16 %v205_v59, %v205_v59 }
  0xe3   :  { %238 = vst.msk [vmem:[%s511_s7 + $0x14] sm:$0xf] %vm232_vm2, %v306_v61  ;;  %268 = vst.msk [vmem:[%s512_s8 + $0x14] sm:$0xf] %vm232_vm2, %v312_v63 }

// kernel: cross_conformer_block.8
= control target key start
LH: loop header
LB: loop body
LE: loop exit
PB: predicated region body
PF: predicated region fallthrough
CT: control target
= control target key end

     0   :  { %vm35_vm0 = vcmask 261120   ;;  %vm277_vm1 = vcmask 257024   ;;  %s499_s0 = inlined_call_operand.vmem [shape: f32[32,32], index: 0, kind: input, shape index: {}]   ;;  %s500_s3 = inlined_call_operand.vmem [shape: bf16[32,32], index: 3, kind: input, shape index: {}]   ;;  %s501_s5 = inlined_call_operand.vmem [shape: bf16[32,32], index: 5, kind: input, shape index: {}]   ;;  %s502_s1 = inlined_call_operand.vmem [shape: f32[1,32], index: 1, kind: input, shape index: {}]   ;;  %s503_s2 = inlined_call_operand.vmem [shape: f32[1,32], index: 2, kind: input, shape index: {}]   ;;  %s504_s4 = inlined_call_operand.vmem [shape: f32[1,32], index: 4, kind: input, shape index: {}]   ;;  %s505_s6 = inlined_call_operand.vmem [shape: f32[1,32], index: 6, kind: input, shape index: {}]   ;;  %s506_s7 = inlined_call_operand.vmem [shape: bf16[32,32], index: 7, kind: output, shape index: {0}]   ;;  %s507_s8 = inlined_call_operand.vmem [shape: bf16[32,32], index: 8, kind: output, shape index: {1}]  }
   0x1   :  { %v29_v0 = vld [vmem:[%s499_s0] sm:$0xff]  ;;  %v31_v1 = vld [vmem:[%s499_s0 + $0x10] sm:$0xff]  ;;  %v30_v2 = vld [vmem:[%s499_s0 + $0x8] sm:$0xff] }
   0x2   :  { %v36_v3 = vsel %vm35_vm0, %v29_v0, 0.0  ;;  %v42_v4 = vsel %vm35_vm0, %v31_v1, 0.0  ;;  %v32_v5 = vld [vmem:[%s499_s0 + $0x18] sm:$0xff]  ;;  %v39_v6 = vsel %vm35_vm0, %v30_v2, 0.0  ;;  %v362_v28 = vld [vmem:[%s500_s3 + $0x8] sm:$0xff]   ;;  %v364_v30 = vld [vmem:[%s500_s3] sm:$0xff]  }
   0x3   :  { %37 = vadd.xlane.f32.xlu0 %v36_v3  ;;  %43 = vadd.xlane.f32.xlu1 %v42_v4  ;;  %v45_v7 = vsel %vm35_vm0, %v32_v5, 0.0  ;;  %v363_v29 = vld [vmem:[%s501_s5 + $0x8] sm:$0xff]   ;;  %v365_v31 = vld [vmem:[%s501_s5] sm:$0xff]  }
   0x4   :  { %346 = vmatprep.subr.bf16.mxu0 %v362_v28  ;;  %354 = vmatprep.subr.bf16.mxu1 %v363_v29  ;;  %v310_v46 = vld [vmem:[%s502_s1] ss:$0 sm:$0xff] }
   0x5   :  { %347 = vmatpush3.bf16.msra.mxu0 %v362_v28  ;;  %355 = vmatpush3.bf16.msra.mxu1 %v363_v29  ;;  %v311_v51 = vld [vmem:[%s503_s2] ss:$0 sm:$0xff] }
   0x6   :  { %348 = vmatprep.subr.bf16.mxu0 %v364_v30  ;;  %356 = vmatprep.subr.bf16.mxu1 %v365_v31 }
   0x7   :  { %40 = vadd.xlane.f32.xlu0 %v39_v6  ;;  %46 = vadd.xlane.f32.xlu1 %v45_v7 }
   0x9   :  { %349 = vmatpush3.bf16.msra.mxu0 %v364_v30  ;;  %357 = vmatpush3.bf16.msra.mxu1 %v365_v31 }
  0x8c   :  { %v38_v8 = vpop.xlane.xlu0 %37  ;;  %v44_v9 = vpop.xlane.xlu1 %43 }
  0x8d   :  { %v49_v10 = vmul.f32 0.03125, %v38_v8  ;;  %v51_v11 = vmul.f32 0.03125, %v44_v9 }
  0x8f   :  { %v53_v12 = vsub.f32 %v29_v0, %v49_v10  ;;  %v55_v13 = vsub.f32 %v31_v1, %v51_v11  ;;  %v312_v0 = vld [vmem:[%s504_s4] ss:$0 sm:$0xff] }
  0x90   :  { %v41_v14 = vpop.xlane.xlu0 %40  ;;  %v47_v15 = vpop.xlane.xlu1 %46  ;;  %v317_v1 = vld [vmem:[%s505_s6] ss:$0 sm:$0xff] }
  0x91   :  { %v50_v16 = vmul.f32 0.03125, %v41_v14  ;;  %v52_v17 = vmul.f32 0.03125, %v47_v15  ;;  %v57_v18 = vmul.f32 %v53_v12, %v53_v12  ;;  %v59_v19 = vmul.f32 %v55_v13, %v55_v13 }
  0x93   :  { %v54_v20 = vsub.f32 %v30_v2, %v50_v16  ;;  %v56_v21 = vsub.f32 %v32_v5, %v52_v17  ;;  %v61_v22 = vsel %vm35_vm0, %v57_v18, 0.0  ;;  %v67_v23 = vsel %vm35_vm0, %v59_v19, 0.0 }
  0x94   :  { %62 = vadd.xlane.f32.xlu0 %v61_v22 }
  0x95   :  { %v58_v24 = vmul.f32 %v54_v20, %v54_v20  ;;  %v60_v25 = vmul.f32 %v56_v21, %v56_v21 }
  0x97   :  { %v64_v26 = vsel %vm35_vm0, %v58_v24, 0.0  ;;  %v70_v27 = vsel %vm35_vm0, %v60_v25, 0.0 }
  0x98   :  { %68 = vadd.xlane.f32.xlu0 %v67_v23  ;;  %65 = vadd.xlane.f32.xlu1 %v64_v26 }
  0x9c   :  { %71 = vadd.xlane.f32.xlu1 %v70_v27 }
 0x11d   :  { %v63_v32 = vpop.xlane.xlu0 %62 }
 0x11e   :  { %v73_v33 = vmul.f32 0.03125, %v63_v32 }
 0x120   :  { %v77_v34 = vadd.f32 1e-05, %v73_v33 }
 0x121   :  { %v66_v35 = vpop.xlane.xlu1 %65  ;;  %v69_v36 = vpop.xlane.xlu0 %68 }
 0x122   :  { %366 = vrsqrt.f32 %v77_v34  ;;  %v74_v37 = vmul.f32 0.03125, %v66_v35  ;;  %v75_v38 = vmul.f32 0.03125, %v69_v36 }
 0x124   :  { %v78_v39 = vadd.f32 1e-05, %v74_v37  ;;  %v79_v40 = vadd.f32 1e-05, %v75_v38 }
 0x125   :  { %v72_v41 = vpop.xlane.xlu1 %71 }
 0x126   :  { %368 = vrsqrt.f32 %v78_v39  ;;  %v76_v42 = vmul.f32 0.03125, %v72_v41 }
 0x127   :  { %370 = vrsqrt.f32 %v79_v40 }
 0x128   :  { %v80_v43 = vadd.f32 1e-05, %v76_v42 }
 0x12a   :  { %372 = vrsqrt.f32 %v80_v43 }
 0x12f   :  { %v367_v44 = vpop.eup %366 }
 0x130   :  { %v85_v45 = vmul.f32 %v367_v44, %v53_v12 }
 0x132   :  { %v95_v50 = vmul.f32 %v310_v46, %v85_v45 }
 0x133   :  { %v369_v47 = vpop.eup %368 }
 0x134   :  { %v371_v48 = vpop.eup %370  ;;  %v86_v49 = vmul.f32 %v369_v47, %v54_v20  ;;  %v105_v55 = vadd.f32 %v311_v51, %v95_v50 }
 0x135   :  { %v87_v52 = vmul.f32 %v371_v48, %v55_v13 }
 0x136   :  { %v96_v53 = vmul.f32 %v310_v46, %v86_v49 }
 0x137   :  { %v373_v54 = vpop.eup %372  ;;  %v97_v58 = vmul.f32 %v310_v46, %v87_v52 }
 0x138   :  { %v106_v56 = vadd.f32 %v311_v51, %v96_v53  ;;  %v88_v57 = vmul.f32 %v373_v54, %v56_v21 }
 0x139   :  { %v107_v61 = vadd.f32 %v311_v51, %v97_v58 }
 0x13a   :  { %v109_v59 = vpack.c.bf16 %v106_v56, %v105_v55  ;;  %v98_v60 = vmul.f32 %v310_v46, %v88_v57 }
 0x13c   :  { %350 = vmatprep.mubr.msk.bf16.mxu0 %vm35_vm0, %v109_v59  ;;  %358 = vmatprep.mubr.msk.bf16.mxu1 %vm35_vm0, %v109_v59  ;;  %v108_v62 = vadd.f32 %v311_v51, %v98_v60 }
 0x13e   :  { %v110_v63 = vpack.c.bf16 %v108_v62, %v107_v61 }
 0x140   :  { %351 = vmatmul.mubr.msk.bf16.vlgmr.msra.gmra.mxu0 %vm35_vm0, %v110_v63  ;;  %359 = vmatmul.mubr.msk.bf16.vlgmr.msra.gmra.mxu1 %vm35_vm0, %v110_v63 }
 0x200   :  { %v352_v2 = vpop.f32.mrf.mxu0  ;;  %v360_v3 = vpop.f32.mrf.mxu1 }
 0x201   :  { %v183_v4 = vadd.f32 %v352_v2, %v312_v0  ;;  %v255_v5 = vadd.f32 %v360_v3, %v317_v1 }
 0x202   :  { %v174_v6 = vpop.f32.mrf.mxu0  ;;  %v246_v7 = vpop.f32.mrf.mxu1 }
 0x203   :  { %v332_v8 = vpack.c.bf16 %v183_v4, %v183_v4  ;;  %v336_v9 = vpack.c.bf16 %v255_v5, %v255_v5  ;;  %v175_v10 = vadd.f32 %v312_v0, %v174_v6  ;;  %v247_v11 = vadd.f32 %v317_v1, %v246_v7 }
 0x204   :  { %v353_v12 = vpop.f32.mrf.mxu0  ;;  %v361_v13 = vpop.f32.mrf.mxu1 }
 0x205   :  { %280 = vst.msk [vmem:[%s506_s7 + $0x8] sm:$0xf] %vm277_vm1, %v332_v8  ;;  %300 = vst.msk [vmem:[%s507_s8 + $0x8] sm:$0xf] %vm277_vm1, %v336_v9  ;;  %v330_v14 = vpack.c.bf16 %v175_v10, %v175_v10  ;;  %v334_v15 = vpack.c.bf16 %v247_v11, %v247_v11  ;;  %v186_v16 = vadd.f32 %v353_v12, %v312_v0 }
 0x206   :  { %v258_v17 = vadd.f32 %v361_v13, %v317_v1  ;;  %v177_v18 = vpop.f32.mrf.mxu0  ;;  %v249_v19 = vpop.f32.mrf.mxu1 }
 0x207   :  { %278 = vst.msk [vmem:[%s506_s7] sm:$0xf] %vm277_vm1, %v330_v14  ;;  %298 = vst.msk [vmem:[%s507_s8] sm:$0xf] %vm277_vm1, %v334_v15  ;;  %v333_v20 = vpack.c.bf16 %v186_v16, %v186_v16  ;;  %v178_v22 = vadd.f32 %v312_v0, %v177_v18  ;;  %v250_v23 = vadd.f32 %v317_v1, %v249_v19 }
 0x208   :  { %v337_v21 = vpack.c.bf16 %v258_v17, %v258_v17 }
 0x209   :  { %281 = vst.msk [vmem:[%s506_s7 + $0xc] sm:$0xf] %vm277_vm1, %v333_v20  ;;  %v331_v24 = vpack.c.bf16 %v178_v22, %v178_v22  ;;  %v335_v25 = vpack.c.bf16 %v250_v23, %v250_v23 }
 0x20a   :  { %301 = vst.msk [vmem:[%s507_s8 + $0xc] sm:$0xf] %vm277_vm1, %v337_v21 }
 0x20b   :  { %279 = vst.msk [vmem:[%s506_s7 + $0x4] sm:$0xf] %vm277_vm1, %v331_v24  ;;  %299 = vst.msk [vmem:[%s507_s8 + $0x4] sm:$0xf] %vm277_vm1, %v335_v25 }

// kernel: cross_conformer_block.9
= control target key start
LH: loop header
LB: loop body
LE: loop exit
PB: predicated region body
PF: predicated region fallthrough
CT: control target
= control target key end

     0   :  { %16 = vsyncpa [#allocation3], 0  ;;  %s2233_s0 = inlined_call_operand.vmem [shape: f32[2,16,32], index: 0, kind: input, shape index: {}]   ;;  %s2234_s1 = inlined_call_operand.vmem [shape: bf16[2,16,32], index: 1, kind: input, shape index: {}]   ;;  %s2235_s2 = inlined_call_operand.vmem [shape: bf16[2,16,32], index: 2, kind: input, shape index: {}]   ;;  %s2236_s3 = inlined_call_operand.vmem [shape: f32[1,32], index: 3, kind: input, shape index: {}]   ;;  %s2237_s4 = inlined_call_operand.vmem [shape: f32[1,32], index: 4, kind: input, shape index: {}]   ;;  %s2238_s5 = inlined_call_operand.vmem [shape: bf16[32,32], index: 5, kind: input, shape index: {}]   ;;  %s2239_s6 = inlined_call_operand.vmem [shape: f32[1,32], index: 6, kind: input, shape index: {}]   ;;  %s2240_s7 = inlined_call_operand.vmem [shape: bf16[32,32], index: 7, kind: input, shape index: {}]   ;;  %s2241_s8 = inlined_call_operand.vmem [shape: f32[1,32], index: 8, kind: input, shape index: {}]   ;;  %s2242_s9 = inlined_call_operand.vmem [shape: f32[2,16,32], index: 9, kind: output, shape index: {0}]   ;;  %s2243_s10 = inlined_call_operand.hbm [shape: bf16[2,4,16,16], index: 10, kind: output, shape index: {1}]  }
   0x1   :  { %18 = vsyncpa [#allocation3 + $0x1], 0  ;;  %s1908_s13 = smov 0   ;;  %s1910_s14 = smov 0  }
   0x2   :  { %s1912_s15 = smov 0   ;;  %s1914_s16 = smov 0  }
   0x3   :  { %s1916_s17 = smov 0   ;;  %s1918_s18 = smov 0  }
   0x4 LB: > { %2247 = sst [smem:[#allocation5_spill]] %s1839_s17  ;;  %s1491_s19 = sadd.s32 4294967295, %s1843_s18   ;;  %s1843_s18 = sphi %s1918_s18, %s24_s18   ;;  %s1839_s17 = sphi %s1916_s17, %s2253_s17   ;;  %s1835_s16 = sphi %s1914_s16, %s2252_s16   ;;  %s1831_s15 = sphi %s1912_s15, %s2256_s15   ;;  %s1827_s14 = sphi %s1910_s14, %s2255_s14   ;;  %s1823_s13 = sphi %s1908_s13, %s2254_s13  }
   0x5   : > { %s1492_s20 = sadd.s32 4294967294, %s1843_s18   ;;  %s36_s21 = sadd.s32 1, %s1839_s17 }
   0x6   : > { %s279_s22 = sadd.s32 1, %s1831_s15  ;;  %p38_p0 = scmp.ge.s32.totalorder %s36_s21, 2 }
   0x7   : > { %p289_p1 = scmp.ne.s32.totalorder %s1831_s15, %s1827_s14  ;;  %p290_p2 = scmp.eq.s32.totalorder %s1491_s19, 1 }
   0x8   : > { %p295_p3 = scmp.ne.s32.totalorder %s1827_s14, %s1823_s13  ;;  %s2258_s21 = smov (%p38_p0, %s36_s21), 0 }
   0x9   : > { %2248 = sst [smem:[#allocation6_spill]] %s2258_s21  ;;  %p1948_p4 = por %p290_p2, %p289_p1 }
   0xa   : > { %p296_p5 = scmp.eq.s32.totalorder %s1492_s20, 1  ;;  %s274_s24 = ssub.s32 %s1839_s17, %s2258_s21 }
   0xb   : > { %p1495_p6 = scmp.ge.s32.totalorder %s1843_s18, 1  ;;  %p277_p7 = scmp.eq.s32.totalorder %s274_s24, 0 }
   0xc   : > { %p1955_p8 = por %p296_p5, %p295_p3  ;;  %p361_p9 = scmp.lt.s32.totalorder %s1843_s18, 3 }
   0xd   : > { %s1961_s26 = scalar_select %p277_p7, %s1831_s15, %s279_s22  }
   0xe   : > { %p362_p10 = pnand %p1495_p6, %p361_p9 }
   0xf   : > { %p423_p11 = scmp.lt.s32.totalorder (!%p362_p10), %s1835_s16, 1  ;;  %s1847_s21 = smov (!%p362_p10), 120  }
  0x10   : > { %365 = sbr.rel (%p362_p10) target bundleno = 2809 (0xaf9), region = 56  ;;  %s1557_s20 = sshll.u32 (!%p362_p10), %s1835_s16, 9 }
  0x11   : > { %s2169_s30 = scalar_lea.hbm (!%p362_p10), %s2243_s10, %s1557_s20 }
  0x15   : > { %s1965_s27 = scalar_select %p423_p11, %s1835_s16, 1  ;;  %vm458_vm0 = vcmask 261120   ;;  %v1727_v14 = vld [vmem:[%s2238_s5 + $0x8] sm:$0xff]   ;;  %v1845_v15 = vmov 0.0   ;;  %vm1846_vm1 = vmmov 0   ;;  %v1728_v16 = vld [vmem:[%s2238_s5] sm:$0xff]  }
  0x16   : > { %1585 = vmatprep.subr.bf16.mxu0 %v1845_v15  ;;  %1589 = vmatprep.mubr.msk.bf16.mxu0 %vm1846_vm1, %v1845_v15  ;;  %v1505_v25 = vld [vmem:[%s2236_s3] ss:$0 sm:$0xff]  ;;  %vm582_vm2 = vcmask 64512   ;;  %vm630_vm3 = vcmask 130048   ;;  %vm661_vm4 = vcmask 125952   ;;  %vm853_vm5 = vcmask 1043456  }
  0x17   : > { %s2246_s28 = sshll.u32 %s1965_s27, 4  ;;  %s1546_s29 = sshll.u32 %s1965_s27, 3  ;;  %1586 = vmatpush3.bf16.msra.mxu0 %v1727_v14  ;;  %1593 = vmatprep.subr.bf16.mxu1 %v1845_v15  ;;  %v1506_v29 = vld [vmem:[%s2237_s4] ss:$0 sm:$0xff] }
  0x18   : > { %s430_s12 = scalar_lea.vmem %s2233_s0, %s2246_s28  ;;  %s1977_s22 = scalar_lea.vmem %s2234_s1, %s1546_s29  ;;  %1587 = vmatprep.subr.bf16.mxu0 %v1845_v15  ;;  %1595 = vmatprep.mubr.msk.bf16.mxu1 %vm1846_vm1, %v1845_v15  ;;  %v1507_v36 = vld [vmem:[%s2239_s6] ss:$0 sm:$0xff] }
  0x19   : > { %s1982_s17 = scalar_lea.vmem %s2235_s2, %s1546_s29  ;;  %v1984_v0 = vld [vmem:[%s430_s12] sm:$0xff]  ;;  %v1986_v1 = vld [vmem:[%s430_s12 + $0x8] sm:$0xff]  ;;  %s1849_s29 = smov 104  }
  0x1a   : > { %v459_v2 = vsel %vm458_vm0, %v1984_v0, 0.0  ;;  %v462_v3 = vsel %vm458_vm0, %v1986_v1, 0.0  ;;  %v2020_v34 = vld [vmem:[%s1977_s22] sm:$0xff]   ;;  %s419_s22 = sand.u32 1, %s1827_s14   ;;  %s1850_s16 = smov [#allocation2]  }
  0x1b   : > { %460 = vadd.xlane.f32.xlu0 %v459_v2  ;;  %1588 = vmatpush3.bf16.msra.mxu0 %v1728_v16  ;;  %v587_v35 = vsel %vm582_vm2, %v2020_v34, 0  ;;  %s1496_s11 = sshll.u32 %s419_s22, 5 }
  0x1c   : > { %1599 = vmatprep.subr.bf16.mxu0 %v1845_v15  ;;  %1594 = vmatpush3.bf16.xpose.msra.mxu1 %v587_v35  ;;  %s2065_s12 = scalar_lea.vmem [#allocation2], %s1496_s11 }
  0x1d   : > { %1605 = vmatprep.subr.bf16.mxu1 %v1845_v15  ;;  %s1351_s24 = sshll.u32 %s2065_s12, 4  ;;  %s2171_s24 = int_to_ptr.vmem [resolvable:$true] %s1351_s24 }
  0x1e   : > { %s1767_s11 = scalar_lea.vmem %s2171_s24, 512 }
  0x1f   : > { %463 = vadd.xlane.f32.xlu0 %v462_v3  ;;  %p1768_p12 = scmp.ne.s32.totalorder %s2171_s24, %s1767_s11 }
  0x21   : > { %p1769_p13 = pnand %p1768_p12, %p1948_p4 }
  0x23   : > { %p1770_p0 = pneg %p1769_p13 }
  0x35   : > { %719 = vrot.lane.b32.xlu0 %v2020_v34, %s1847_s21 }
  0xa4   : > { %v461_v4 = vpop.xlane.xlu0 %460 }
  0xa5   : > { %v466_v5 = vmul.f32 0.03125, %v461_v4 }
  0xa7   : > { %v468_v6 = vsub.f32 %v1984_v0, %v466_v5 }
  0xa8   : > { %v464_v7 = vpop.xlane.xlu0 %463 }
  0xa9   : > { %v467_v8 = vmul.f32 0.03125, %v464_v7  ;;  %v470_v9 = vmul.f32 %v468_v6, %v468_v6 }
  0xab   : > { %v469_v10 = vsub.f32 %v1986_v1, %v467_v8  ;;  %v472_v11 = vsel %vm458_vm0, %v470_v9, 0.0  ;;  %v2050_v9 = vld [vmem:[%s1982_s17] sm:$0xff]   ;;  %s1848_s17 = smov 112  }
  0xac   : > { %473 = vadd.xlane.f32.xlu1 %v472_v11  ;;  %v720_v43 = vpop.permute.xlu0 %719 }
  0xad   : > { %v471_v12 = vmul.f32 %v469_v10, %v469_v10  ;;  %v725_v47 = vsel %vm582_vm2, %v720_v43, 0 }
  0xaf   : > { %v475_v13 = vsel %vm458_vm0, %v471_v12, 0.0 }
  0xb0   : > { %476 = vadd.xlane.f32.xlu1 %v475_v13 }
 0x135   : > { %v474_v17 = vpop.xlane.xlu1 %473 }
 0x136   : > { %v478_v18 = vmul.f32 0.03125, %v474_v17 }
 0x138   : > { %v480_v19 = vadd.f32 1e-05, %v478_v18 }
 0x139   : > { %v477_v20 = vpop.xlane.xlu1 %476 }
 0x13a   : > { %1731 = vrsqrt.f32 %v480_v19  ;;  %v479_v21 = vmul.f32 0.03125, %v477_v20 }
 0x13c   : > { %v481_v22 = vadd.f32 1e-05, %v479_v21 }
 0x13e   : > { %1733 = vrsqrt.f32 %v481_v22 }
 0x147   : > { %v1732_v23 = vpop.eup %1731 }
 0x148   : > { %v484_v24 = vmul.f32 %v1732_v23, %v468_v6 }
 0x14a   : > { %v492_v28 = vmul.f32 %v1505_v25, %v484_v24 }
 0x14b   : > { %v1734_v26 = vpop.eup %1733 }
 0x14c   : > { %v485_v27 = vmul.f32 %v1734_v26, %v469_v10  ;;  %v500_v31 = vadd.f32 %v1506_v29, %v492_v28 }
 0x14e   : > { %v493_v30 = vmul.f32 %v1505_v25, %v485_v27 }
 0x150   : > { %v501_v32 = vadd.f32 %v1506_v29, %v493_v30  ;;  %v849_v30 = vld [vmem:[%s2240_s7 + $0x4] sm:$0xf] }
 0x152   : > { %v502_v33 = vpack.c.bf16 %v501_v32, %v500_v31  ;;  %v855_v31 = vsel %vm853_vm5, %v849_v30, 0 }
 0x154   : > { %1590 = vmatmul.mubr.msk.bf16.vlgmr.msra.gmra.mxu0 %vm458_vm0, %v502_v33 }
 0x155   : > { %1601 = vmatprep.mubr.msk.bf16.mxu0 %vm1846_vm1, %v1845_v15  ;;  %1600 = vmatpush3.bf16.msra.mxu0 %v2050_v9 }
 0x156   : > { %1611 = vmatprep.subr.bf16.mxu0 %v1845_v15 }
 0x214   : > { %v563_v37 = vpop.f32.mrf.mxu0 }
 0x215   : > { %v564_v39 = vadd.f32 %v1507_v36, %v563_v37 }
 0x216   : > { %v1591_v38 = vpop.f32.mrf.mxu0 }
 0x217   : > { %v574_v44 = vmul.f32 0.35355338, %v564_v39 }
 0x218   : > { %v566_v40 = vpop.f32.mrf.mxu0 }
 0x219   : > { %v567_v41 = vadd.f32 %v1507_v36, %v566_v40  ;;  %v715_v40 = vld [vmem:[%s2240_s7] sm:$0xf] }
 0x21a   : > { %v1592_v42 = vpop.f32.mrf.mxu0 }
 0x21b   : > { %v575_v45 = vmul.f32 0.35355338, %v567_v41 }
 0x21d   : > { %v2030_v46 = vpack.c.bf16 %v575_v45, %v574_v44  ;;  %v902_v44 = vsel %vm853_vm5, %v715_v40, 0 }
 0x21f   : > { %717 = vrot.lane.b32.xlu1 %v2030_v46, %s1847_s21  ;;  %1596 = vmatmul.mubr.msk.bf16.vlgmr.msra.gmra.mxu1 %vm582_vm2, %v2030_v46 }
 0x220   : > { %1606 = vmatpush3.bf16.xpose.msra.mxu1 %v725_v47  ;;  %1607 = vmatprep.mubr.msk.bf16.mxu1 %vm1846_vm1, %v1845_v15 }
 0x221   : > { %1617 = vmatprep.subr.bf16.mxu1 %v1845_v15 }
 0x291   : > { %v718_v48 = vpop.permute.xlu1 %717 }
 0x292   : > { %1608 = vmatmul.mubr.msk.bf16.vlgmr.msra.gmra.mxu1 %vm582_vm2, %v718_v48 }
 0x293   : > { %1619 = vmatprep.mubr.msk.bf16.mxu1 %vm1846_vm1, %v1845_v15  ;;  %1618 = vmatpush3.bf16.msra.mxu1 %v855_v31 }
 0x294   : > { %1629 = vmatprep.subr.bf16.mxu1 %v1845_v15 }
 0x2df   : > { %v623_v49 = vpop.f32.mrf.mxu1 }
 0x2e0   : > { %v631_v50 = vsel %vm630_vm3, %v623_v49, -inf }
 0x2e1   : > { %632 = vmax.xlane.f32.xlu1 %v631_v50  ;;  %v1597_v51 = vpop.f32.mrf.mxu1 }
 0x2e3   : > { %v626_v52 = vpop.f32.mrf.mxu1 }
 0x2e4   : > { %v634_v53 = vsel %vm630_vm3, %v626_v52, -inf }
 0x2e5   : > { %635 = vmax.xlane.f32.xlu0 %v634_v53  ;;  %v1598_v54 = vpop.f32.mrf.mxu1 }
 0x352   : > { %v761_v55 = vpop.f32.mrf.mxu1 }
 0x353   : > { %v768_v56 = vsel %vm630_vm3, %v761_v55, -inf }
 0x354   : > { %769 = vmax.xlane.f32.xlu0 %v768_v56  ;;  %v1609_v57 = vpop.f32.mrf.mxu1 }
 0x356   : > { %v764_v58 = vpop.f32.mrf.mxu1 }
 0x357   : > { %v771_v59 = vsel %vm630_vm3, %v764_v58, -inf }
 0x358   : > { %772 = vmax.xlane.f32.xlu1 %v771_v59  ;;  %v1610_v60 = vpop.f32.mrf.mxu1 }
 0x36a   : > { %v633_v61 = vpop.xlane.xlu1 %632 }
 0x36b   : > { %v637_v62 = vsub.f32 %v623_v49, %v633_v61 }
 0x36d   : > { %v639_v63 = vmul.f32 1.442695, %v637_v62 }
 0x36e   : > { %v636_v2 = vpop.xlane.xlu0 %635 }
 0x36f   : > { %1735 = vpow2.f32 %v639_v63  ;;  %v638_v3 = vsub.f32 %v626_v52, %v636_v2 }
 0x371   : > { %v641_v4 = vmul.f32 1.442695, %v638_v3 }
 0x373   : > { %1737 = vpow2.f32 %v641_v4 }
 0x37c   : > { %v1736_v5 = vpop.eup %1735 }
 0x37d   : > { %v643_v6 = vsel %vm630_vm3, %v1736_v5, 0.0 }
 0x37e   : > { %644 = vadd.xlane.f32.xlu0 %v643_v6 }
 0x380   : > { %v1738_v7 = vpop.eup %1737 }
 0x381   : > { %v646_v8 = vsel %vm630_vm3, %v1738_v7, 0.0 }
 0x382   : > { %647 = vadd.xlane.f32.xlu1 %v646_v8 }
 0x3dd   : > { %v770_v10 = vpop.xlane.xlu0 %769 }
 0x3de   : > { %v774_v11 = vsub.f32 %v761_v55, %v770_v10 }
 0x3e0   : > { %v776_v12 = vmul.f32 1.442695, %v774_v11 }
 0x3e1   : > { %v773_v13 = vpop.xlane.xlu1 %772 }
 0x3e2   : > { %1739 = vpow2.f32 %v776_v12  ;;  %v775_v14 = vsub.f32 %v764_v58, %v773_v13 }
 0x3e4   : > { %v778_v16 = vmul.f32 1.442695, %v775_v14 }
 0x3e6   : > { %1741 = vpow2.f32 %v778_v16 }
 0x3ef   : > { %v1740_v17 = vpop.eup %1739 }
 0x3f0   : > { %v780_v18 = vsel %vm630_vm3, %v1740_v17, 0.0 }
 0x3f1   : > { %781 = vadd.xlane.f32.xlu0 %v780_v18 }
 0x3f3   : > { %v1742_v19 = vpop.eup %1741 }
 0x3f4   : > { %v783_v20 = vsel %vm630_vm3, %v1742_v19, 0.0 }
 0x3f5   : > { %784 = vadd.xlane.f32.xlu1 %v783_v20 }
 0x406   : > { %947 = vrot.lane.b32.xlu1 %v2020_v34, %s1848_s17 }
 0x407   : > { %v645_v21 = vpop.xlane.xlu0 %644  ;;  %801 = vrot.lane.b32.xlu0 %v2050_v9, %s1847_s21 }
 0x408   : > { %1743 = vrcp.f32 %v645_v21 }
 0x40a   : > { %945 = vrot.lane.b32.xlu1 %v2030_v46, %s1848_s17 }
 0x40b   : > { %v648_v22 = vpop.xlane.xlu1 %647 }
 0x40c   : > { %1745 = vrcp.f32 %v648_v22 }
 0x415   : > { %v1744_v23 = vpop.eup %1743 }
 0x416   : > { %v651_v24 = vmul.f32 %v1744_v23, %v1736_v5 }
 0x418   : > { %v1549_v25 = vpack.c.bf16 %v651_v24, %v651_v24 }
 0x419   : > { %v1746_v26 = vpop.eup %1745 }
 0x41a   : > { %v652_v27 = vmul.f32 %v1746_v26, %v1738_v7  ;;  %662 = vst.msk [vmem:[%s2065_s12] sm:$0xf] %vm661_vm4, %v1549_v25 }
 0x41c   : > { %v653_v28 = vpack.c.bf16 %v652_v27, %v651_v24  ;;  %v1550_v29 = vpack.c.bf16 %v652_v27, %v652_v27 }
 0x41e   : > { %663 = vst.msk [vmem:[%s2065_s12 + $0x4] sm:$0xf] %vm661_vm4, %v1550_v29  ;;  %1602 = vmatmul.mubr.msk.bf16.vlgmr.msra.gmra.mxu0 %vm630_vm3, %v653_v28 }
 0x41f   : > { %1613 = vmatprep.mubr.msk.bf16.mxu0 %vm1846_vm1, %v1845_v15 }
 0x47a   : > { %v782_v32 = vpop.xlane.xlu0 %781 }
 0x47b   : > { %1747 = vrcp.f32 %v782_v32 }
 0x47e   : > { %v785_v33 = vpop.xlane.xlu1 %784  ;;  %v802_v35 = vpop.permute.xlu0 %801 }
 0x47f   : > { %1749 = vrcp.f32 %v785_v33  ;;  %1612 = vmatpush3.bf16.msra.mxu0 %v802_v35  ;;  %v1077_v35 = vld [vmem:[%s2240_s7 + $0x8] sm:$0xf] }
 0x480   : > { %1623 = vmatprep.subr.bf16.mxu0 %v1845_v15 }
 0x482   : > { %v948_v53 = vpop.permute.xlu1 %947 }
 0x483   : > { %v953_v55 = vsel %vm582_vm2, %v948_v53, 0 }
 0x486   : > { %v946_v58 = vpop.permute.xlu1 %945 }
 0x488   : > { %v1748_v36 = vpop.eup %1747 }
 0x489   : > { %v788_v37 = vmul.f32 %v1748_v36, %v1740_v17  ;;  %v1082_v36 = vsel %vm853_vm5, %v1077_v35, 0 }
 0x48b   : > { %v1551_v38 = vpack.c.bf16 %v788_v37, %v788_v37 }
 0x48c   : > { %v1750_v39 = vpop.eup %1749 }
 0x48d   : > { %v789_v41 = vmul.f32 %v1750_v39, %v1742_v19  ;;  %1520 = vst.msk [vmem:[%s2065_s12 + $0x8] sm:$0xf] %vm661_vm4, %v1551_v38 }
 0x48f   : > { %v790_v42 = vpack.c.bf16 %v789_v41, %v788_v37  ;;  %v1552_v43 = vpack.c.bf16 %v789_v41, %v789_v41 }
 0x491   : > { %1521 = vst.msk [vmem:[%s2065_s12 + $0xc] sm:$0xf] %vm661_vm4, %v1552_v43  ;;  %1614 = vmatmul.mubr.msk.bf16.vlgmr.msra.gmra.mxu0 %vm630_vm3, %v790_v42 }
 0x492   : > { %1624 = vmatpush3.bf16.msra.mxu0 %v902_v44  ;;  %1625 = vmatprep.mubr.msk.bf16.mxu0 %vm1846_vm1, %v1845_v15 }
 0x493   : > { %1635 = vmatprep.subr.bf16.mxu0 %v1845_v15 }
 0x4de   : > { %v707_v45 = vpop.f32.mrf.mxu0 }
 0x4e0   : > { %v1603_v47 = vpop.f32.mrf.mxu0 }
 0x4e2   : > { %v710_v48 = vpop.f32.mrf.mxu0 }
 0x4e3   : > { %v714_v49 = vpack.c.bf16 %v710_v48, %v707_v45 }
 0x4e4   : > { %v1604_v50 = vpop.f32.mrf.mxu0 }
 0x4e5   : > { %1626 = vmatmul.mubr.msk.bf16.vlgmr.msra.gmra.mxu0 %vm582_vm2, %v714_v49 }
 0x4e6   : > { %1637 = vmatprep.mubr.msk.bf16.mxu0 %vm1846_vm1, %v1845_v15 }
 0x551   : > { %v841_v51 = vpop.f32.mrf.mxu0 }
 0x553   : > { %v1615_v52 = vpop.f32.mrf.mxu0 }
 0x555   : > { %v844_v54 = vpop.f32.mrf.mxu0 }
 0x556   : > { %v848_v56 = vpack.c.bf16 %v844_v54, %v841_v51 }
 0x557   : > { %v1616_v57 = vpop.f32.mrf.mxu0 }
 0x558   : > { %1620 = vmatmul.mubr.msk.bf16.vlgmr.msra.gmra.mxu1 %vm582_vm2, %v848_v56 }
 0x559   : > { %1630 = vmatpush3.bf16.xpose.msra.mxu1 %v953_v55  ;;  %1631 = vmatprep.mubr.msk.bf16.mxu1 %vm1846_vm1, %v1845_v15 }
 0x55a   : > { %1641 = vmatprep.subr.bf16.mxu1 %v1845_v15 }
 0x560   : > { %1632 = vmatmul.mubr.msk.bf16.vlgmr.msra.gmra.mxu1 %vm582_vm2, %v946_v58 }
 0x561   : > { %1643 = vmatprep.mubr.msk.bf16.mxu1 %vm1846_vm1, %v1845_v15  ;;  %1642 = vmatpush3.bf16.msra.mxu1 %v1082_v36 }
 0x562   : > { %1653 = vmatprep.subr.bf16.mxu1 %v1845_v15 }
 0x5a5   : > { %v2103_v59 = vpop.f32.mrf.mxu0 }
 0x5a7   : > { %v1627_v60 = vpop.f32.mrf.mxu0 }
 0x5a9   : > { %v2105_v61 = vpop.f32.mrf.mxu0 }
 0x5ab   : > { %v1628_v62 = vpop.f32.mrf.mxu0 }
 0x5ac   : > { %v1259_v62 = vld [vmem:[%s2240_s7 + $0xc] sm:$0xf] }
 0x618   : > { %v2107_v63 = vpop.f32.mrf.mxu1 }
 0x619   : > { %v939_v58 = vadd.f32 %v2103_v59, %v2107_v63 }
 0x61a   : > { %v1621_v2 = vpop.f32.mrf.mxu1 }
 0x61c   : > { %v2109_v3 = vpop.f32.mrf.mxu1 }
 0x61e   : > { %v1622_v4 = vpop.f32.mrf.mxu1 }
 0x61f   : > { %v1264_v4 = vsel %vm853_vm5, %v1259_v62, 0 }
 0x620   : > { %v989_v5 = vpop.f32.mrf.mxu1 }
 0x621   : > { %v996_v6 = vsel %vm630_vm3, %v989_v5, -inf }
 0x622   : > { %997 = vmax.xlane.f32.xlu1 %v996_v6  ;;  %v1633_v7 = vpop.f32.mrf.mxu1  ;;  %v942_v6 = vadd.f32 %v2105_v61, %v2109_v3 }
 0x624   : > { %v992_v8 = vpop.f32.mrf.mxu1 }
 0x625   : > { %v999_v10 = vsel %vm630_vm3, %v992_v8, -inf }
 0x626   : > { %1000 = vmax.xlane.f32.xlu0 %v999_v10  ;;  %v1634_v11 = vpop.f32.mrf.mxu1 }
 0x633   : > { %1029 = vrot.lane.b32.xlu1 %v2050_v9, %s1848_s17  ;;  %s2175_s17 = scalar_lea.sflag [#allocation3], %s419_s22 }
 0x637   : > { %1127 = vrot.lane.b32.xlu1 %v2030_v46, %s1849_s29 }
 0x6ab   : > { %v998_v12 = vpop.xlane.xlu1 %997 }
 0x6ac   : > { %v1002_v13 = vsub.f32 %v989_v5, %v998_v12 }
 0x6ae   : > { %v1004_v14 = vmul.f32 1.442695, %v1002_v13 }
 0x6af   : > { %v1030_v16 = vpop.permute.xlu1 %1029  ;;  %v1001_v17 = vpop.xlane.xlu0 %1000 }
 0x6b0   : > { %1751 = vpow2.f32 %v1004_v14  ;;  %v1003_v18 = vsub.f32 %v992_v8, %v1001_v17  ;;  %1636 = vmatpush3.bf16.msra.mxu0 %v1030_v16 }
 0x6b1   : > { %1647 = vmatprep.subr.bf16.mxu0 %v1845_v15 }
 0x6b2   : > { %v1006_v19 = vmul.f32 1.442695, %v1003_v18 }
 0x6b4   : > { %1753 = vpow2.f32 %v1006_v19 }
 0x6bd   : > { %v1752_v20 = vpop.eup %1751 }
 0x6be   : > { %v1008_v21 = vsel %vm630_vm3, %v1752_v20, 0.0 }
 0x6bf   : > { %1009 = vadd.xlane.f32.xlu0 %v1008_v21 }
 0x6c1   : > { %v1754_v22 = vpop.eup %1753 }
 0x6c2   : > { %v1011_v46 = vsel %vm630_vm3, %v1754_v22, 0.0 }
 0x6c3   : > { %1012 = vadd.xlane.f32.xlu0 %v1011_v46 }
 0x6d9   : > { %1129 = vrot.lane.b32.xlu0 %v2020_v34, %s1849_s29  ;;  %v1128_v34 = vpop.permute.xlu1 %1127 }
 0x748   : > { %v1010_v23 = vpop.xlane.xlu0 %1009 }
 0x749   : > { %1755 = vrcp.f32 %v1010_v23 }
 0x74c   : > { %v1013_v24 = vpop.xlane.xlu0 %1012 }
 0x74d   : > { %1757 = vrcp.f32 %v1013_v24 }
 0x750   : > { %v1130_v29 = vpop.permute.xlu0 %1129 }
 0x751   : > { %v1135_v31 = vsel %vm582_vm2, %v1130_v29, 0 }
 0x756   : > { %v1756_v25 = vpop.eup %1755 }
 0x757   : > { %v1016_v26 = vmul.f32 %v1756_v25, %v1752_v20 }
 0x759   : > { %v1553_v27 = vpack.c.bf16 %v1016_v26, %v1016_v26 }
 0x75a   : > { %v1758_v28 = vpop.eup %1757 }
 0x75b   : > { %v1017_v30 = vmul.f32 %v1758_v28, %v1754_v22  ;;  %1528 = vst.msk [vmem:[%s2065_s12 + $0x10] sm:$0xf] %vm661_vm4, %v1553_v27 }
 0x75d   : > { %v1018_v32 = vpack.c.bf16 %v1017_v30, %v1016_v26  ;;  %v1554_v33 = vpack.c.bf16 %v1017_v30, %v1017_v30 }
 0x75f   : > { %1529 = vst.msk [vmem:[%s2065_s12 + $0x14] sm:$0xf] %vm661_vm4, %v1554_v33  ;;  %1638 = vmatmul.mubr.msk.bf16.vlgmr.msra.gmra.mxu0 %vm630_vm3, %v1018_v32 }
 0x760   : > { %1648 = vmatpush3.bf16.xpose.msra.mxu0 %v1135_v31  ;;  %1649 = vmatprep.mubr.msk.bf16.mxu0 %vm1846_vm1, %v1845_v15 }
 0x761   : > { %1659 = vmatprep.subr.bf16.mxu0 %v1845_v15 }
 0x767   : > { %1650 = vmatmul.mubr.msk.bf16.vlgmr.msra.gmra.mxu0 %vm582_vm2, %v1128_v34 }
 0x768   : > { %1661 = vmatprep.mubr.msk.bf16.mxu0 %vm1846_vm1, %v1845_v15  ;;  %1660 = vmatpush3.bf16.msra.mxu0 %v1264_v4 }
 0x81f   : > { %v1069_v37 = vpop.f32.mrf.mxu0 }
 0x821   : > { %v1639_v38 = vpop.f32.mrf.mxu0 }
 0x823   : > { %v1072_v39 = vpop.f32.mrf.mxu0 }
 0x824   : > { %v1076_v40 = vpack.c.bf16 %v1072_v39, %v1069_v37 }
 0x825   : > { %v1640_v41 = vpop.f32.mrf.mxu0 }
 0x826   : > { %1644 = vmatmul.mubr.msk.bf16.vlgmr.msra.gmra.mxu1 %vm582_vm2, %v1076_v40 }
 0x827   : > { %v1171_v42 = vpop.f32.mrf.mxu0  ;;  %1655 = vmatprep.mubr.msk.bf16.mxu1 %vm1846_vm1, %v1845_v15 }
 0x828   : > { %v1178_v43 = vsel %vm630_vm3, %v1171_v42, -inf }
 0x829   : > { %1179 = vmax.xlane.f32.xlu1 %v1178_v43  ;;  %v1651_v44 = vpop.f32.mrf.mxu0 }
 0x82b   : > { %v1174_v45 = vpop.f32.mrf.mxu0 }
 0x82c   : > { %v1181_v47 = vsel %vm630_vm3, %v1174_v45, -inf }
 0x82d   : > { %1182 = vmax.xlane.f32.xlu0 %v1181_v47  ;;  %v1652_v48 = vpop.f32.mrf.mxu0 }
 0x8b2   : > { %v1180_v49 = vpop.xlane.xlu1 %1179 }
 0x8b3   : > { %v1184_v50 = vsub.f32 %v1171_v42, %v1180_v49 }
 0x8b5   : > { %v1186_v51 = vmul.f32 1.442695, %v1184_v50 }
 0x8b6   : > { %v1183_v52 = vpop.xlane.xlu0 %1182 }
 0x8b7   : > { %1759 = vpow2.f32 %v1186_v51  ;;  %v1185_v53 = vsub.f32 %v1174_v45, %v1183_v52 }
 0x8b9   : > { %v1188_v54 = vmul.f32 1.442695, %v1185_v53 }
 0x8bb   : > { %1761 = vpow2.f32 %v1188_v54 }
 0x8c4   : > { %v1760_v55 = vpop.eup %1759 }
 0x8c5   : > { %v1190_v15 = vsel %vm630_vm3, %v1760_v55, 0.0 }
 0x8c6   : > { %1191 = vadd.xlane.f32.xlu0 %v1190_v15 }
 0x8c8   : > { %v1762_v56 = vpop.eup %1761 }
 0x8c9   : > { %v1193_v57 = vsel %vm630_vm3, %v1762_v56, 0.0 }
 0x8ca   : > { %1194 = vadd.xlane.f32.xlu1 %v1193_v57 }
 0x8dc   : > { %1211 = vrot.lane.b32.xlu0 %v2050_v9, %s1849_s29 }
 0x8e6   : > { %v1118_v60 = vpop.f32.mrf.mxu1 }
 0x8e7   : > { %v1125_v2 = vadd.f32 %v1118_v60, %v939_v58 }
 0x8e8   : > { %v1645_v5 = vpop.f32.mrf.mxu1 }
 0x8ea   : > { %v1121_v7 = vpop.f32.mrf.mxu1 }
 0x8eb   : > { %v2156_v8 = vadd.f32 %v1121_v7, %v942_v6 }
 0x8ec   : > { %v1646_v9 = vpop.f32.mrf.mxu1 }
 0x94f   : > { %v1192_v59 = vpop.xlane.xlu0 %1191 }
 0x950   : > { %1763 = vrcp.f32 %v1192_v59 }
 0x953   : > { %v1195_v63 = vpop.xlane.xlu1 %1194  ;;  %v1212_v10 = vpop.permute.xlu0 %1211 }
 0x954   : > { %1765 = vrcp.f32 %v1195_v63  ;;  %1654 = vmatpush3.bf16.msra.mxu1 %v1212_v10 }
 0x95d   : > { %v1764_v11 = vpop.eup %1763 }
 0x95e   : > { %v1198_v12 = vmul.f32 %v1764_v11, %v1760_v55 }
 0x960   : > { %v1555_v13 = vpack.c.bf16 %v1198_v12, %v1198_v12 }
 0x961   : > { %v1766_v14 = vpop.eup %1765 }
 0x962   : > { %v1199_v16 = vmul.f32 %v1766_v14, %v1762_v56  ;;  %1535 = vst.msk [vmem:[%s2065_s12 + $0x18] sm:$0xf] %vm661_vm4, %v1555_v13 }
 0x964   : > { %v1556_v61 = vpack.c.bf16 %v1199_v16, %v1199_v16  ;;  %v1200_v3 = vpack.c.bf16 %v1199_v16, %v1198_v12 }
 0x966   : > { %1536 = vst.msk [vmem:[%s2065_s12 + $0x1c] sm:$0xf] %vm661_vm4, %v1556_v61  ;;  %1656 = vmatmul.mubr.msk.bf16.vlgmr.msra.gmra.mxu1 %vm630_vm3, %v1200_v3  ;;  %s1771_s12 = sshll.u32 %s1850_s16, 4  ;;  %s1772_s12 = int_to_ptr.vmem [resolvable:$false] %s1771_s12 }
 0x967   : > { %s1773_s19 = scalar_lea.vmem %s1772_s12, 1024  ;;  %p1774_p1 = scmp.lt.s32.totalorder %s2171_s24, %s1772_s12 }
 0x968   : > { %p1775_p2 = scmp.lt.s32.totalorder %s1773_s19, %s1767_s11 }
 0x96a   : > { %p1776_p3 = por %p1775_p2, %p1774_p1 }
 0x96c   : > { %p1777_p5 = pnand %p1776_p3, %p1770_p0 }
 0xa26   : > { %v1251_v17 = vpop.f32.mrf.mxu1 }
 0xa28   : > { %v1657_v18 = vpop.f32.mrf.mxu1 }
 0xa2a   : > { %v1254_v19 = vpop.f32.mrf.mxu1 }
 0xa2b   : > { %v1258_v20 = vpack.c.bf16 %v1254_v19, %v1251_v17 }
 0xa2c   : > { %v1658_v21 = vpop.f32.mrf.mxu1 }
 0xa2d   : > { %1662 = vmatmul.mubr.msk.bf16.vlgmr.msra.gmra.mxu0 %vm582_vm2, %v1258_v20 }
 0xa2e   : > { %1780 = shalt.err (!%p1777_p5)
}
 0xa2f   : > { %s1781_s22 = scalar_lea.hbm %s2169_s30, 512  ;;  %s1785_s29 = scalar_lea.hbm %s2243_s10, 1024 }
 0xa30   : > { %p1782_p6 = scmp.ne.s32.totalorder %s2169_s30, %s1781_s22  ;;  %p1786_p10 = scmp.lt.s32.totalorder %s2169_s30, %s2243_s10 }
 0xa31   : > { %p1787_p11 = scmp.lt.s32.totalorder %s1785_s29, %s1781_s22 }
 0xa32   : > { %p1783_p7 = pnand %p1782_p6, %p1948_p4 }
 0xa33   : > { %p1788_p12 = por %p1787_p11, %p1786_p10 }
 0xa34   : > { %p1784_p9 = pneg %p1783_p7 }
 0xa36   : > { %p1789_p13 = pnand %p1788_p12, %p1784_p9 }
 0xa38   : > { %1792 = shalt.err (!%p1789_p13)
}
 0xa39   : > { %s1851_s11 = smov 64   ;;  %s1852_s12 = smov 4   ;;  %v1539_v23 = vld [vmem:[%s2241_s8] ss:$0 sm:$0xff] }
 0xa3a   : > { %1665 = dma.vmem_to_hbm [thread:$0]  (%p1948_p4), %s2171_s24, 512, %s2169_s30, %s2175_s17, %s1851_s11, %s1851_s11, %s1852_s12  }
 0xa3b   : > { %s2251_s28 = sshll.u32 %s1965_s27, 4 }
 0xa3c   : > { %s450_s29 = scalar_lea.vmem %s2242_s9, %s2251_s28 }
 0xaed   : > { %v1300_v22 = vpop.f32.mrf.mxu0 }
 0xaee   : > { %v1307_v46 = vadd.f32 %v1300_v22, %v1125_v2 }
 0xaef   : > { %v1663_v24 = vpop.f32.mrf.mxu0 }
 0xaf0   : > { %v1309_v25 = vadd.f32 %v1307_v46, %v1984_v0 }
 0xaf1   : > { %v1303_v26 = vpop.f32.mrf.mxu0 }
 0xaf2   : > { %v1318_v27 = vadd.f32 %v1539_v23, %v1309_v25  ;;  %v1308_v28 = vadd.f32 %v1303_v26, %v2156_v8 }
 0xaf3   : > { %v1664_v29 = vpop.f32.mrf.mxu0 }
 0xaf4   : > { %1320 = vst.msk [vmem:[%s450_s29] sm:$0xff] %vm458_vm0, %v1318_v27  ;;  %v1310_v30 = vadd.f32 %v1308_v28, %v1986_v1 }
 0xaf6   : > { %v1319_v31 = vadd.f32 %v1539_v23, %v1310_v30 }
 0xaf8   : > { %1321 = vst.msk [vmem:[%s450_s29 + $0x8] sm:$0xff] %vm458_vm0, %v1319_v31 }
 0xaf9 PF: > { %p1671_p4 = scmp.ge.s32.totalorder %s1843_s18, 2  ;;  %s1378_s23 = sand.u32 1, %s1823_s13  }
 0xafa   : > { %s1379_s27 = scalar_lea.sflag [#allocation3], %s1378_s23 }
 0xafb   : > { %p1668_p0 = pnand %p1671_p4, %p1955_p8 }
 0xafd   : > { %p1669_p1 = pneg %p1668_p0 }
 0xaff   : > { %1818 = dma.done.wait (%p1669_p1), %s1379_s27, 512  }
 0xb00   : > { %1820 = vsyncadd (%p1669_p1), %s1379_s27, 4294966784  ;;  %s24_s18 = sadd.s32 1, %s1843_s18   ;;  %s2252_s16 = sld [smem:[#allocation5_spill]] }
 0xb01   : > { %p21_p2 = scmp.ge.s32.totalorder %s24_s18, 4   ;;  %s2253_s17 = sld [smem:[#allocation6_spill]] }
 0xb02   : > { %s2254_s13 = smov %s1827_s14  ;;  %s2255_s14 = smov %s1831_s15 }
 0xb03   : > { %s2256_s15 = smov %s1961_s26  ;;  %23 = sbr.rel (!%p21_p2) target bundleno = 4 (0x4), region = 112 }
 0xb08   :  { %1384 = vsyncpa [#allocation3], 1 }
 0xb09   :  { %1386 = vsyncpa [#allocation3 + $0x1], 1 }

// kernel: cross_conformer_block.12
= control target key start
LH: loop header
LB: loop body
LE: loop exit
PB: predicated region body
PF: predicated region fallthrough
CT: control target
= control target key end

     0   :  { %s972_s25 = smov 0   ;;  %s1060_s0 = inlined_call_operand.vmem [shape: f32[2,16,32], index: 0, kind: input, shape index: {}]   ;;  %s1061_s1 = inlined_call_operand.vmem [shape: f32[1,32], index: 1, kind: input, shape index: {}]   ;;  %s1062_s2 = inlined_call_operand.vmem [shape: f32[1,32], index: 2, kind: input, shape index: {}]   ;;  %s1063_s3 = inlined_call_operand.vmem [shape: bf16[32,64], index: 3, kind: input, shape index: {}]   ;;  %s1064_s4 = inlined_call_operand.vmem [shape: f32[1,64], index: 4, kind: input, shape index: {}]   ;;  %s1065_s5 = inlined_call_operand.vmem [shape: f32[3,32], index: 5, kind: input, shape index: {}]   ;;  %s1066_s6 = inlined_call_operand.vmem [shape: f32[1,32], index: 6, kind: input, shape index: {}]   ;;  %s1067_s7 = inlined_call_operand.vmem [shape: f32[1,32], index: 7, kind: input, shape index: {}]   ;;  %s1068_s8 = inlined_call_operand.vmem [shape: f32[1,32], index: 8, kind: input, shape index: {}]   ;;  %s1069_s9 = inlined_call_operand.vmem [shape: f32[1,32], index: 9, kind: input, shape index: {}]   ;;  %s1070_s10 = inlined_call_operand.vmem [shape: f32[1,32], index: 10, kind: input, shape index: {}]   ;;  %s1071_s11 = inlined_call_operand.vmem [shape: bf16[32,32], index: 11, kind: input, shape index: {}]   ;;  %s1072_s12 = inlined_call_operand.vmem [shape: f32[1,32], index: 12, kind: input, shape index: {}]   ;;  %s1073_s13 = inlined_call_operand.vmem [shape: f32[2,16,32], index: 13, kind: output, shape index: {}]  }
   0x1 LB: > { %s805_s26 = sadd.s32 4294967295, %s897_s25   ;;  %p809_p0 = scmp.ge.s32.totalorder %s897_s25, 1  ;;  %s897_s25 = sphi %s972_s25, %s23_s25  }
   0x2   : > { %p387_p1 = scmp.lt.s32.totalorder %s897_s25, 3 }
   0x4   : > { %p388_p2 = pnand %p809_p0, %p387_p1 }
   0x5   : > { %p431_p3 = scmp.lt.s32.totalorder (!%p388_p2), %s805_s26, 1  ;;  %s901_s14 = smov (!%p388_p2), 96  }
   0x6   : > { %391 = sbr.rel (%p388_p2) target bundleno = 944 (0x3b0), region = 72 }
   0xb   : > { %s1075_s26 = smov (!%p431_p3, %s805_s26), 1  ;;  %vm446_vm0 = vcmask 261120   ;;  %v865_v14 = vld [vmem:[%s1063_s3 + $0x8] sm:$0xff]   ;;  %v899_v15 = vmov 0.0   ;;  %vm900_vm1 = vmmov 0   ;;  %v866_v16 = vld [vmem:[%s1063_s3] sm:$0xff]   ;;  %v589_v53 = vlaneseq }
   0xc   : > { %s830_s27 = sshll.u32 %s1075_s26, 4  ;;  %838 = vmatprep.subr.bf16.mxu0 %v899_v15  ;;  %580 = vst.msk [vmem:[#allocation2] sm:$0xff] %vm446_vm0, %v899_v15  ;;  %581 = vst.msk [vmem:[#allocation2 + $0x8] sm:$0xff] %vm446_vm0, %v899_v15  ;;  %842 = vmatprep.mubr.msk.bf16.mxu0 %vm900_vm1, %v899_v15  ;;  %v814_v25 = vld [vmem:[%s1061_s1] ss:$0 sm:$0xff]  ;;  %vm582_vm2 = vcmask 254976  }
   0xd   : > { %s435_s30 = scalar_lea.vmem %s1060_s0, %s830_s27  ;;  %839 = vmatpush3.bf16.msra.mxu0 %v865_v14  ;;  %846 = vmatprep.subr.bf16.mxu1 %v899_v15  ;;  %v815_v29 = vld [vmem:[%s1062_s2] ss:$0 sm:$0xff]  ;;  %583 = vst.msk [vmem:[#allocation2 + $0x10] sm:$0x3] %vm582_vm2, %v899_v15  ;;  %v867_v49 = vld [vmem:[%s1071_s11 + $0x8] sm:$0xff]   ;;  %v590_v55 = vshrl.u32 %v589_v53, 7  ;;  %s440_s17 = scalar_lea.vmem %s1073_s13, %s830_s27 }
   0xe   : > { %v988_v0 = vld [vmem:[%s435_s30] sm:$0xff]  ;;  %v990_v1 = vld [vmem:[%s435_s30 + $0x8] sm:$0xff]  ;;  %840 = vmatprep.subr.bf16.mxu0 %v899_v15  ;;  %850 = vmatprep.mubr.msk.bf16.mxu1 %vm900_vm1, %v899_v15 }
   0xf   : > { %v447_v2 = vsel %vm446_vm0, %v988_v0, 0.0  ;;  %v450_v3 = vsel %vm446_vm0, %v990_v1, 0.0  ;;  %v816_v34 = vld [vmem:[%s1064_s4] ss:$0 sm:$0xff]  ;;  %847 = vmatpush3.bf16.msra.mxu1 %v867_v49  ;;  %v591_v59 = vsub.s32 0, %v590_v55  ;;  %v601_v60 = vsub.s32 1, %v590_v55 }
  0x10   : > { %448 = vadd.xlane.f32.xlu0 %v447_v2  ;;  %v868_v50 = vld [vmem:[%s1071_s11] sm:$0xff]   ;;  %848 = vmatprep.subr.bf16.mxu1 %v899_v15 }
  0x11   : > { %841 = vmatpush3.bf16.msra.mxu0 %v866_v16  ;;  %v635_v54 = vld [vmem:[%s1070_s10] sm:$0x1] }
  0x12   : > { %v636_v56 = vadd.f32 1e-05, %v635_v54  ;;  %v586_v62 = vld [vmem:[%s1065_s5] sm:$0x7] }
  0x13   : > { %849 = vmatpush3.bf16.msra.mxu1 %v868_v50  ;;  %v592_v2 = vrot.slane %v586_v62, %v591_v59 }
  0x14   : > { %451 = vadd.xlane.f32.xlu0 %v450_v3  ;;  %v602_v3 = vrot.slane %v586_v62, %v601_v60 }
  0x99   : > { %v449_v4 = vpop.xlane.xlu0 %448 }
  0x9a   : > { %v454_v5 = vmul.f32 0.03125, %v449_v4  ;;  %v611_v4 = vsub.s32 2, %v590_v55 }
  0x9c   : > { %v456_v6 = vsub.f32 %v988_v0, %v454_v5 }
  0x9d   : > { %v452_v7 = vpop.xlane.xlu0 %451 }
  0x9e   : > { %v455_v8 = vmul.f32 0.03125, %v452_v7  ;;  %v458_v9 = vmul.f32 %v456_v6, %v456_v6 }
  0xa0   : > { %v457_v10 = vsub.f32 %v990_v1, %v455_v8  ;;  %v460_v11 = vsel %vm446_vm0, %v458_v9, 0.0  ;;  %v612_v9 = vrot.slane %v586_v62, %v611_v4 }
  0xa1   : > { %461 = vadd.xlane.f32.xlu1 %v460_v11 }
  0xa2   : > { %v459_v12 = vmul.f32 %v457_v10, %v457_v10 }
  0xa4   : > { %v463_v13 = vsel %vm446_vm0, %v459_v12, 0.0 }
  0xa5   : > { %464 = vadd.xlane.f32.xlu1 %v463_v13 }
 0x12a   : > { %v462_v17 = vpop.xlane.xlu1 %461 }
 0x12b   : > { %v466_v18 = vmul.f32 0.03125, %v462_v17 }
 0x12d   : > { %v468_v19 = vadd.f32 1e-05, %v466_v18 }
 0x12e   : > { %v465_v20 = vpop.xlane.xlu1 %464 }
 0x12f   : > { %869 = vrsqrt.f32 %v468_v19  ;;  %v467_v21 = vmul.f32 0.03125, %v465_v20  ;;  %v820_v19 = vld [vmem:[%s1066_s6] ss:$0 sm:$0xff] }
 0x131   : > { %v469_v22 = vadd.f32 1e-05, %v467_v21 }
 0x133   : > { %871 = vrsqrt.f32 %v469_v22 }
 0x13c   : > { %v870_v23 = vpop.eup %869 }
 0x13d   : > { %v472_v24 = vmul.f32 %v870_v23, %v456_v6  ;;  %v821_v23 = vld [vmem:[%s1069_s9] ss:$0 sm:$0xff] }
 0x13f   : > { %v480_v28 = vmul.f32 %v814_v25, %v472_v24 }
 0x140   : > { %v872_v26 = vpop.eup %871 }
 0x141   : > { %v473_v27 = vmul.f32 %v872_v26, %v457_v10  ;;  %v488_v31 = vadd.f32 %v815_v29, %v480_v28 }
 0x143   : > { %v481_v30 = vmul.f32 %v814_v25, %v473_v27 }
 0x145   : > { %v489_v32 = vadd.f32 %v815_v29, %v481_v30  ;;  %v822_v29 = vld [vmem:[%s1067_s7] ss:$0 sm:$0xff] }
 0x147   : > { %v490_v33 = vpack.c.bf16 %v489_v32, %v488_v31  ;;  %v823_v32 = vld [vmem:[%s1068_s8] ss:$0 sm:$0xff] }
 0x149   : > { %843 = vmatmul.mubr.msk.bf16.vlgmr.msra.gmra.mxu0 %vm446_vm0, %v490_v33 }
 0x209   : > { %v551_v35 = vpop.f32.mrf.mxu0 }
 0x20a   : > { %v552_v36 = vadd.f32 %v816_v34, %v551_v35 }
 0x20b   : > { %v844_v37 = vpop.f32.mrf.mxu0 }
 0x20c   : > { %v558_v38 = vsub.f32 0.0, %v552_v36 }
 0x20d   : > { %v554_v39 = vpop.f32.mrf.mxu0 }
 0x20e   : > { %v560_v40 = vmul.f32 1.442695, %v558_v38  ;;  %v555_v41 = vadd.f32 %v816_v34, %v554_v39 }
 0x20f   : > { %v845_v42 = vpop.f32.mrf.mxu0 }
 0x210   : > { %873 = vpow2.f32 %v560_v40  ;;  %v559_v43 = vsub.f32 0.0, %v555_v41 }
 0x212   : > { %v562_v44 = vmul.f32 1.442695, %v559_v43 }
 0x214   : > { %875 = vpow2.f32 %v562_v44 }
 0x21d   : > { %v874_v45 = vpop.eup %873 }
 0x21e   : > { %v564_v46 = vadd.f32 1.0, %v874_v45 }
 0x220   : > { %877 = vrcp.f32 %v564_v46 }
 0x221   : > { %v876_v47 = vpop.eup %875 }
 0x222   : > { %v565_v48 = vadd.f32 1.0, %v876_v47 }
 0x224   : > { %879 = vrcp.f32 %v565_v48 }
 0x225   : > { %881 = vrsqrt.f32 %v636_v56 }
 0x22d   : > { %v878_v51 = vpop.eup %877 }
 0x22e   : > { %572 = vrot.lane.b32.xlu0 %v878_v51, %s901_s14  ;;  %v824_v51 = vld [vmem:[%s1072_s12] ss:$0 sm:$0xff] }
 0x231   : > { %v880_v52 = vpop.eup %879 }
 0x232   : > { %574 = vrot.lane.b32.xlu1 %v880_v52, %s901_s14  ;;  %v882_v18 = vpop.eup %881 }
 0x233   : > { %v642_v26 = vrot.slane %v882_v18, %v591_v59 }
 0x2a0   : > { %v573_v57 = vpop.permute.xlu0 %572 }
 0x2a1   : > { %v578_v58 = vmul.f32 %v573_v57, %v552_v36 }
 0x2a3   : > { %584 = vst.msk [vmem:[#allocation2 + $0x1] sm:$0xff] %vm446_vm0, %v578_v58 }
 0x2a4   : > { %v575_v61 = vpop.permute.xlu1 %574 }
 0x2a5   : > { %v579_v63 = vmul.f32 %v575_v61, %v555_v41 }
 0x2a7   : > { %585 = vst.msk [vmem:[#allocation2 + $0x9] sm:$0xff] %vm446_vm0, %v579_v63 }
 0x2aa   : > { %v587_v5 = vld [vmem:[#allocation2] sm:$0xff] }
 0x2ab   : > { %v597_v6 = vld [vmem:[#allocation2 + $0x1] sm:$0xff]  ;;  %v593_v7 = vmul.f32 %v592_v2, %v587_v5 }
 0x2ac   : > { %v603_v8 = vmul.f32 %v602_v3, %v597_v6 }
 0x2ae   : > { %v588_v10 = vld [vmem:[#allocation2 + $0x8] sm:$0xff]  ;;  %v605_v15 = vadd.f32 %v603_v8, %v593_v7 }
 0x2af   : > { %v598_v11 = vld [vmem:[#allocation2 + $0x9] sm:$0xff]  ;;  %v594_v13 = vmul.f32 %v592_v2, %v588_v10 }
 0x2b0   : > { %v607_v12 = vld [vmem:[#allocation2 + $0x2] sm:$0xff]  ;;  %v604_v14 = vmul.f32 %v602_v3, %v598_v11  ;;  %v608_v16 = vld [vmem:[#allocation2 + $0xa] sm:$0xff] }
 0x2b1   : > { %v613_v17 = vmul.f32 %v612_v9, %v607_v12  ;;  %v614_v21 = vmul.f32 %v612_v9, %v608_v16 }
 0x2b2   : > { %v606_v20 = vadd.f32 %v604_v14, %v594_v13 }
 0x2b3   : > { %v615_v22 = vadd.f32 %v613_v17, %v605_v15 }
 0x2b4   : > { %v616_v24 = vadd.f32 %v614_v21, %v606_v20 }
 0x2b5   : > { %v624_v25 = vadd.f32 %v820_v19, %v615_v22 }
 0x2b6   : > { %v625_v27 = vadd.f32 %v820_v19, %v616_v24 }
 0x2b7   : > { %v633_v28 = vsub.f32 %v624_v25, %v821_v23 }
 0x2b8   : > { %v634_v30 = vsub.f32 %v625_v27, %v821_v23 }
 0x2b9   : > { %v644_v31 = vmul.f32 %v642_v26, %v633_v28 }
 0x2ba   : > { %v645_v33 = vmul.f32 %v642_v26, %v634_v30 }
 0x2bb   : > { %v653_v34 = vmul.f32 %v822_v29, %v644_v31 }
 0x2bc   : > { %v654_v35 = vmul.f32 %v822_v29, %v645_v33 }
 0x2bd   : > { %v662_v36 = vadd.f32 %v823_v32, %v653_v34 }
 0x2be   : > { %v663_v37 = vadd.f32 %v823_v32, %v654_v35 }
 0x2bf   : > { %v664_v38 = vsub.f32 0.0, %v662_v36 }
 0x2c0   : > { %v665_v39 = vsub.f32 0.0, %v663_v37 }
 0x2c1   : > { %v666_v40 = vmul.f32 1.442695, %v664_v38 }
 0x2c2   : > { %v668_v41 = vmul.f32 1.442695, %v665_v39 }
 0x2c3   : > { %883 = vpow2.f32 %v666_v40 }
 0x2c4   : > { %885 = vpow2.f32 %v668_v41 }
 0x2d0   : > { %v884_v42 = vpop.eup %883 }
 0x2d1   : > { %v670_v43 = vadd.f32 1.0, %v884_v42  ;;  %v886_v44 = vpop.eup %885 }
 0x2d2   : > { %v671_v45 = vadd.f32 1.0, %v886_v44 }
 0x2d3   : > { %887 = vrcp.f32 %v670_v43 }
 0x2d4   : > { %889 = vrcp.f32 %v671_v45 }
 0x2e0   : > { %v888_v46 = vpop.eup %887 }
 0x2e1   : > { %v890_v47 = vpop.eup %889  ;;  %v676_v48 = vmul.f32 %v888_v46, %v662_v36 }
 0x2e2   : > { %v677_v49 = vmul.f32 %v890_v47, %v663_v37 }
 0x2e4   : > { %v678_v50 = vpack.c.bf16 %v677_v49, %v676_v48 }
 0x2e6   : > { %851 = vmatmul.mubr.msk.bf16.vlgmr.msra.gmra.mxu1 %vm446_vm0, %v678_v50 }
 0x3a6   : > { %v739_v52 = vpop.f32.mrf.mxu1 }
 0x3a7   : > { %v740_v53 = vadd.f32 %v824_v51, %v739_v52 }
 0x3a8   : > { %v852_v54 = vpop.f32.mrf.mxu1 }
 0x3a9   : > { %v746_v55 = vadd.f32 %v740_v53, %v988_v0 }
 0x3aa   : > { %v742_v56 = vpop.f32.mrf.mxu1 }
 0x3ab   : > { %748 = vst.msk [vmem:[%s440_s17] sm:$0xff] %vm446_vm0, %v746_v55  ;;  %v743_v57 = vadd.f32 %v824_v51, %v742_v56 }
 0x3ac   : > { %v853_v58 = vpop.f32.mrf.mxu1 }
 0x3ad   : > { %v747_v59 = vadd.f32 %v743_v57, %v990_v1 }
 0x3af   : > { %749 = vst.msk [vmem:[%s440_s17 + $0x8] sm:$0xff] %vm446_vm0, %v747_v59 }
 0x3b0 PF: > { %s23_s25 = sadd.s32 1, %s897_s25  }
 0x3b1   : > { %p20_p4 = scmp.ge.s32.totalorder %s23_s25, 4  }
 0x3b3   :  { %22 = sbr.rel (!%p20_p4) target bundleno = 1 (0x1), region = 102 }

// kernel: cross_conformer_block.11
= control target key start
LH: loop header
LB: loop body
LE: loop exit
PB: predicated region body
PF: predicated region fallthrough
CT: control target
= control target key end

     0   :  { %16 = vsyncpa [#allocation3], 0  ;;  %s2335_s0 = inlined_call_operand.vmem [shape: f32[2,16,32], index: 0, kind: input, shape index: {}]   ;;  %s2336_s1 = inlined_call_operand.vmem [shape: bf16[2,24,32], index: 1, kind: input, shape index: {}]   ;;  %s2337_s2 = inlined_call_operand.vmem [shape: bf16[2,24,32], index: 2, kind: input, shape index: {}]   ;;  %s2338_s3 = inlined_call_operand.vmem [shape: f32[1,32], index: 3, kind: input, shape index: {}]   ;;  %s2339_s4 = inlined_call_operand.vmem [shape: f32[1,32], index: 4, kind: input, shape index: {}]   ;;  %s2340_s5 = inlined_call_operand.vmem [shape: bf16[32,32], index: 5, kind: input, shape index: {}]   ;;  %s2341_s6 = inlined_call_operand.vmem [shape: f32[1,32], index: 6, kind: input, shape index: {}]   ;;  %s2342_s7 = inlined_call_operand.vmem [shape: bf16[32,32], index: 7, kind: input, shape index: {}]   ;;  %s2343_s8 = inlined_call_operand.vmem [shape: f32[1,32], index: 8, kind: input, shape index: {}]   ;;  %s2344_s9 = inlined_call_operand.vmem [shape: f32[2,16,32], index: 9, kind: output, shape index: {0}]   ;;  %s2345_s10 = inlined_call_operand.hbm [shape: bf16[2,4,16,24], index: 10, kind: output, shape index: {1}]  }
   0x1   :  { %18 = vsyncpa [#allocation3 + $0x1], 0  ;;  %s1977_s13 = smov 0   ;;  %s1979_s14 = smov 0  }
   0x2   :  { %s1981_s15 = smov 0   ;;  %s1983_s16 = smov 0  }
   0x3   :  { %s1985_s17 = smov 0   ;;  %s1987_s18 = smov 0  }
   0x4 LB: > { %2349 = sst [smem:[#allocation5_spill]] %s1908_s17  ;;  %s1535_s19 = sadd.s32 4294967295, %s1912_s18   ;;  %s1912_s18 = sphi %s1987_s18, %s24_s18   ;;  %s1908_s17 = sphi %s1985_s17, %s2355_s17   ;;  %s1904_s16 = sphi %s1983_s16, %s2354_s16   ;;  %s1900_s15 = sphi %s1981_s15, %s2358_s15   ;;  %s1896_s14 = sphi %s1979_s14, %s2357_s14   ;;  %s1892_s13 = sphi %s1977_s13, %s2356_s13  }
   0x5   : > { %s1536_s20 = sadd.s32 4294967294, %s1912_s18   ;;  %s36_s21 = sadd.s32 1, %s1908_s17 }
   0x6   : > { %s279_s22 = sadd.s32 1, %s1900_s15  ;;  %p38_p0 = scmp.ge.s32.totalorder %s36_s21, 2 }
   0x7   : > { %p289_p1 = scmp.ne.s32.totalorder %s1900_s15, %s1896_s14  ;;  %p290_p2 = scmp.eq.s32.totalorder %s1535_s19, 1 }
   0x8   : > { %p295_p3 = scmp.ne.s32.totalorder %s1896_s14, %s1892_s13  ;;  %s2360_s21 = smov (%p38_p0, %s36_s21), 0 }
   0x9   : > { %2350 = sst [smem:[#allocation6_spill]] %s2360_s21  ;;  %p2017_p4 = por %p290_p2, %p289_p1 }
   0xa   : > { %p296_p5 = scmp.eq.s32.totalorder %s1536_s20, 1  ;;  %s274_s24 = ssub.s32 %s1908_s17, %s2360_s21 }
   0xb   : > { %p1539_p6 = scmp.ge.s32.totalorder %s1912_s18, 1  ;;  %p277_p7 = scmp.eq.s32.totalorder %s274_s24, 0 }
   0xc   : > { %p2024_p8 = por %p296_p5, %p295_p3  ;;  %p361_p9 = scmp.lt.s32.totalorder %s1912_s18, 3 }
   0xd   : > { %s2030_s26 = scalar_select %p277_p7, %s1900_s15, %s279_s22  }
   0xe   : > { %p362_p10 = pnand %p1539_p6, %p361_p9 }
   0xf   : > { %p423_p11 = scmp.lt.s32.totalorder (!%p362_p10), %s1904_s16, 1  ;;  %s419_s30 = sand.u32 (!%p362_p10), 1, %s1896_s14  }
  0x10   : > { %365 = sbr.rel (%p362_p10) target bundleno = 2920 (0xb68), region = 56  ;;  %s1540_s11 = sshll.u32 (!%p362_p10), %s419_s30, 5 }
  0x11   : > { %s1917_s20 = smov (!%p362_p10), 112   ;;  %s1918_s24 = smov (!%p362_p10), 104  }
  0x15   : > { %s2034_s27 = scalar_select %p423_p11, %s1904_s16, 1  ;;  %vm458_vm0 = vcmask 261120   ;;  %v1794_v14 = vld [vmem:[%s2340_s5 + $0x8] sm:$0xff]   ;;  %v1914_v15 = vmov 0.0   ;;  %vm1915_vm1 = vmmov 0   ;;  %v1795_v16 = vld [vmem:[%s2340_s5] sm:$0xff]  }
  0x16   : > { %1635 = vmatprep.subr.bf16.mxu0 %v1914_v15  ;;  %1639 = vmatprep.mubr.msk.bf16.mxu0 %vm1915_vm1, %v1914_v15  ;;  %vm587_vm2 = vcmask 64512   ;;  %v1547_v27 = vld [vmem:[%s2338_s3] ss:$0 sm:$0xff]  ;;  %vm638_vm3 = vcmask 195584   ;;  %vm684_vm4 = vcmask 1043456   ;;  %vm669_vm5 = vcmask 191488  }
  0x17   : > { %s2348_s28 = sshll.u32 %s2034_s27, 4  ;;  %s1731_s29 = smul.u32 12, %s2034_s27  ;;  %1636 = vmatpush3.bf16.msra.mxu0 %v1794_v14  ;;  %1643 = vmatprep.subr.bf16.mxu1 %v1914_v15  ;;  %v1548_v31 = vld [vmem:[%s2339_s4] ss:$0 sm:$0xff] }
  0x18   : > { %s430_s12 = scalar_lea.vmem %s2335_s0, %s2348_s28  ;;  %1637 = vmatprep.subr.bf16.mxu0 %v1914_v15  ;;  %1647 = vmatprep.mubr.msk.bf16.mxu1 %vm1915_vm1, %v1914_v15  ;;  %v1549_v38 = vld [vmem:[%s2341_s6] ss:$0 sm:$0xff] }
  0x19   : > { %s2046_s22 = scalar_lea.vmem %s2336_s1, %s1731_s29  ;;  %v2048_v0 = vld [vmem:[%s430_s12] sm:$0xff]  ;;  %v2050_v1 = vld [vmem:[%s430_s12 + $0x8] sm:$0xff]  ;;  %s2055_s17 = scalar_lea.vmem %s2337_s2, %s1731_s29 }
  0x1a   : > { %v459_v2 = vsel %vm458_vm0, %v2048_v0, 0.0  ;;  %v462_v3 = vsel %vm458_vm0, %v2050_v1, 0.0  ;;  %v2080_v17 = vld [vmem:[%s2046_s22 + $0x8] ss:$0 sps:$4 sm:$0xff]   ;;  %v2095_v36 = vld [vmem:[%s2046_s22] sm:$0xff]   ;;  %s1916_s22 = smov 120  }
  0x1b   : > { %460 = vadd.xlane.f32.xlu0 %v459_v2  ;;  %1638 = vmatpush3.bf16.msra.mxu0 %v1795_v16  ;;  %v595_v18 = vsel %vm587_vm2, %v2080_v17, 0  ;;  %v592_v37 = vsel %vm587_vm2, %v2095_v36, 0  ;;  %v2116_v2 = vld [vmem:[%s2055_s17 + $0x8] ss:$0 sps:$4 sm:$0xff]  }
  0x1c   : > { %1651 = vmatprep.subr.bf16.mxu0 %v1914_v15  ;;  %1644 = vmatpush3.bf16.xpose.msra.mxu1 %v595_v18 }
  0x1d   : > { %1645 = vmatprep.subr.bf16.mxu1 %v1914_v15 }
  0x1f   : > { %463 = vadd.xlane.f32.xlu0 %v462_v3  ;;  %v686_v3 = vsel %vm684_vm4, %v2116_v2, 0 }
  0x24   : > { %1646 = vmatpush3.bf16.xpose.msra.mxu1 %v592_v37 }
  0x25   : > { %1667 = vmatprep.subr.bf16.mxu1 %v1914_v15 }
  0xa4   : > { %v461_v4 = vpop.xlane.xlu0 %460 }
  0xa5   : > { %v466_v5 = vmul.f32 0.03125, %v461_v4  ;;  %v2123_v4 = vld [vmem:[%s2055_s17] sm:$0xff]   ;;  %s2133_s17 = scalar_lea.vmem [#allocation2], %s1540_s11  ;;  %s2278_s11 = scalar_lea.sflag [#allocation3], %s419_s30 }
  0xa7   : > { %v468_v6 = vsub.f32 %v2048_v0, %v466_v5 }
  0xa8   : > { %v464_v7 = vpop.xlane.xlu0 %463 }
  0xa9   : > { %v467_v8 = vmul.f32 0.03125, %v464_v7  ;;  %v470_v9 = vmul.f32 %v468_v6, %v468_v6 }
  0xab   : > { %v469_v10 = vsub.f32 %v2050_v1, %v467_v8  ;;  %v472_v11 = vsel %vm458_vm0, %v470_v9, 0.0 }
  0xac   : > { %473 = vadd.xlane.f32.xlu1 %v472_v11 }
  0xad   : > { %v471_v12 = vmul.f32 %v469_v10, %v469_v10 }
  0xaf   : > { %v475_v13 = vsel %vm458_vm0, %v471_v12, 0.0 }
  0xb0   : > { %476 = vadd.xlane.f32.xlu1 %v475_v13 }
 0x135   : > { %v474_v19 = vpop.xlane.xlu1 %473 }
 0x136   : > { %v478_v20 = vmul.f32 0.03125, %v474_v19 }
 0x138   : > { %v480_v21 = vadd.f32 1e-05, %v478_v20 }
 0x139   : > { %v477_v22 = vpop.xlane.xlu1 %476 }
 0x13a   : > { %1800 = vrsqrt.f32 %v480_v21  ;;  %v479_v23 = vmul.f32 0.03125, %v477_v22  ;;  %v730_v21 = vld [vmem:[%s2342_s7] sm:$0xf] }
 0x13b   : > { %v926_v22 = vsel %vm684_vm4, %v730_v21, 0 }
 0x13c   : > { %v481_v24 = vadd.f32 1e-05, %v479_v23 }
 0x13e   : > { %1802 = vrsqrt.f32 %v481_v24 }
 0x147   : > { %v1801_v25 = vpop.eup %1800 }
 0x148   : > { %v484_v26 = vmul.f32 %v1801_v25, %v468_v6 }
 0x14a   : > { %v492_v30 = vmul.f32 %v1547_v27, %v484_v26 }
 0x14b   : > { %v1803_v28 = vpop.eup %1802 }
 0x14c   : > { %v485_v29 = vmul.f32 %v1803_v28, %v469_v10  ;;  %v500_v33 = vadd.f32 %v1548_v31, %v492_v30 }
 0x14e   : > { %v493_v32 = vmul.f32 %v1547_v27, %v485_v29 }
 0x150   : > { %v501_v34 = vadd.f32 %v1548_v31, %v493_v32 }
 0x152   : > { %v502_v35 = vpack.c.bf16 %v501_v34, %v500_v33 }
 0x154   : > { %1640 = vmatmul.mubr.msk.bf16.vlgmr.msra.gmra.mxu0 %vm458_vm0, %v502_v35 }
 0x155   : > { %1655 = vmatprep.mubr.msk.bf16.mxu0 %vm1915_vm1, %v1914_v15  ;;  %1652 = vmatpush3.bf16.msra.mxu0 %v686_v3 }
 0x156   : > { %1653 = vmatprep.subr.bf16.mxu0 %v1914_v15 }
 0x159   : > { %1654 = vmatpush3.bf16.msra.mxu0 %v2123_v4 }
 0x15a   : > { %1659 = vmatprep.subr.bf16.mxu0 %v1914_v15 }
 0x214   : > { %v563_v39 = vpop.f32.mrf.mxu0 }
 0x215   : > { %v564_v41 = vadd.f32 %v1549_v38, %v563_v39 }
 0x216   : > { %v1641_v40 = vpop.f32.mrf.mxu0 }
 0x217   : > { %v576_v45 = vmul.f32 0.35355338, %v564_v41 }
 0x218   : > { %v566_v42 = vpop.f32.mrf.mxu0 }
 0x219   : > { %v567_v43 = vadd.f32 %v1549_v38, %v566_v42 }
 0x21a   : > { %v1642_v44 = vpop.f32.mrf.mxu0 }
 0x21b   : > { %v577_v46 = vmul.f32 0.35355338, %v567_v43 }
 0x21d   : > { %v2103_v47 = vpack.c.bf16 %v577_v46, %v576_v45 }
 0x21f   : > { %1648 = vmatmul.mubr.msk.bf16.vlgmr.msra.gmra.mxu1 %vm587_vm2, %v2103_v47 }
 0x220   : > { %1671 = vmatprep.mubr.msk.bf16.mxu1 %vm1915_vm1, %v1914_v15 }
 0x2df   : > { %v631_v48 = vpop.f32.mrf.mxu1 }
 0x2e0   : > { %v639_v49 = vsel %vm638_vm3, %v631_v48, -inf }
 0x2e1   : > { %640 = vmax.xlane.f32.xlu0 %v639_v49  ;;  %v1649_v50 = vpop.f32.mrf.mxu1 }
 0x2e3   : > { %v634_v51 = vpop.f32.mrf.mxu1 }
 0x2e4   : > { %v642_v52 = vsel %vm638_vm3, %v634_v51, -inf }
 0x2e5   : > { %643 = vmax.xlane.f32.xlu1 %v642_v52  ;;  %v1650_v53 = vpop.f32.mrf.mxu1 }
 0x36a   : > { %v641_v54 = vpop.xlane.xlu0 %640 }
 0x36b   : > { %v645_v55 = vsub.f32 %v631_v48, %v641_v54 }
 0x36d   : > { %v647_v56 = vmul.f32 1.442695, %v645_v55 }
 0x36e   : > { %v644_v57 = vpop.xlane.xlu1 %643 }
 0x36f   : > { %1804 = vpow2.f32 %v647_v56  ;;  %v646_v58 = vsub.f32 %v634_v51, %v644_v57 }
 0x371   : > { %v649_v59 = vmul.f32 1.442695, %v646_v58 }
 0x373   : > { %1806 = vpow2.f32 %v649_v59 }
 0x37c   : > { %v1805_v60 = vpop.eup %1804 }
 0x37d   : > { %v651_v61 = vsel %vm638_vm3, %v1805_v60, 0.0 }
 0x37e   : > { %652 = vadd.xlane.f32.xlu0 %v651_v61 }
 0x380   : > { %v1807_v62 = vpop.eup %1806 }
 0x381   : > { %v654_v63 = vsel %vm638_vm3, %v1807_v62, 0.0 }
 0x382   : > { %655 = vadd.xlane.f32.xlu1 %v654_v63 }
 0x393   : > { %734 = vrot.lane.b32.xlu1 %v2095_v36, %s1916_s22 }
 0x394   : > { %736 = vrot.lane.b32.xlu0 %v2080_v17, %s1916_s22 }
 0x397   : > { %732 = vrot.lane.b32.xlu1 %v2103_v47, %s1916_s22 }
 0x407   : > { %v653_v5 = vpop.xlane.xlu0 %652 }
 0x408   : > { %1808 = vrcp.f32 %v653_v5 }
 0x40b   : > { %v656_v6 = vpop.xlane.xlu1 %655  ;;  %v737_v11 = vpop.permute.xlu0 %736 }
 0x40c   : > { %1810 = vrcp.f32 %v656_v6  ;;  %v745_v13 = vsel %vm587_vm2, %v737_v11, 0 }
 0x40f   : > { %v735_v18 = vpop.permute.xlu1 %734 }
 0x410   : > { %v742_v19 = vsel %vm587_vm2, %v735_v18, 0 }
 0x413   : > { %v733_v20 = vpop.permute.xlu1 %732 }
 0x415   : > { %v1809_v7 = vpop.eup %1808 }
 0x416   : > { %v659_v8 = vmul.f32 %v1809_v7, %v1805_v60 }
 0x418   : > { %v1591_v9 = vpack.c.bf16 %v659_v8, %v659_v8 }
 0x419   : > { %v1811_v10 = vpop.eup %1810 }
 0x41a   : > { %v660_v12 = vmul.f32 %v1811_v10, %v1807_v62  ;;  %670 = vst.msk [vmem:[%s2133_s17] sm:$0xf] %vm669_vm5, %v1591_v9 }
 0x41c   : > { %v661_v14 = vpack.c.bf16 %v660_v12, %v659_v8  ;;  %v1592_v16 = vpack.c.bf16 %v660_v12, %v660_v12 }
 0x41e   : > { %671 = vst.msk [vmem:[%s2133_s17 + $0x4] sm:$0xf] %vm669_vm5, %v1592_v16  ;;  %1656 = vmatmul.mubr.msk.bf16.vlgmr.msra.gmra.mxu0 %vm638_vm3, %v661_v14 }
 0x41f   : > { %1660 = vmatpush3.bf16.xpose.msra.mxu0 %v745_v13  ;;  %1663 = vmatprep.mubr.msk.bf16.mxu0 %vm1915_vm1, %v1914_v15 }
 0x420   : > { %1661 = vmatprep.subr.bf16.mxu0 %v1914_v15 }
 0x427   : > { %1662 = vmatpush3.bf16.xpose.msra.mxu0 %v742_v19 }
 0x428   : > { %1681 = vmatprep.subr.bf16.mxu0 %v1914_v15 }
 0x42e   : > { %1664 = vmatmul.mubr.msk.bf16.vlgmr.msra.gmra.mxu0 %vm587_vm2, %v733_v20 }
 0x42f   : > { %1683 = vmatprep.mubr.msk.bf16.mxu0 %vm1915_vm1, %v1914_v15  ;;  %1682 = vmatpush3.bf16.msra.mxu0 %v926_v22 }
 0x430   : > { %1695 = vmatprep.subr.bf16.mxu0 %v1914_v15 }
 0x4de   : > { %v722_v23 = vpop.f32.mrf.mxu0 }
 0x4e0   : > { %v1657_v24 = vpop.f32.mrf.mxu0 }
 0x4e2   : > { %v725_v25 = vpop.f32.mrf.mxu0 }
 0x4e3   : > { %v729_v26 = vpack.c.bf16 %v725_v25, %v722_v23 }
 0x4e4   : > { %v1658_v27 = vpop.f32.mrf.mxu0 }
 0x4e5   : > { %1684 = vmatmul.mubr.msk.bf16.vlgmr.msra.gmra.mxu0 %vm587_vm2, %v729_v26 }
 0x4e6   : > { %1699 = vmatprep.mubr.msk.bf16.mxu0 %vm1915_vm1, %v1914_v15 }
 0x4ee   : > { %v781_v28 = vpop.f32.mrf.mxu0 }
 0x4ef   : > { %v788_v29 = vsel %vm638_vm3, %v781_v28, -inf }
 0x4f0   : > { %789 = vmax.xlane.f32.xlu1 %v788_v29  ;;  %v1665_v30 = vpop.f32.mrf.mxu0 }
 0x4f2   : > { %v784_v31 = vpop.f32.mrf.mxu0 }
 0x4f3   : > { %v791_v32 = vsel %vm638_vm3, %v784_v31, -inf }
 0x4f4   : > { %792 = vmax.xlane.f32.xlu0 %v791_v32  ;;  %v1666_v33 = vpop.f32.mrf.mxu0 }
 0x501   : > { %823 = vrot.lane.b32.xlu1 %v2116_v2, %s1916_s22 }
 0x505   : > { %973 = vrot.lane.b32.xlu1 %v2080_v17, %s1917_s20 }
 0x509   : > { %971 = vrot.lane.b32.xlu1 %v2095_v36, %s1917_s20 }
 0x50d   : > { %969 = vrot.lane.b32.xlu1 %v2103_v47, %s1917_s20 }
 0x511   : > { %1163 = vrot.lane.b32.xlu1 %v2095_v36, %s1918_s24 }
 0x579   : > { %v790_v34 = vpop.xlane.xlu1 %789 }
 0x57a   : > { %v794_v35 = vsub.f32 %v781_v28, %v790_v34 }
 0x57c   : > { %v796_v37 = vmul.f32 1.442695, %v794_v35 }
 0x57d   : > { %v824_v38 = vpop.permute.xlu1 %823  ;;  %v793_v39 = vpop.xlane.xlu0 %792 }
 0x57e   : > { %1812 = vpow2.f32 %v796_v37  ;;  %v830_v40 = vsel %vm684_vm4, %v824_v38, 0  ;;  %v795_v41 = vsub.f32 %v784_v31, %v793_v39 }
 0x57f   : > { %1668 = vmatpush3.bf16.msra.mxu1 %v830_v40 }
 0x580   : > { %v798_v42 = vmul.f32 1.442695, %v795_v41  ;;  %1669 = vmatprep.subr.bf16.mxu1 %v1914_v15 }
 0x581   : > { %v974_v63 = vpop.permute.xlu1 %973 }
 0x582   : > { %1814 = vpow2.f32 %v798_v42  ;;  %v982_v5 = vsel %vm587_vm2, %v974_v63, 0 }
 0x585   : > { %v972_v8 = vpop.permute.xlu1 %971 }
 0x586   : > { %v979_v9 = vsel %vm587_vm2, %v972_v8, 0 }
 0x589   : > { %v970_v12 = vpop.permute.xlu1 %969 }
 0x58b   : > { %v1813_v43 = vpop.eup %1812 }
 0x58c   : > { %v800_v44 = vsel %vm638_vm3, %v1813_v43, 0.0 }
 0x58d   : > { %801 = vadd.xlane.f32.xlu0 %v800_v44  ;;  %v1164_v13 = vpop.permute.xlu1 %1163 }
 0x58e   : > { %v1171_v14 = vsel %vm587_vm2, %v1164_v13, 0 }
 0x58f   : > { %v1815_v45 = vpop.eup %1814 }
 0x590   : > { %v803_v36 = vsel %vm638_vm3, %v1815_v45, 0.0 }
 0x591   : > { %804 = vadd.xlane.f32.xlu0 %v803_v36 }
 0x5a5   : > { %v2173_v46 = vpop.f32.mrf.mxu0 }
 0x5a7   : > { %821 = vrot.lane.b32.xlu0 %v2123_v4, %s1916_s22  ;;  %v1685_v48 = vpop.f32.mrf.mxu0 }
 0x5a9   : > { %v2177_v49 = vpop.f32.mrf.mxu0 }
 0x5ab   : > { %1165 = vrot.lane.b32.xlu0 %v2080_v17, %s1918_s24  ;;  %v1686_v50 = vpop.f32.mrf.mxu0  ;;  %v874_v17 = vld [vmem:[%s2342_s7 + $0x4] sm:$0xf] }
 0x5ac   : > { %v879_v60 = vsel %vm684_vm4, %v874_v17, 0 }
 0x5af   : > { %1161 = vrot.lane.b32.xlu0 %v2103_v47, %s1918_s24 }
 0x616   : > { %v802_v51 = vpop.xlane.xlu0 %801 }
 0x617   : > { %1816 = vrcp.f32 %v802_v51 }
 0x61a   : > { %v805_v52 = vpop.xlane.xlu0 %804 }
 0x61b   : > { %1818 = vrcp.f32 %v805_v52 }
 0x61e   : > { %v822_v53 = vpop.permute.xlu0 %821 }
 0x61f   : > { %1670 = vmatpush3.bf16.msra.mxu1 %v822_v53 }
 0x620   : > { %1675 = vmatprep.subr.bf16.mxu1 %v1914_v15 }
 0x622   : > { %v1166_v10 = vpop.permute.xlu0 %1165 }
 0x623   : > { %v1174_v11 = vsel %vm587_vm2, %v1166_v10, 0  ;;  %v1111_v10 = vld [vmem:[%s2342_s7 + $0x8] sm:$0xf] }
 0x624   : > { %v1817_v54 = vpop.eup %1816 }
 0x625   : > { %v808_v55 = vmul.f32 %v1817_v54, %v1813_v43 }
 0x626   : > { %v1162_v16 = vpop.permute.xlu0 %1161 }
 0x627   : > { %v1593_v56 = vpack.c.bf16 %v808_v55, %v808_v55 }
 0x628   : > { %v1819_v57 = vpop.eup %1818 }
 0x629   : > { %v809_v58 = vmul.f32 %v1819_v57, %v1815_v45  ;;  %1564 = vst.msk [vmem:[%s2133_s17 + $0x8] sm:$0xf] %vm669_vm5, %v1593_v56 }
 0x62b   : > { %v810_v47 = vpack.c.bf16 %v809_v58, %v808_v55  ;;  %v1594_v59 = vpack.c.bf16 %v809_v58, %v809_v58 }
 0x62d   : > { %1565 = vst.msk [vmem:[%s2133_s17 + $0xc] sm:$0xf] %vm669_vm5, %v1594_v59  ;;  %1672 = vmatmul.mubr.msk.bf16.vlgmr.msra.gmra.mxu1 %vm638_vm3, %v810_v47 }
 0x62e   : > { %1676 = vmatpush3.bf16.msra.mxu1 %v879_v60  ;;  %1677 = vmatprep.mubr.msk.bf16.mxu1 %vm1915_vm1, %v1914_v15 }
 0x62f   : > { %1687 = vmatprep.subr.bf16.mxu1 %v1914_v15 }
 0x6ed   : > { %v866_v61 = vpop.f32.mrf.mxu1 }
 0x6ef   : > { %v1673_v62 = vpop.f32.mrf.mxu1 }
 0x6f1   : > { %v869_v3 = vpop.f32.mrf.mxu1 }
 0x6f2   : > { %v873_v6 = vpack.c.bf16 %v869_v3, %v866_v61 }
 0x6f3   : > { %v1674_v7 = vpop.f32.mrf.mxu1 }
 0x6f4   : > { %1678 = vmatmul.mubr.msk.bf16.vlgmr.msra.gmra.mxu1 %vm587_vm2, %v873_v6 }
 0x6f5   : > { %1688 = vmatpush3.bf16.xpose.msra.mxu1 %v982_v5  ;;  %1691 = vmatprep.mubr.msk.bf16.mxu1 %vm1915_vm1, %v1914_v15 }
 0x6f6   : > { %1689 = vmatprep.subr.bf16.mxu1 %v1914_v15 }
 0x6fd   : > { %1690 = vmatpush3.bf16.xpose.msra.mxu1 %v979_v9 }
 0x6fe   : > { %1709 = vmatprep.subr.bf16.mxu1 %v1914_v15 }
 0x704   : > { %1692 = vmatmul.mubr.msk.bf16.vlgmr.msra.gmra.mxu1 %vm587_vm2, %v970_v12 }
 0x705   : > { %1710 = vmatpush3.bf16.xpose.msra.mxu1 %v1174_v11  ;;  %1713 = vmatprep.mubr.msk.bf16.mxu1 %vm1915_vm1, %v1914_v15  ;;  %v1116_v11 = vsel %vm684_vm4, %v1111_v10, 0 }
 0x706   : > { %1711 = vmatprep.subr.bf16.mxu1 %v1914_v15 }
 0x70d   : > { %1712 = vmatpush3.bf16.xpose.msra.mxu1 %v1171_v14 }
 0x714   : > { %1714 = vmatmul.mubr.msk.bf16.vlgmr.msra.gmra.mxu1 %vm587_vm2, %v1162_v16 }
 0x7b4   : > { %v2210_v18 = vpop.f32.mrf.mxu1 }
 0x7b6   : > { %v1679_v19 = vpop.f32.mrf.mxu1 }
 0x7b8   : > { %v2212_v20 = vpop.f32.mrf.mxu1 }
 0x7ba   : > { %v1680_v21 = vpop.f32.mrf.mxu1 }
 0x7c4   : > { %v1018_v22 = vpop.f32.mrf.mxu1 }
 0x7c5   : > { %v1025_v23 = vsel %vm638_vm3, %v1018_v22, -inf }
 0x7c6   : > { %1026 = vmax.xlane.f32.xlu1 %v1025_v23  ;;  %v1693_v24 = vpop.f32.mrf.mxu1 }
 0x7c8   : > { %v1021_v25 = vpop.f32.mrf.mxu1 }
 0x7c9   : > { %v1028_v26 = vsel %vm638_vm3, %v1021_v25, -inf }
 0x7ca   : > { %1029 = vmax.xlane.f32.xlu0 %v1028_v26  ;;  %v1694_v27 = vpop.f32.mrf.mxu1 }
 0x7d4   : > { %v1210_v28 = vpop.f32.mrf.mxu1 }
 0x7d5   : > { %v1217_v32 = vsel %vm638_vm3, %v1210_v28, -inf }
 0x7d6   : > { %v1715_v29 = vpop.f32.mrf.mxu1 }
 0x7d7   : > { %1060 = vrot.lane.b32.xlu1 %v2116_v2, %s1917_s20 }
 0x7d8   : > { %v1213_v30 = vpop.f32.mrf.mxu1 }
 0x7d9   : > { %v1220_v53 = vsel %vm638_vm3, %v1213_v30, -inf }
 0x7da   : > { %v1716_v31 = vpop.f32.mrf.mxu1 }
 0x7fb   : > { %1218 = vmax.xlane.f32.xlu1 %v1217_v32 }
 0x84f   : > { %v1027_v33 = vpop.xlane.xlu1 %1026 }
 0x850   : > { %v1031_v34 = vsub.f32 %v1018_v22, %v1027_v33 }
 0x852   : > { %v1033_v35 = vmul.f32 1.442695, %v1031_v34  ;;  %v966_v34 = vadd.f32 %v2177_v49, %v2212_v20 }
 0x853   : > { %v1030_v37 = vpop.xlane.xlu0 %1029  ;;  %v1061_v38 = vpop.permute.xlu1 %1060 }
 0x854   : > { %1820 = vpow2.f32 %v1033_v35  ;;  %v1032_v39 = vsub.f32 %v1021_v25, %v1030_v37  ;;  %v1067_v40 = vsel %vm684_vm4, %v1061_v38, 0 }
 0x855   : > { %1696 = vmatpush3.bf16.msra.mxu0 %v1067_v40 }
 0x856   : > { %v1035_v41 = vmul.f32 1.442695, %v1032_v39  ;;  %1697 = vmatprep.subr.bf16.mxu0 %v1914_v15 }
 0x858   : > { %1822 = vpow2.f32 %v1035_v41 }
 0x861   : > { %v1821_v42 = vpop.eup %1820 }
 0x862   : > { %v1037_v43 = vsel %vm638_vm3, %v1821_v42, 0.0 }
 0x863   : > { %1038 = vadd.xlane.f32.xlu0 %v1037_v43 }
 0x865   : > { %v1823_v44 = vpop.eup %1822 }
 0x866   : > { %v1040_v45 = vsel %vm638_vm3, %v1823_v44, 0.0 }
 0x867   : > { %1041 = vadd.xlane.f32.xlu0 %v1040_v45 }
 0x87d   : > { %1058 = vrot.lane.b32.xlu0 %v2123_v4, %s1917_s20  ;;  %s1599_s20 = sshll.u32 %s1904_s16, 9  ;;  %s1919_s16 = smov [#allocation2]  }
 0x87e   : > { %s2272_s22 = scalar_lea.hbm %s2345_s10, %s1599_s20 }
 0x884   : > { %v1219_v36 = vpop.xlane.xlu1 %1218 }
 0x885   : > { %v1223_v48 = vsub.f32 %v1210_v28, %v1219_v36  ;;  %v1303_v28 = vld [vmem:[%s2342_s7 + $0xc] sm:$0xf] }
 0x886   : > { %v1308_v29 = vsel %vm684_vm4, %v1303_v28, 0 }
 0x887   : > { %v1225_v50 = vmul.f32 1.442695, %v1223_v48 }
 0x889   : > { %1824 = vpow2.f32 %v1225_v50 }
 0x896   : > { %v1825_v51 = vpop.eup %1824 }
 0x897   : > { %v1229_v52 = vsel %vm638_vm3, %v1825_v51, 0.0 }
 0x898   : > { %1230 = vadd.xlane.f32.xlu1 %v1229_v52 }
 0x89c   : > { %1221 = vmax.xlane.f32.xlu0 %v1220_v53 }
 0x8a9   : > { %1252 = vrot.lane.b32.xlu1 %v2116_v2, %s1918_s24 }
 0x8ec   : > { %v1039_v54 = vpop.xlane.xlu0 %1038 }
 0x8ed   : > { %1826 = vrcp.f32 %v1039_v54 }
 0x8f0   : > { %v1042_v55 = vpop.xlane.xlu0 %1041 }
 0x8f1   : > { %1828 = vrcp.f32 %v1042_v55 }
 0x8f4   : > { %v1059_v56 = vpop.permute.xlu0 %1058 }
 0x8f5   : > { %1698 = vmatpush3.bf16.msra.mxu0 %v1059_v56 }
 0x8f6   : > { %1703 = vmatprep.subr.bf16.mxu0 %v1914_v15 }
 0x8fa   : > { %v1827_v57 = vpop.eup %1826 }
 0x8fb   : > { %v1045_v17 = vmul.f32 %v1827_v57, %v1821_v42 }
 0x8fd   : > { %v1595_v58 = vpack.c.bf16 %v1045_v17, %v1045_v17 }
 0x8fe   : > { %v1829_v47 = vpop.eup %1828 }
 0x8ff   : > { %v1046_v59 = vmul.f32 %v1829_v47, %v1823_v44  ;;  %1572 = vst.msk [vmem:[%s2133_s17 + $0x10] sm:$0xf] %vm669_vm5, %v1595_v58 }
 0x901   : > { %v1047_v60 = vpack.c.bf16 %v1046_v59, %v1045_v17  ;;  %v1596_v61 = vpack.c.bf16 %v1046_v59, %v1046_v59 }
 0x903   : > { %1573 = vst.msk [vmem:[%s2133_s17 + $0x14] sm:$0xf] %vm669_vm5, %v1596_v61  ;;  %1700 = vmatmul.mubr.msk.bf16.vlgmr.msra.gmra.mxu0 %vm638_vm3, %v1047_v60 }
 0x904   : > { %1705 = vmatprep.mubr.msk.bf16.mxu0 %vm1915_vm1, %v1914_v15  ;;  %1704 = vmatpush3.bf16.msra.mxu0 %v1116_v11 }
 0x905   : > { %1717 = vmatprep.subr.bf16.mxu0 %v1914_v15 }
 0x921   : > { %v1231_v2 = vpop.xlane.xlu1 %1230 }
 0x922   : > { %1830 = vrcp.f32 %v1231_v2 }
 0x925   : > { %v1222_v62 = vpop.xlane.xlu0 %1221  ;;  %v1253_v16 = vpop.permute.xlu1 %1252 }
 0x926   : > { %v1224_v63 = vsub.f32 %v1213_v30, %v1222_v62  ;;  %v1259_v22 = vsel %vm684_vm4, %v1253_v16, 0  ;;  %v963_v30 = vadd.f32 %v2173_v46, %v2210_v18 }
 0x928   : > { %v1227_v3 = vmul.f32 1.442695, %v1224_v63 }
 0x92a   : > { %1832 = vpow2.f32 %v1227_v3 }
 0x92f   : > { %v1831_v5 = vpop.eup %1830 }
 0x930   : > { %v1237_v6 = vmul.f32 %v1831_v5, %v1825_v51 }
 0x932   : > { %v1597_v7 = vpack.c.bf16 %v1237_v6, %v1237_v6 }
 0x934   : > { %1579 = vst.msk [vmem:[%s2133_s17 + $0x18] sm:$0xf] %vm669_vm5, %v1597_v7 }
 0x937   : > { %v1833_v8 = vpop.eup %1832 }
 0x938   : > { %v1232_v9 = vsel %vm638_vm3, %v1833_v8, 0.0 }
 0x939   : > { %1233 = vadd.xlane.f32.xlu0 %v1232_v9 }
 0x94f   : > { %1250 = vrot.lane.b32.xlu0 %v2123_v4, %s1918_s24  ;;  %s1395_s24 = sshll.u32 %s2133_s17, 4  ;;  %s2274_s24 = int_to_ptr.vmem [resolvable:$true] %s1395_s24 }
 0x950   : > { %s1836_s12 = scalar_lea.vmem %s2274_s24, 512 }
 0x951   : > { %p1837_p12 = scmp.ne.s32.totalorder %s2274_s24, %s1836_s12 }
 0x953   : > { %p1838_p13 = pnand %p1837_p12, %p2017_p4 }
 0x955   : > { %p1839_p0 = pneg %p1838_p13 }
 0x9c2   : > { %v1234_v12 = vpop.xlane.xlu0 %1233 }
 0x9c3   : > { %1834 = vrcp.f32 %v1234_v12  ;;  %v1103_v13 = vpop.f32.mrf.mxu0 }
 0x9c5   : > { %v1701_v14 = vpop.f32.mrf.mxu0 }
 0x9c6   : > { %v1251_v24 = vpop.permute.xlu0 %1250 }
 0x9c7   : > { %v1106_v19 = vpop.f32.mrf.mxu0 }
 0x9c8   : > { %v1110_v21 = vpack.c.bf16 %v1106_v19, %v1103_v13 }
 0x9c9   : > { %v1702_v23 = vpop.f32.mrf.mxu0 }
 0x9ca   : > { %1706 = vmatmul.mubr.msk.bf16.vlgmr.msra.gmra.mxu0 %vm587_vm2, %v1110_v21 }
 0x9cb   : > { %1718 = vmatpush3.bf16.msra.mxu0 %v1259_v22  ;;  %1721 = vmatprep.mubr.msk.bf16.mxu0 %vm1915_vm1, %v1914_v15 }
 0x9cc   : > { %1719 = vmatprep.subr.bf16.mxu0 %v1914_v15 }
 0x9cf   : > { %1720 = vmatpush3.bf16.msra.mxu0 %v1251_v24 }
 0x9d0   : > { %v1835_v4 = vpop.eup %1834  ;;  %1725 = vmatprep.subr.bf16.mxu0 %v1914_v15 }
 0x9d1   : > { %v1238_v25 = vmul.f32 %v1835_v4, %v1833_v8 }
 0x9d3   : > { %v1239_v26 = vpack.c.bf16 %v1238_v25, %v1237_v6  ;;  %v1598_v27 = vpack.c.bf16 %v1238_v25, %v1238_v25 }
 0x9d5   : > { %1580 = vst.msk [vmem:[%s2133_s17 + $0x1c] sm:$0xf] %vm669_vm5, %v1598_v27  ;;  %1722 = vmatmul.mubr.msk.bf16.vlgmr.msra.gmra.mxu0 %vm638_vm3, %v1239_v26  ;;  %s1840_s17 = sshll.u32 %s1919_s16, 4  ;;  %s1841_s17 = int_to_ptr.vmem [resolvable:$false] %s1840_s17 }
 0x9d6   : > { %1727 = vmatprep.mubr.msk.bf16.mxu0 %vm1915_vm1, %v1914_v15  ;;  %1726 = vmatpush3.bf16.msra.mxu0 %v1308_v29  ;;  %s1842_s19 = scalar_lea.vmem %s1841_s17, 1024  ;;  %p1843_p1 = scmp.lt.s32.totalorder %s2274_s24, %s1841_s17 }
 0x9d7   : > { %p1844_p2 = scmp.lt.s32.totalorder %s1842_s19, %s1836_s12 }
 0x9d9   : > { %p1845_p3 = por %p1844_p2, %p1843_p1 }
 0x9db   : > { %p1846_p5 = pnand %p1845_p3, %p1839_p0 }
 0xa8a   : > { %v1152_v31 = vpop.f32.mrf.mxu0 }
 0xa8b   : > { %v1159_v32 = vadd.f32 %v1152_v31, %v963_v30 }
 0xa8c   : > { %v1707_v33 = vpop.f32.mrf.mxu0 }
 0xa8e   : > { %v1155_v15 = vpop.f32.mrf.mxu0 }
 0xa8f   : > { %v1160_v35 = vadd.f32 %v1155_v15, %v966_v34 }
 0xa90   : > { %v1708_v37 = vpop.f32.mrf.mxu0 }
 0xa95   : > { %v1295_v38 = vpop.f32.mrf.mxu0 }
 0xa97   : > { %v1723_v39 = vpop.f32.mrf.mxu0 }
 0xa99   : > { %v1298_v40 = vpop.f32.mrf.mxu0 }
 0xa9a   : > { %v1302_v41 = vpack.c.bf16 %v1298_v40, %v1295_v38 }
 0xa9b   : > { %v1724_v42 = vpop.f32.mrf.mxu0 }
 0xa9c   : > { %1728 = vmatmul.mubr.msk.bf16.vlgmr.msra.gmra.mxu0 %vm587_vm2, %v1302_v41 }
 0xa9d   : > { %1849 = shalt.err (!%p1846_p5)
}
 0xa9e   : > { %s1850_s30 = scalar_lea.hbm %s2272_s22, 512  ;;  %s1854_s29 = scalar_lea.hbm %s2345_s10, 1024 }
 0xa9f   : > { %p1851_p6 = scmp.ne.s32.totalorder %s2272_s22, %s1850_s30  ;;  %p1855_p10 = scmp.lt.s32.totalorder %s2272_s22, %s2345_s10 }
 0xaa0   : > { %p1856_p11 = scmp.lt.s32.totalorder %s1854_s29, %s1850_s30 }
 0xaa1   : > { %p1852_p7 = pnand %p1851_p6, %p2017_p4 }
 0xaa2   : > { %p1857_p12 = por %p1856_p11, %p1855_p10 }
 0xaa3   : > { %p1853_p9 = pneg %p1852_p7 }
 0xaa5   : > { %p1858_p13 = pnand %p1857_p12, %p1853_p9 }
 0xaa7   : > { %1861 = shalt.err (!%p1858_p13)
}
 0xaa8   : > { %s1920_s12 = smov 64   ;;  %s1921_s17 = smov 4   ;;  %v1583_v18 = vld [vmem:[%s2343_s8] ss:$0 sm:$0xff] }
 0xaa9   : > { %1732 = dma.vmem_to_hbm [thread:$0]  (%p2017_p4), %s2274_s24, 512, %s2272_s22, %s2278_s11, %s1920_s12, %s1920_s12, %s1921_s17  }
 0xaaa   : > { %s2353_s28 = sshll.u32 %s2034_s27, 4 }
 0xaab   : > { %s450_s29 = scalar_lea.vmem %s2344_s9, %s2353_s28 }
 0xb5c   : > { %v1344_v46 = vpop.f32.mrf.mxu0 }
 0xb5d   : > { %v1351_v49 = vadd.f32 %v1344_v46, %v1159_v32 }
 0xb5e   : > { %v1729_v20 = vpop.f32.mrf.mxu0 }
 0xb5f   : > { %v1353_v43 = vadd.f32 %v1351_v49, %v2048_v0 }
 0xb60   : > { %v1347_v44 = vpop.f32.mrf.mxu0 }
 0xb61   : > { %v1362_v45 = vadd.f32 %v1583_v18, %v1353_v43  ;;  %v1352_v36 = vadd.f32 %v1347_v44, %v1160_v35 }
 0xb62   : > { %v1730_v48 = vpop.f32.mrf.mxu0 }
 0xb63   : > { %1364 = vst.msk [vmem:[%s450_s29] sm:$0xff] %vm458_vm0, %v1362_v45  ;;  %v1354_v50 = vadd.f32 %v1352_v36, %v2050_v1 }
 0xb65   : > { %v1363_v51 = vadd.f32 %v1583_v18, %v1354_v50 }
 0xb67   : > { %1365 = vst.msk [vmem:[%s450_s29 + $0x8] sm:$0xff] %vm458_vm0, %v1363_v51 }
 0xb68 PF: > { %p1738_p4 = scmp.ge.s32.totalorder %s1912_s18, 2  ;;  %s1422_s23 = sand.u32 1, %s1892_s13  }
 0xb69   : > { %s1423_s27 = scalar_lea.sflag [#allocation3], %s1422_s23 }
 0xb6a   : > { %p1735_p0 = pnand %p1738_p4, %p2024_p8 }
 0xb6c   : > { %p1736_p1 = pneg %p1735_p0 }
 0xb6e   : > { %1887 = dma.done.wait (%p1736_p1), %s1423_s27, 512  }
 0xb6f   : > { %1889 = vsyncadd (%p1736_p1), %s1423_s27, 4294966784  ;;  %s24_s18 = sadd.s32 1, %s1912_s18   ;;  %s2354_s16 = sld [smem:[#allocation5_spill]] }
 0xb70   : > { %p21_p2 = scmp.ge.s32.totalorder %s24_s18, 4   ;;  %s2355_s17 = sld [smem:[#allocation6_spill]] }
 0xb71   : > { %s2356_s13 = smov %s1896_s14  ;;  %s2357_s14 = smov %s1900_s15 }
 0xb72   : > { %s2358_s15 = smov %s2030_s26  ;;  %23 = sbr.rel (!%p21_p2) target bundleno = 4 (0x4), region = 112 }
 0xb77   :  { %1428 = vsyncpa [#allocation3], 1 }
 0xb78   :  { %1430 = vsyncpa [#allocation3 + $0x1], 1 }

// kernel: cross_conformer_block.13
= control target key start
LH: loop header
LB: loop body
LE: loop exit
PB: predicated region body
PF: predicated region fallthrough
CT: control target
= control target key end

     0   :  { %vm40_vm0 = vcmask 261120   ;;  %s731_s0 = inlined_call_operand.vmem [shape: f32[32,32], index: 0, kind: input, shape index: {}]   ;;  %s732_s1 = inlined_call_operand.vmem [shape: f32[1,32], index: 1, kind: input, shape index: {}]   ;;  %s733_s2 = inlined_call_operand.vmem [shape: f32[1,32], index: 2, kind: input, shape index: {}]   ;;  %s734_s3 = inlined_call_operand.vmem [shape: bf16[32,128], index: 3, kind: input, shape index: {}]   ;;  %s735_s4 = inlined_call_operand.vmem [shape: f32[1,128], index: 4, kind: input, shape index: {}]   ;;  %s736_s5 = inlined_call_operand.vmem [shape: bf16[128,32], index: 5, kind: input, shape index: {}]   ;;  %s737_s6 = inlined_call_operand.vmem [shape: f32[1,32], index: 6, kind: input, shape index: {}]   ;;  %s738_s7 = inlined_call_operand.vmem [shape: f32[1,32], index: 7, kind: input, shape index: {}]   ;;  %s739_s8 = inlined_call_operand.vmem [shape: f32[1,32], index: 8, kind: input, shape index: {}]   ;;  %s740_s9 = inlined_call_operand.hbm [shape: f32[32,32], index: 9, kind: output, shape index: {}]  }
   0x1   :  { %v629_v0 = vld [vmem:[%s731_s0] sm:$0xff]  ;;  %v634_v1 = vld [vmem:[%s731_s0 + $0x10] sm:$0xff]  ;;  %v639_v2 = vld [vmem:[%s731_s0 + $0x8] sm:$0xff] }
   0x2   :  { %v41_v3 = vsel %vm40_vm0, %v629_v0, 0.0  ;;  %v47_v4 = vsel %vm40_vm0, %v634_v1, 0.0  ;;  %v648_v5 = vld [vmem:[%s731_s0 + $0x18] sm:$0xff]  ;;  %v44_v6 = vsel %vm40_vm0, %v639_v2, 0.0 }
   0x3   :  { %42 = vadd.xlane.f32.xlu0 %v41_v3  ;;  %48 = vadd.xlane.f32.xlu1 %v47_v4  ;;  %v50_v7 = vsel %vm40_vm0, %v648_v5, 0.0 }
   0x7   :  { %45 = vadd.xlane.f32.xlu0 %v44_v6  ;;  %51 = vadd.xlane.f32.xlu1 %v50_v7 }
   0x8   :  { %14 = vsyncpa [#allocation3], 0  ;;  %v509_v28 = vld [vmem:[%s734_s3 + $0x8] sm:$0xff]   ;;  %v510_v29 = vld [vmem:[%s734_s3] sm:$0xff]  }
   0x9   :  { %478 = vmatprep.subr.bf16.mxu0 %v509_v28  ;;  %v446_v44 = vld [vmem:[%s732_s1] ss:$0 sm:$0xff]  ;;  %v511_v62 = vld [vmem:[%s736_s5 + $0x38] sm:$0xff]   ;;  %v512_v63 = vld [vmem:[%s736_s5 + $0x30] sm:$0xff]  }
   0xa   :  { %479 = vmatpush3.bf16.msra.mxu0 %v509_v28  ;;  %v447_v49 = vld [vmem:[%s733_s2] ss:$0 sm:$0xff]  ;;  %486 = vmatprep.subr.bf16.mxu1 %v511_v62  ;;  %v513_v3 = vld [vmem:[%s736_s5 + $0x28] sm:$0xff]   ;;  %v515_v6 = vld [vmem:[%s736_s5 + $0x18] sm:$0xff]  }
   0xb   :  { %480 = vmatprep.subr.bf16.mxu0 %v510_v29  ;;  %487 = vmatpush3.bf16.msra.mxu1 %v511_v62  ;;  %v514_v4 = vld [vmem:[%s736_s5 + $0x20] sm:$0xff]   ;;  %v516_v7 = vld [vmem:[%s736_s5 + $0x10] sm:$0xff]  }
   0xc   :  { %488 = vmatprep.subr.bf16.mxu1 %v512_v63 }
   0xe   :  { %481 = vmatpush3.bf16.msra.mxu0 %v510_v29 }
   0xf   :  { %489 = vmatpush3.bf16.msra.mxu1 %v512_v63 }
  0x10   :  { %490 = vmatprep.subr.bf16.mxu1 %v513_v3 }
  0x13   :  { %491 = vmatpush3.bf16.msra.mxu1 %v513_v3 }
  0x14   :  { %492 = vmatprep.subr.bf16.mxu1 %v514_v4 }
  0x17   :  { %493 = vmatpush3.bf16.msra.mxu1 %v514_v4 }
  0x18   :  { %494 = vmatprep.subr.bf16.mxu1 %v515_v6 }
  0x1b   :  { %495 = vmatpush3.bf16.msra.mxu1 %v515_v6 }
  0x1c   :  { %496 = vmatprep.subr.bf16.mxu1 %v516_v7 }
  0x1f   :  { %497 = vmatpush3.bf16.msra.mxu1 %v516_v7 }
  0x8c   :  { %v43_v8 = vpop.xlane.xlu0 %42  ;;  %v49_v9 = vpop.xlane.xlu1 %48 }
  0x8d   :  { %v54_v10 = vmul.f32 0.03125, %v43_v8  ;;  %v56_v11 = vmul.f32 0.03125, %v49_v9  ;;  %v517_v8 = vld [vmem:[%s736_s5 + $0x8] sm:$0xff]   ;;  %v518_v9 = vld [vmem:[%s736_s5] sm:$0xff]  }
  0x8e   :  { %498 = vmatprep.subr.bf16.mxu1 %v517_v8 }
  0x8f   :  { %v58_v12 = vsub.f32 %v629_v0, %v54_v10  ;;  %v60_v13 = vsub.f32 %v634_v1, %v56_v11  ;;  %499 = vmatpush3.bf16.msra.mxu1 %v517_v8  ;;  %v448_v10 = vld [vmem:[%s735_s4] ss:$0 sm:$0xff] }
  0x90   :  { %v46_v14 = vpop.xlane.xlu0 %45  ;;  %v52_v15 = vpop.xlane.xlu1 %51  ;;  %500 = vmatprep.subr.bf16.mxu1 %v518_v9 }
  0x91   :  { %v55_v16 = vmul.f32 0.03125, %v46_v14  ;;  %v57_v17 = vmul.f32 0.03125, %v52_v15  ;;  %v62_v18 = vmul.f32 %v58_v12, %v58_v12  ;;  %v64_v19 = vmul.f32 %v60_v13, %v60_v13 }
  0x93   :  { %v59_v20 = vsub.f32 %v639_v2, %v55_v16  ;;  %v61_v21 = vsub.f32 %v648_v5, %v57_v17  ;;  %v66_v22 = vsel %vm40_vm0, %v62_v18, 0.0  ;;  %v72_v23 = vsel %vm40_vm0, %v64_v19, 0.0  ;;  %501 = vmatpush3.bf16.msra.mxu1 %v518_v9 }
  0x94   :  { %67 = vadd.xlane.f32.xlu0 %v66_v22 }
  0x95   :  { %v63_v24 = vmul.f32 %v59_v20, %v59_v20  ;;  %v65_v25 = vmul.f32 %v61_v21, %v61_v21 }
  0x97   :  { %v69_v26 = vsel %vm40_vm0, %v63_v24, 0.0  ;;  %v75_v27 = vsel %vm40_vm0, %v65_v25, 0.0 }
  0x98   :  { %73 = vadd.xlane.f32.xlu0 %v72_v23  ;;  %70 = vadd.xlane.f32.xlu1 %v69_v26 }
  0x9c   :  { %76 = vadd.xlane.f32.xlu1 %v75_v27 }
 0x11d   :  { %v68_v30 = vpop.xlane.xlu0 %67 }
 0x11e   :  { %v78_v31 = vmul.f32 0.03125, %v68_v30 }
 0x120   :  { %v82_v32 = vadd.f32 1e-05, %v78_v31 }
 0x121   :  { %v71_v33 = vpop.xlane.xlu1 %70  ;;  %v74_v34 = vpop.xlane.xlu0 %73 }
 0x122   :  { %519 = vrsqrt.f32 %v82_v32  ;;  %v79_v35 = vmul.f32 0.03125, %v71_v33  ;;  %v80_v36 = vmul.f32 0.03125, %v74_v34 }
 0x124   :  { %v83_v37 = vadd.f32 1e-05, %v79_v35  ;;  %v84_v38 = vadd.f32 1e-05, %v80_v36 }
 0x125   :  { %v77_v39 = vpop.xlane.xlu1 %76 }
 0x126   :  { %521 = vrsqrt.f32 %v83_v37  ;;  %v81_v40 = vmul.f32 0.03125, %v77_v39 }
 0x127   :  { %523 = vrsqrt.f32 %v84_v38 }
 0x128   :  { %v85_v41 = vadd.f32 1e-05, %v81_v40 }
 0x12a   :  { %525 = vrsqrt.f32 %v85_v41 }
 0x12f   :  { %v520_v42 = vpop.eup %519 }
 0x130   :  { %v90_v43 = vmul.f32 %v520_v42, %v58_v12 }
 0x132   :  { %v100_v48 = vmul.f32 %v446_v44, %v90_v43 }
 0x133   :  { %v522_v45 = vpop.eup %521 }
 0x134   :  { %v524_v46 = vpop.eup %523  ;;  %v91_v47 = vmul.f32 %v522_v45, %v59_v20  ;;  %v110_v53 = vadd.f32 %v447_v49, %v100_v48  ;;  %v453_v45 = vld [vmem:[%s737_s6] ss:$0 sm:$0xff] }
 0x135   :  { %v92_v50 = vmul.f32 %v524_v46, %v60_v13 }
 0x136   :  { %v101_v51 = vmul.f32 %v446_v44, %v91_v47 }
 0x137   :  { %v526_v52 = vpop.eup %525  ;;  %v102_v56 = vmul.f32 %v446_v44, %v92_v50 }
 0x138   :  { %v111_v54 = vadd.f32 %v447_v49, %v101_v51  ;;  %v93_v55 = vmul.f32 %v526_v52, %v61_v21 }
 0x139   :  { %v112_v59 = vadd.f32 %v447_v49, %v102_v56 }
 0x13a   :  { %v114_v57 = vpack.c.bf16 %v111_v54, %v110_v53  ;;  %v103_v58 = vmul.f32 %v446_v44, %v93_v55 }
 0x13c   :  { %482 = vmatprep.mubr.msk.bf16.mxu0 %vm40_vm0, %v114_v57  ;;  %v113_v60 = vadd.f32 %v447_v49, %v103_v58 }
 0x13e   :  { %v115_v61 = vpack.c.bf16 %v113_v60, %v112_v59 }
 0x140   :  { %483 = vmatmul.mubr.msk.bf16.vlgmr.msra.gmra.mxu0 %vm40_vm0, %v115_v61 }
 0x200   :  { %v484_v11 = vpop.f32.mrf.mxu0 }
 0x201   :  { %v188_v12 = vadd.f32 %v484_v11, %v448_v10 }
 0x202   :  { %v179_v13 = vpop.f32.mrf.mxu0 }
 0x203   :  { %v196_v14 = vsub.f32 0.0, %v188_v12  ;;  %v180_v15 = vadd.f32 %v448_v10, %v179_v13 }
 0x204   :  { %v485_v16 = vpop.f32.mrf.mxu0 }
 0x205   :  { %v202_v17 = vmul.f32 1.442695, %v196_v14  ;;  %v194_v18 = vsub.f32 0.0, %v180_v15  ;;  %v191_v19 = vadd.f32 %v485_v16, %v448_v10 }
 0x206   :  { %v182_v20 = vpop.f32.mrf.mxu0 }
 0x207   :  { %v198_v21 = vmul.f32 1.442695, %v194_v18  ;;  %v197_v22 = vsub.f32 0.0, %v191_v19  ;;  %v183_v23 = vadd.f32 %v448_v10, %v182_v20  ;;  %527 = vpow2.f32 %v202_v17 }
 0x209   :  { %529 = vpow2.f32 %v198_v21  ;;  %v204_v24 = vmul.f32 1.442695, %v197_v22  ;;  %v195_v25 = vsub.f32 0.0, %v183_v23 }
 0x20b   :  { %531 = vpow2.f32 %v204_v24  ;;  %v200_v26 = vmul.f32 1.442695, %v195_v25 }
 0x20d   :  { %533 = vpow2.f32 %v200_v26 }
 0x214   :  { %v528_v27 = vpop.eup %527 }
 0x215   :  { %v208_v31 = vadd.f32 1.0, %v528_v27 }
 0x216   :  { %v530_v28 = vpop.eup %529 }
 0x217   :  { %v206_v29 = vadd.f32 1.0, %v530_v28 }
 0x218   :  { %v532_v30 = vpop.eup %531 }
 0x219   :  { %v209_v32 = vadd.f32 1.0, %v532_v30  ;;  %535 = vrcp.f32 %v206_v29 }
 0x21a   :  { %v534_v33 = vpop.eup %533 }
 0x21b   :  { %537 = vrcp.f32 %v209_v32  ;;  %v207_v34 = vadd.f32 1.0, %v534_v33 }
 0x21c   :  { %539 = vrcp.f32 %v208_v31 }
 0x21d   :  { %541 = vrcp.f32 %v207_v34 }
 0x226   :  { %v536_v35 = vpop.eup %535 }
 0x227   :  { %v218_v40 = vmul.f32 %v536_v35, %v180_v15  ;;  %v462_v35 = vld [vmem:[%s738_s7] ss:$0 sm:$0xff]  ;;  %s573_s7 = smov [#allocation2]  }
 0x228   :  { %v538_v36 = vpop.eup %537  ;;  %s435_s3 = sshll.u32 %s573_s7, 4  ;;  %s436_s3 = int_to_ptr.vmem [resolvable:$true] %s435_s3 }
 0x229   :  { %v540_v37 = vpop.eup %539  ;;  %v221_v39 = vmul.f32 %v538_v36, %v191_v19  ;;  %p556_p1 = scmp.lt.s32.totalorder %s436_s3, %s436_s3 }
 0x22a   :  { %v542_v38 = vpop.eup %541  ;;  %v220_v42 = vmul.f32 %v540_v37, %v188_v12  ;;  %v463_v37 = vld [vmem:[%s739_s8] ss:$0 sm:$0xff]  ;;  %s551_s8 = scalar_lea.vmem %s436_s3, 512 }
 0x22b   :  { %v219_v41 = vmul.f32 %v542_v38, %v183_v23  ;;  %p552_p0 = scmp.ne.s32.totalorder %s436_s3, %s551_s8  ;;  %p557_p2 = scmp.lt.s32.totalorder %s551_s8, %s551_s8 }
 0x22c   :  { %v223_v44 = vpack.c.bf16 %v221_v39, %v220_v42 }
 0x22d   :  { %v222_v43 = vpack.c.bf16 %v219_v41, %v218_v40  ;;  %p558_p3 = por %p557_p2, %p556_p1 }
 0x22f   :  { %502 = vmatprep.mubr.bf16.mxu1 %v222_v43  ;;  %p559_p4 = pnand %p558_p3, %p552_p0 }
 0x230   :  { %503 = vmatmul.mubr.bf16.vlgmr.msra.gmra.mxu1 %v223_v44 }
 0x2f0   :  { %v504_v46 = vpop.f32.mrf.mxu1 }
 0x2f1   :  { %v338_v47 = vadd.f32 %v504_v46, %v453_v45 }
 0x2f2   :  { %v329_v48 = vpop.f32.mrf.mxu1 }
 0x2f3   :  { %v330_v49 = vadd.f32 %v453_v45, %v329_v48  ;;  %v346_v51 = vmul.f32 0.5, %v338_v47 }
 0x2f4   :  { %v505_v50 = vpop.f32.mrf.mxu1 }
 0x2f5   :  { %v344_v52 = vmul.f32 0.5, %v330_v49  ;;  %v341_v53 = vadd.f32 %v505_v50, %v453_v45  ;;  %v350_v60 = vadd.f32 %v346_v51, %v634_v1 }
 0x2f6   :  { %v332_v54 = vpop.f32.mrf.mxu1 }
 0x2f7   :  { %v333_v55 = vadd.f32 %v453_v45, %v332_v54  ;;  %v348_v56 = vadd.f32 %v344_v52, %v629_v0  ;;  %v347_v57 = vmul.f32 0.5, %v341_v53  ;;  %v360_v63 = vsel %vm40_vm0, %v350_v60, 0.0 }
 0x2f9   :  { %v345_v58 = vmul.f32 0.5, %v333_v55  ;;  %v354_v59 = vsel %vm40_vm0, %v348_v56, 0.0  ;;  %v351_v3 = vadd.f32 %v347_v57, %v648_v5 }
 0x2fa   :  { %355 = vadd.xlane.f32.xlu0 %v354_v59 }
 0x2fb   :  { %v349_v61 = vadd.f32 %v345_v58, %v639_v2  ;;  %v363_v4 = vsel %vm40_vm0, %v351_v3, 0.0 }
 0x2fd   :  { %v357_v62 = vsel %vm40_vm0, %v349_v61, 0.0 }
 0x2fe   :  { %358 = vadd.xlane.f32.xlu1 %v357_v62  ;;  %361 = vadd.xlane.f32.xlu0 %v360_v63 }
 0x302   :  { %364 = vadd.xlane.f32.xlu1 %v363_v4 }
 0x383   :  { %v356_v0 = vpop.xlane.xlu0 %355 }
 0x384   :  { %v366_v6 = vmul.f32 0.03125, %v356_v0 }
 0x386   :  { %v370_v7 = vsub.f32 %v348_v56, %v366_v6 }
 0x387   :  { %v359_v8 = vpop.xlane.xlu1 %358  ;;  %v362_v9 = vpop.xlane.xlu0 %361 }
 0x388   :  { %v367_v1 = vmul.f32 0.03125, %v359_v8  ;;  %v368_v10 = vmul.f32 0.03125, %v362_v9  ;;  %v374_v11 = vmul.f32 %v370_v7, %v370_v7 }
 0x38a   :  { %v371_v2 = vsub.f32 %v349_v61, %v367_v1  ;;  %v372_v12 = vsub.f32 %v350_v60, %v368_v10  ;;  %v378_v13 = vsel %vm40_vm0, %v374_v11, 0.0 }
 0x38b   :  { %v365_v14 = vpop.xlane.xlu1 %364  ;;  %379 = vadd.xlane.f32.xlu0 %v378_v13 }
 0x38c   :  { %v369_v5 = vmul.f32 0.03125, %v365_v14  ;;  %v375_v15 = vmul.f32 %v371_v2, %v371_v2  ;;  %v376_v16 = vmul.f32 %v372_v12, %v372_v12 }
 0x38e   :  { %v373_v17 = vsub.f32 %v351_v3, %v369_v5  ;;  %v381_v18 = vsel %vm40_vm0, %v375_v15, 0.0  ;;  %v384_v19 = vsel %vm40_vm0, %v376_v16, 0.0 }
 0x38f   :  { %382 = vadd.xlane.f32.xlu1 %v381_v18  ;;  %385 = vadd.xlane.f32.xlu0 %v384_v19 }
 0x390   :  { %v377_v20 = vmul.f32 %v373_v17, %v373_v17 }
 0x392   :  { %v387_v21 = vsel %vm40_vm0, %v377_v20, 0.0 }
 0x393   :  { %388 = vadd.xlane.f32.xlu1 %v387_v21 }
 0x414   :  { %v380_v22 = vpop.xlane.xlu0 %379 }
 0x415   :  { %v390_v23 = vmul.f32 0.03125, %v380_v22 }
 0x417   :  { %v394_v24 = vadd.f32 1e-05, %v390_v23 }
 0x418   :  { %v383_v25 = vpop.xlane.xlu1 %382  ;;  %v386_v26 = vpop.xlane.xlu0 %385 }
 0x419   :  { %543 = vrsqrt.f32 %v394_v24  ;;  %v391_v27 = vmul.f32 0.03125, %v383_v25  ;;  %v392_v28 = vmul.f32 0.03125, %v386_v26 }
 0x41b   :  { %v395_v29 = vadd.f32 1e-05, %v391_v27  ;;  %v396_v30 = vadd.f32 1e-05, %v392_v28 }
 0x41c   :  { %v389_v31 = vpop.xlane.xlu1 %388 }
 0x41d   :  { %545 = vrsqrt.f32 %v395_v29  ;;  %v393_v32 = vmul.f32 0.03125, %v389_v31 }
 0x41e   :  { %547 = vrsqrt.f32 %v396_v30 }
 0x41f   :  { %v397_v33 = vadd.f32 1e-05, %v393_v32 }
 0x421   :  { %549 = vrsqrt.f32 %v397_v33 }
 0x426   :  { %v544_v34 = vpop.eup %543 }
 0x427   :  { %v402_v36 = vmul.f32 %v544_v34, %v370_v7 }
 0x429   :  { %v412_v38 = vmul.f32 %v462_v35, %v402_v36 }
 0x42a   :  { %v546_v39 = vpop.eup %545 }
 0x42b   :  { %v548_v40 = vpop.eup %547  ;;  %v403_v41 = vmul.f32 %v546_v39, %v371_v2  ;;  %v422_v42 = vadd.f32 %v463_v37, %v412_v38 }
 0x42c   :  { %v404_v43 = vmul.f32 %v548_v40, %v372_v12 }
 0x42d   :  { %v413_v44 = vmul.f32 %v462_v35, %v403_v41  ;;  %426 = vst.msk [vmem:[#allocation2] sm:$0xff] %vm40_vm0, %v422_v42 }
 0x42e   :  { %v550_v45 = vpop.eup %549  ;;  %v414_v46 = vmul.f32 %v462_v35, %v404_v43 }
 0x42f   :  { %v405_v47 = vmul.f32 %v550_v45, %v373_v17  ;;  %v423_v48 = vadd.f32 %v463_v37, %v413_v44 }
 0x430   :  { %v424_v49 = vadd.f32 %v463_v37, %v414_v46 }
 0x431   :  { %v415_v50 = vmul.f32 %v462_v35, %v405_v47  ;;  %427 = vst.msk [vmem:[#allocation2 + $0x8] sm:$0xff] %vm40_vm0, %v423_v48 }
 0x432   :  { %428 = vst.msk [vmem:[#allocation2 + $0x10] sm:$0xff] %vm40_vm0, %v424_v49 }
 0x433   :  { %v425_v51 = vadd.f32 %v463_v37, %v415_v50 }
 0x435   :  { %429 = vst.msk [vmem:[#allocation2 + $0x18] sm:$0xff] %vm40_vm0, %v425_v51 }
 0x436   :  { %562 = shalt.err (!%p559_p4)
}
 0x437   :  { %s574_s20 = smov 128   ;;  %s575_s21 = smov 8  }
 0x438   :  { %441 = dma.vmem_to_hbm [thread:$0]  %s436_s3, 512, %s740_s9, [#allocation3], %s574_s20, %s574_s20, %s575_s21  }
 0x439   :  { %571 = dma.done.wait [#allocation3], 512  }
 0x43a   :  { %572 = vsyncadd [#allocation3], 4294966784 }
 0x43b   :  { %445 = vsyncpa [#allocation3], 1 }

</bundles_post_ra>
